<compile_context>
chip_gen: v7x
topology: tpu7x:2x2x1
jax: 0.10.0
libtpu: 0.0.40
codegen_flags: <defaults>
</compile_context>

<pallas_src>
import functools

import jax
import jax.numpy as jnp
import numpy as np
from jax.experimental import pallas as pl
from jax.experimental.pallas import tpu as pltpu

_BIG = 1e30  # "infinite" squared distance for cross-batch / padded points


def _round_up(x, m):
    return (x + m - 1) // m * m


def _fp_kernel(posb_ref, xs_ref, meta_ref, xw1_ref,
               w1b_ref, w2_ref, w3_ref, vec_ref,
               out_ref, *, k, d1, d2, d3):
    """One grid step: kNN-interpolate a tile of skip points + fused MLP."""
    posb = posb_ref[...]                         # [tm, 4]  f32: x, y, z, batch
    meta = meta_ref[...]                         # [4, Ns]  f32: x; y; z; batch

    # --- squared distances, seeded from coordinate 0 (one fewer live temp) ---
    diff = posb[:, 0:1] - meta[0:1, :]           # [tm, Ns]
    sqd = diff * diff
    for c in (1, 2):
        diff = posb[:, c:c + 1] - meta[c:c + 1, :]
        sqd = sqd + diff * diff
    # Mask cross-batch / padded sources in place; batch ids compared as f32
    # (exact for ids < 2^24).  No separate `valid` array is kept live.
    sqd = jnp.where(posb[:, 3:4] == meta[3:4, :], sqd, _BIG)

    # --- k-th smallest distance per row (k tiny & static -> unrolled) --------
    # TODO(synk): exact f32 ties select all tied entries (reference top_k
    #             counts duplicates); only diverges on exactly duplicated points.
    cur = sqd
    thr = None
    for _ in range(k):
        thr = jnp.min(cur, axis=-1, keepdims=True)
        cur = jnp.where(cur <= thr, _BIG, cur)

    # --- inverse-square-distance weights (masked entries give ~1e-30 -> noise)
    w = jnp.where(sqd <= thr,
                  pl.reciprocal(jnp.maximum(sqd, 1e-16), approx=True), 0.0)
    inv = pl.reciprocal(jnp.maximum(jnp.sum(w, axis=-1, keepdims=True), 1e-16),
                        approx=True)
    wn = (w * inv).astype(jnp.bfloat16)          # normalized weights [tm, Ns]

    # --- layer 1 fused with interpolation: wn @ (x_src @ W1a) + x_skip @ W1b --
    z1 = (jnp.dot(wn, xw1_ref[...], preferred_element_type=jnp.float32)
          + jnp.dot(xs_ref[...], w1b_ref[...], preferred_element_type=jnp.float32)
          + vec_ref[0:1, :d1])
    r1 = jnp.maximum(z1, 0.0).astype(jnp.bfloat16)
    z2 = jnp.dot(r1, w2_ref[...], preferred_element_type=jnp.float32) + vec_ref[1:2, :d2]
    r2 = jnp.maximum(z2, 0.0).astype(jnp.bfloat16)
    z3 = jnp.dot(r2, w3_ref[...], preferred_element_type=jnp.float32) + vec_ref[2:3, :d3]
    r3 = jnp.maximum(z3, 0.0)
    out_ref[...] = r3 * vec_ref[3:4, :d3] + vec_ref[4:5, :d3]


def _fold_params(params):
    """Fold BN of layers 1 and 2 into the next Lin's weights/bias (eval mode)."""
    (w1, b1, s1, t1), (w2, b2, s2, t2), (w3, b3, s3, t3) = params
    w2f = w2 * s1.reshape(-1, 1)
    b2f = b2 + t1 @ w2
    w3f = w3 * s2.reshape(-1, 1)
    b3f = b3 + t2 @ w3
    return (w1, b1), (w2f, b2f), (w3f, b3f), (s3, t3)


def fp_module(x, pos, batch, x_skip, pos_skip, batch_skip, params, *, k=3, tile_m=256):
    """JAX wrapper reproducing FPModule.forward (x_skip must not be None)."""
    n_src, c_src = x.shape
    n_skip, c_skip = x_skip.shape

    # ---- parameters: fold BN, split layer 1, cast matmul operands to bf16 ----
    (w1, b1), (w2f, b2f), (w3f, b3f), (s3, t3) = _fold_params(params)
    d1, d2, d3 = w1.shape[1], w2f.shape[1], w3f.shape[1]
    w1b = w1[c_src:].astype(jnp.bfloat16)
    w2b = w2f.astype(jnp.bfloat16)
    w3b = w3f.astype(jnp.bfloat16)

    # ---- source side: pad point count to a lane multiple, build resident slabs
    ns_pad = _round_up(n_src, 128)
    pad_s = ns_pad - n_src
    x_src_p = jnp.pad(x.astype(jnp.float32), ((0, pad_s), (0, 0)))
    pos_src_p = jnp.pad(pos.astype(jnp.float32), ((0, pad_s), (0, 0)))
    batch_src_p = jnp.pad(batch.astype(jnp.int32), (0, pad_s), constant_values=-2)
    src_meta = jnp.concatenate(
        [pos_src_p.T, batch_src_p.astype(jnp.float32)[None, :]], axis=0)   # [4, Ns]
    # Pre-project source features through the interpolation half of layer 1
    # (f32 matmul in the wrapper, then bf16): kernel never materializes interp.
    xw1 = (x_src_p @ w1[:c_src]).astype(jnp.bfloat16)                      # [Ns, d1]

    # ---- target (skip) side: bf16 feature stream + small f32 pos|batch stream
    nt_pad = _round_up(n_skip, tile_m)
    pad_t = nt_pad - n_skip
    xs_p = jnp.pad(x_skip.astype(jnp.float32),
                   ((0, pad_t), (0, 0))).astype(jnp.bfloat16)              # [Nt, c_skip]
    posb = jnp.concatenate(
        [jnp.pad(pos_skip.astype(jnp.float32), ((0, pad_t), (0, 0))),
         jnp.pad(batch_skip.astype(jnp.int32), (0, pad_t),
                 constant_values=-1).astype(jnp.float32)[:, None]], axis=1)  # [Nt, 4]

    # ---- stacked small vectors: b1 | b2 | b3 | s3 | t3 (padded to 8 sublanes) -
    cmax = max(d1, d2, d3)
    def _row(v, wdt):
        return jnp.pad(v.reshape(1, -1).astype(jnp.float32), ((0, 0), (0, cmax - wdt)))
    vecs = jnp.concatenate(
        [_row(b1, d1), _row(b2f, d2), _row(b3f, d3), _row(s3, d3), _row(t3, d3),
         jnp.zeros((3, cmax), jnp.float32)], axis=0)                        # [8, cmax]

    kernel = functools.partial(_fp_kernel, k=k, d1=d1, d2=d2, d3=d3)
    full = lambda i: (0, 0)

    out = pl.pallas_call(
        kernel,
        out_shape=jax.ShapeDtypeStruct((nt_pad, d3), jnp.float32),
        grid_spec=pltpu.PrefetchScalarGridSpec(
            num_scalar_prefetch=0,
            grid=(nt_pad // tile_m,),
            in_specs=[
                pl.BlockSpec((tile_m, 4), lambda i: (i, 0)),        # target pos|batch f32
                pl.BlockSpec((tile_m, c_skip), lambda i: (i, 0)),   # x_skip bf16 (tiled)
                pl.BlockSpec(src_meta.shape, full),                 # source pos/batch
                pl.BlockSpec(xw1.shape, full),                      # x_src @ W1a (bf16)
                pl.BlockSpec(w1b.shape, full),
                pl.BlockSpec(w2b.shape, full),
                pl.BlockSpec(w3b.shape, full),
                pl.BlockSpec(vecs.shape, full),                     # stacked b/scale/shift
            ],
            out_specs=pl.BlockSpec((tile_m, d3), lambda i: (i, 0)),
        ),
        compiler_params=pltpu.CompilerParams(
            dimension_semantics=("parallel",),          # disjoint output rows per step
            vmem_limit_bytes=32 * 1024 * 1024,          # above v5e's 16 MiB default,
                                                        # well inside v7x's 64 MiB/TC
        ),
    )(posb, xs_p, src_meta, xw1, w1b, w2b, w3b, vecs)

    return out[:n_skip], pos_skip, batch_skip


def _make_mlp_params(key, dims):
    """Deterministic Lin/ReLU/BN (eval-mode) parameters. BN as scale/shift."""
    params = []
    for din, dout in zip(dims[:-1], dims[1:]):
        key, kw, kb, kg, kbe = jax.random.split(key, 5)
        w = jax.random.normal(kw, (din, dout), jnp.float32) / jnp.sqrt(din)
        b = jax.random.normal(kb, (1, dout), jnp.float32) * 0.1
        gamma = 1.0 + 0.1 * jax.random.normal(kg, (1, dout), jnp.float32)
        beta = 0.1 * jax.random.normal(kbe, (1, dout), jnp.float32)
        # BN eval mode with running_mean=0, running_var=1, eps=1e-5
        scale = gamma / jnp.sqrt(1.0 + 1e-5)
        shift = beta
        params.append((w, b, scale, shift))
    return params


def _reference(x, pos, batch, x_skip, pos_skip, batch_skip, params, k):
    """Pure-JAX f32 reference of FPModule.forward feature output."""
    diff = pos_skip[:, None, :] - pos[None, :, :]
    d2 = diff[..., 0] ** 2 + diff[..., 1] ** 2 + diff[..., 2] ** 2
    valid = batch_skip[:, None] == batch[None, :]
    d2m = jnp.where(valid, d2, _BIG)
    kth = -jax.lax.top_k(-d2m, k)[0][:, k - 1:k]          # k-th smallest per row
    sel = (d2m <= kth) & valid
    w = jnp.where(sel, 1.0 / jnp.maximum(d2, 1e-16), 0.0)
    wn = w / jnp.maximum(jnp.sum(w, axis=-1, keepdims=True), 1e-16)
    h = jnp.concatenate([wn @ x, x_skip], axis=1)
    for wl, bl, sl, tl in params:
        h = jnp.maximum(h @ wl + bl, 0.0) * sl + tl
    return h


if __name__ == "__main__":
    key = jax.random.PRNGKey(0)
    ks = jax.random.split(key, 5)

    B = 2
    N_SRC, C_SRC = 64, 64          # coarse level (features to propagate)
    N_SKIP, C_SKIP = 512, 64       # fine level (skip connection)
    K = 3
    dims = (C_SRC + C_SKIP, 128, 128, 128)   # MLP([Cin, 128, 128, 128])

    x = jax.random.normal(ks[0], (N_SRC, C_SRC), jnp.float32)
    pos = jax.random.normal(ks[1], (N_SRC, 3), jnp.float32)
    batch = jnp.repeat(jnp.arange(B, dtype=jnp.int32), N_SRC // B)

    x_skip = jax.random.normal(ks[2], (N_SKIP, C_SKIP), jnp.float32)
    pos_skip = jax.random.normal(ks[3], (N_SKIP, 3), jnp.float32)
    batch_skip = jnp.repeat(jnp.arange(B, dtype=jnp.int32), N_SKIP // B)

    params = _make_mlp_params(ks[4], dims)

    feat, pos_out, batch_out = fp_module(
        x, pos, batch, x_skip, pos_skip, batch_skip, params, k=K, tile_m=256)
    jax.block_until_ready((feat, pos_out, batch_out))

    ref = _reference(x, pos, batch, x_skip, pos_skip, batch_skip, params, K)
    # Tolerance relaxed because the kernel runs feature matmuls with bf16
    # operands (f32 accumulation) and approximate reciprocals in the weights;
    # neighbor selection itself is exact f32.
    np.testing.assert_allclose(np.asarray(feat), np.asarray(ref), rtol=5e-2, atol=5e-2)
    assert feat.shape == (N_SKIP, dims[-1]) and feat.dtype == jnp.float32
    assert pos_out.shape == (N_SKIP, 3) and batch_out.shape == (N_SKIP,)

    print("KERNEL_OK")
</pallas_src>

<mosaic_0001>
module attributes {stable_mosaic.version = 11 : i64} {
  func.func @_fp_kernel(%arg0: i32, %arg1: memref<256x4xf32, #tpu.memory_space<vmem>>, %arg2: memref<256x64xbf16, #tpu.memory_space<vmem>>, %arg3: memref<4x128xf32, #tpu.memory_space<vmem>>, %arg4: memref<128x128xbf16, #tpu.memory_space<vmem>>, %arg5: memref<64x128xbf16, #tpu.memory_space<vmem>>, %arg6: memref<128x128xbf16, #tpu.memory_space<vmem>>, %arg7: memref<128x128xbf16, #tpu.memory_space<vmem>>, %arg8: memref<8x128xf32, #tpu.memory_space<vmem>>, %arg9: memref<256x128xf32, #tpu.memory_space<vmem>>) attributes {dimension_semantics = [#tpu.dimension_semantics<parallel>], iteration_bounds = array<i64: 2>, scalar_prefetch = 0 : i64, scratch_operands = 0 : i64, tpu.core_type = #tpu.core_type<tc>, window_params = [{transform_indices = @transform_0, window_bounds = array<i64: 256, 4>}, {transform_indices = @transform_1, window_bounds = array<i64: 256, 64>}, {pipeline_mode = #tpu.pipeline_mode<synchronous>, transform_indices = @transform_2, window_bounds = array<i64: 4, 128>}, {pipeline_mode = #tpu.pipeline_mode<synchronous>, transform_indices = @transform_3, window_bounds = array<i64: 128, 128>}, {pipeline_mode = #tpu.pipeline_mode<synchronous>, transform_indices = @transform_4, window_bounds = array<i64: 64, 128>}, {pipeline_mode = #tpu.pipeline_mode<synchronous>, transform_indices = @transform_5, window_bounds = array<i64: 128, 128>}, {pipeline_mode = #tpu.pipeline_mode<synchronous>, transform_indices = @transform_6, window_bounds = array<i64: 128, 128>}, {pipeline_mode = #tpu.pipeline_mode<synchronous>, transform_indices = @transform_7, window_bounds = array<i64: 8, 128>}, {transform_indices = @transform_8, window_bounds = array<i64: 256, 128>}]} {
    %c0 = arith.constant 0 : index
    %c0_0 = arith.constant 0 : index
    %0 = vector.load %arg1[%c0, %c0_0] : memref<256x4xf32, #tpu.memory_space<vmem>>, vector<256x4xf32>
    %c0_1 = arith.constant 0 : index
    %c0_2 = arith.constant 0 : index
    %1 = vector.load %arg3[%c0_1, %c0_2] : memref<4x128xf32, #tpu.memory_space<vmem>>, vector<4x128xf32>
    %2 = vector.extract_strided_slice %0 {offsets = [0, 0], sizes = [256, 1], strides = [1, 1]} : vector<256x4xf32> to vector<256x1xf32>
    %3 = vector.extract_strided_slice %1 {offsets = [0, 0], sizes = [1, 128], strides = [1, 1]} : vector<4x128xf32> to vector<1x128xf32>
    %4 = vector.broadcast %2 : vector<256x1xf32> to vector<256x128xf32>
    %5 = vector.broadcast %3 : vector<1x128xf32> to vector<256x128xf32>
    %6 = arith.subf %4, %5 : vector<256x128xf32>
    %7 = arith.mulf %6, %6 : vector<256x128xf32>
    %8 = vector.extract_strided_slice %0 {offsets = [0, 1], sizes = [256, 1], strides = [1, 1]} : vector<256x4xf32> to vector<256x1xf32>
    %9 = vector.extract_strided_slice %1 {offsets = [1, 0], sizes = [1, 128], strides = [1, 1]} : vector<4x128xf32> to vector<1x128xf32>
    %10 = vector.broadcast %8 : vector<256x1xf32> to vector<256x128xf32>
    %11 = vector.broadcast %9 : vector<1x128xf32> to vector<256x128xf32>
    %12 = arith.subf %10, %11 : vector<256x128xf32>
    %13 = arith.mulf %12, %12 : vector<256x128xf32>
    %14 = arith.addf %7, %13 : vector<256x128xf32>
    %15 = vector.extract_strided_slice %0 {offsets = [0, 2], sizes = [256, 1], strides = [1, 1]} : vector<256x4xf32> to vector<256x1xf32>
    %16 = vector.extract_strided_slice %1 {offsets = [2, 0], sizes = [1, 128], strides = [1, 1]} : vector<4x128xf32> to vector<1x128xf32>
    %17 = vector.broadcast %15 : vector<256x1xf32> to vector<256x128xf32>
    %18 = vector.broadcast %16 : vector<1x128xf32> to vector<256x128xf32>
    %19 = arith.subf %17, %18 : vector<256x128xf32>
    %20 = arith.mulf %19, %19 : vector<256x128xf32>
    %21 = arith.addf %14, %20 : vector<256x128xf32>
    %22 = vector.extract_strided_slice %0 {offsets = [0, 3], sizes = [256, 1], strides = [1, 1]} : vector<256x4xf32> to vector<256x1xf32>
    %23 = vector.extract_strided_slice %1 {offsets = [3, 0], sizes = [1, 128], strides = [1, 1]} : vector<4x128xf32> to vector<1x128xf32>
    %24 = vector.broadcast %22 : vector<256x1xf32> to vector<256x128xf32>
    %25 = vector.broadcast %23 : vector<1x128xf32> to vector<256x128xf32>
    %26 = arith.cmpf oeq, %24, %25 : vector<256x128xf32>
    %cst = arith.constant 1.000000e+30 : f32
    %27 = vector.broadcast %cst : f32 to vector<256x128xf32>
    %28 = arith.select %26, %21, %27 : vector<256x128xi1>, vector<256x128xf32>
    %cst_3 = arith.constant dense<0x7F800000> : vector<256xf32>
    %29 = vector.multi_reduction <minimumf>, %28, %cst_3 [1] : vector<256x128xf32> to vector<256xf32>
    %30 = vector.shape_cast %29 : vector<256xf32> to vector<256x1xf32>
    %31 = vector.broadcast %30 : vector<256x1xf32> to vector<256x128xf32>
    %32 = arith.cmpf ole, %28, %31 : vector<256x128xf32>
    %cst_4 = arith.constant 1.000000e+30 : f32
    %33 = vector.broadcast %cst_4 : f32 to vector<256x128xf32>
    %34 = arith.select %32, %33, %28 : vector<256x128xi1>, vector<256x128xf32>
    %cst_5 = arith.constant dense<0x7F800000> : vector<256xf32>
    %35 = vector.multi_reduction <minimumf>, %34, %cst_5 [1] : vector<256x128xf32> to vector<256xf32>
    %36 = vector.shape_cast %35 : vector<256xf32> to vector<256x1xf32>
    %37 = vector.broadcast %36 : vector<256x1xf32> to vector<256x128xf32>
    %38 = arith.cmpf ole, %34, %37 : vector<256x128xf32>
    %cst_6 = arith.constant 1.000000e+30 : f32
    %39 = vector.broadcast %cst_6 : f32 to vector<256x128xf32>
    %40 = arith.select %38, %39, %34 : vector<256x128xi1>, vector<256x128xf32>
    %cst_7 = arith.constant dense<0x7F800000> : vector<256xf32>
    %41 = vector.multi_reduction <minimumf>, %40, %cst_7 [1] : vector<256x128xf32> to vector<256xf32>
    %42 = vector.shape_cast %41 : vector<256xf32> to vector<256x1xf32>
    %43 = vector.broadcast %42 : vector<256x1xf32> to vector<256x128xf32>
    %44 = arith.cmpf ole, %28, %43 : vector<256x128xf32>
    %cst_8 = arith.constant 1.000000e-16 : f32
    %45 = vector.broadcast %cst_8 : f32 to vector<256x128xf32>
    %46 = arith.maximumf %28, %45 : vector<256x128xf32>
    %47 = tpu.reciprocal %46 {approx = true} : vector<256x128xf32> -> vector<256x128xf32>
    %cst_9 = arith.constant 0.000000e+00 : f32
    %48 = vector.broadcast %cst_9 : f32 to vector<256x128xf32>
    %49 = arith.select %44, %47, %48 : vector<256x128xi1>, vector<256x128xf32>
    %cst_10 = arith.constant dense<0.000000e+00> : vector<256xf32>
    %50 = vector.multi_reduction <add>, %49, %cst_10 [1] : vector<256x128xf32> to vector<256xf32>
    %51 = vector.shape_cast %50 : vector<256xf32> to vector<256x1xf32>
    %cst_11 = arith.constant 1.000000e-16 : f32
    %52 = vector.broadcast %cst_11 : f32 to vector<256x1xf32>
    %53 = arith.maximumf %51, %52 : vector<256x1xf32>
    %54 = tpu.reciprocal %53 {approx = true} : vector<256x1xf32> -> vector<256x1xf32>
    %55 = vector.broadcast %54 : vector<256x1xf32> to vector<256x128xf32>
    %56 = arith.mulf %49, %55 : vector<256x128xf32>
    %57 = arith.truncf %56 : vector<256x128xf32> to vector<256x128xbf16>
    %c0_12 = arith.constant 0 : index
    %c0_13 = arith.constant 0 : index
    %58 = vector.load %arg4[%c0_12, %c0_13] : memref<128x128xbf16, #tpu.memory_space<vmem>>, vector<128x128xbf16>
    %cst_14 = arith.constant dense<0.000000e+00> : vector<256x128xf32>
    %59 = tpu.matmul %57, %58, %cst_14 {dimension_numbers = #tpu.dot_dimension_numbers<[1], [0], [0], [1], [0, 0, 1, 1], [], []>} : vector<256x128xbf16>, vector<128x128xbf16>, vector<256x128xf32> -> vector<256x128xf32>
    %c0_15 = arith.constant 0 : index
    %c0_16 = arith.constant 0 : index
    %60 = vector.load %arg2[%c0_15, %c0_16] : memref<256x64xbf16, #tpu.memory_space<vmem>>, vector<256x64xbf16>
    %c0_17 = arith.constant 0 : index
    %c0_18 = arith.constant 0 : index
    %61 = vector.load %arg5[%c0_17, %c0_18] : memref<64x128xbf16, #tpu.memory_space<vmem>>, vector<64x128xbf16>
    %cst_19 = arith.constant dense<0.000000e+00> : vector<256x128xf32>
    %62 = tpu.matmul %60, %61, %cst_19 {dimension_numbers = #tpu.dot_dimension_numbers<[1], [0], [0], [1], [0, 0, 1, 1], [], []>} : vector<256x64xbf16>, vector<64x128xbf16>, vector<256x128xf32> -> vector<256x128xf32>
    %63 = arith.addf %59, %62 : vector<256x128xf32>
    %c0_20 = arith.constant 0 : index
    %c0_21 = arith.constant 0 : index
    %64 = vector.load %arg8[%c0_20, %c0_21] : memref<8x128xf32, #tpu.memory_space<vmem>>, vector<1x128xf32>
    %65 = vector.broadcast %64 : vector<1x128xf32> to vector<256x128xf32>
    %66 = arith.addf %63, %65 : vector<256x128xf32>
    %cst_22 = arith.constant 0.000000e+00 : f32
    %67 = vector.broadcast %cst_22 : f32 to vector<256x128xf32>
    %68 = arith.maximumf %66, %67 : vector<256x128xf32>
    %69 = arith.truncf %68 : vector<256x128xf32> to vector<256x128xbf16>
    %c0_23 = arith.constant 0 : index
    %c0_24 = arith.constant 0 : index
    %70 = vector.load %arg6[%c0_23, %c0_24] : memref<128x128xbf16, #tpu.memory_space<vmem>>, vector<128x128xbf16>
    %cst_25 = arith.constant dense<0.000000e+00> : vector<256x128xf32>
    %71 = tpu.matmul %69, %70, %cst_25 {dimension_numbers = #tpu.dot_dimension_numbers<[1], [0], [0], [1], [0, 0, 1, 1], [], []>} : vector<256x128xbf16>, vector<128x128xbf16>, vector<256x128xf32> -> vector<256x128xf32>
    %c1 = arith.constant 1 : index
    %c0_26 = arith.constant 0 : index
    %72 = vector.load %arg8[%c1, %c0_26] : memref<8x128xf32, #tpu.memory_space<vmem>>, vector<1x128xf32>
    %73 = vector.broadcast %72 : vector<1x128xf32> to vector<256x128xf32>
    %74 = arith.addf %71, %73 : vector<256x128xf32>
    %cst_27 = arith.constant 0.000000e+00 : f32
    %75 = vector.broadcast %cst_27 : f32 to vector<256x128xf32>
    %76 = arith.maximumf %74, %75 : vector<256x128xf32>
    %77 = arith.truncf %76 : vector<256x128xf32> to vector<256x128xbf16>
    %c0_28 = arith.constant 0 : index
    %c0_29 = arith.constant 0 : index
    %78 = vector.load %arg7[%c0_28, %c0_29] : memref<128x128xbf16, #tpu.memory_space<vmem>>, vector<128x128xbf16>
    %cst_30 = arith.constant dense<0.000000e+00> : vector<256x128xf32>
    %79 = tpu.matmul %77, %78, %cst_30 {dimension_numbers = #tpu.dot_dimension_numbers<[1], [0], [0], [1], [0, 0, 1, 1], [], []>} : vector<256x128xbf16>, vector<128x128xbf16>, vector<256x128xf32> -> vector<256x128xf32>
    %c2 = arith.constant 2 : index
    %c0_31 = arith.constant 0 : index
    %80 = vector.load %arg8[%c2, %c0_31] : memref<8x128xf32, #tpu.memory_space<vmem>>, vector<1x128xf32>
    %81 = vector.broadcast %80 : vector<1x128xf32> to vector<256x128xf32>
    %82 = arith.addf %79, %81 : vector<256x128xf32>
    %cst_32 = arith.constant 0.000000e+00 : f32
    %83 = vector.broadcast %cst_32 : f32 to vector<256x128xf32>
    %84 = arith.maximumf %82, %83 : vector<256x128xf32>
    %c3 = arith.constant 3 : index
    %c0_33 = arith.constant 0 : index
    %85 = vector.load %arg8[%c3, %c0_33] : memref<8x128xf32, #tpu.memory_space<vmem>>, vector<1x128xf32>
    %86 = vector.broadcast %85 : vector<1x128xf32> to vector<256x128xf32>
    %87 = arith.mulf %84, %86 : vector<256x128xf32>
    %c4 = arith.constant 4 : index
    %c0_34 = arith.constant 0 : index
    %88 = vector.load %arg8[%c4, %c0_34] : memref<8x128xf32, #tpu.memory_space<vmem>>, vector<1x128xf32>
    %89 = vector.broadcast %88 : vector<1x128xf32> to vector<256x128xf32>
    %90 = arith.addf %87, %89 : vector<256x128xf32>
    %c0_35 = arith.constant 0 : index
    %c0_36 = arith.constant 0 : index
    %91 = vector.load %arg9[%c0_35, %c0_36] : memref<256x128xf32, #tpu.memory_space<vmem>>, vector<256x128xf32>
    tpu.vector_store %arg9[%c0_35, %c0_36], %90 {strides = array<i32>} : memref<256x128xf32, #tpu.memory_space<vmem>>, vector<256x128xf32>,
    return
  }
  func.func @transform_0(%arg0: i32) -> (i32, i32) {
    %c0_i32 = arith.constant 0 : i32
    %c0_i32_0 = arith.constant 0 : i32
    return %arg0, %c0_i32 : i32, i32
  }
  func.func @transform_1(%arg0: i32) -> (i32, i32) {
    %c0_i32 = arith.constant 0 : i32
    %c0_i32_0 = arith.constant 0 : i32
    return %arg0, %c0_i32 : i32, i32
  }
  func.func @transform_2(%arg0: i32) -> (i32, i32) {
    %c0_i32 = arith.constant 0 : i32
    %c0_i32_0 = arith.constant 0 : i32
    %c0_i32_1 = arith.constant 0 : i32
    return %c0_i32, %c0_i32_0 : i32, i32
  }
  func.func @transform_3(%arg0: i32) -> (i32, i32) {
    %c0_i32 = arith.constant 0 : i32
    %c0_i32_0 = arith.constant 0 : i32
    %c0_i32_1 = arith.constant 0 : i32
    return %c0_i32, %c0_i32_0 : i32, i32
  }
  func.func @transform_4(%arg0: i32) -> (i32, i32) {
    %c0_i32 = arith.constant 0 : i32
    %c0_i32_0 = arith.constant 0 : i32
    %c0_i32_1 = arith.constant 0 : i32
    return %c0_i32, %c0_i32_0 : i32, i32
  }
  func.func @transform_5(%arg0: i32) -> (i32, i32) {
    %c0_i32 = arith.constant 0 : i32
    %c0_i32_0 = arith.constant 0 : i32
    %c0_i32_1 = arith.constant 0 : i32
    return %c0_i32, %c0_i32_0 : i32, i32
  }
  func.func @transform_6(%arg0: i32) -> (i32, i32) {
    %c0_i32 = arith.constant 0 : i32
    %c0_i32_0 = arith.constant 0 : i32
    %c0_i32_1 = arith.constant 0 : i32
    return %c0_i32, %c0_i32_0 : i32, i32
  }
  func.func @transform_7(%arg0: i32) -> (i32, i32) {
    %c0_i32 = arith.constant 0 : i32
    %c0_i32_0 = arith.constant 0 : i32
    %c0_i32_1 = arith.constant 0 : i32
    return %c0_i32, %c0_i32_0 : i32, i32
  }
  func.func @transform_8(%arg0: i32) -> (i32, i32) {
    %c0_i32 = arith.constant 0 : i32
    %c0_i32_0 = arith.constant 0 : i32
    return %arg0, %c0_i32 : i32, i32
  }
}

</mosaic_0001>

<bundles_post_ra>
// kernel: tpu_custom_call.1
= control target key start
LH: loop header
LB: loop body
LE: loop exit
PB: predicated region body
PF: predicated region fallthrough
CT: control target
= control target key end

     0   :  { %13 = vsyncpa [#allocation3], 0  ;;  %s5683_s0 = inlined_call_operand.vmem [shape: f32[512,4], index: 0, kind: input, shape index: {}]   ;;  %s5684_s1 = inlined_call_operand.vmem [shape: bf16[512,64], index: 1, kind: input, shape index: {}]   ;;  %s5685_s2 = inlined_call_operand.vmem [shape: f32[4,128], index: 2, kind: input, shape index: {}]   ;;  %s5686_s3 = inlined_call_operand.vmem [shape: bf16[128,128], index: 3, kind: input, shape index: {}]   ;;  %s5687_s4 = inlined_call_operand.vmem [shape: bf16[64,128], index: 4, kind: input, shape index: {}]   ;;  %s5688_s5 = inlined_call_operand.vmem [shape: bf16[128,128], index: 5, kind: input, shape index: {}]   ;;  %s5689_s6 = inlined_call_operand.vmem [shape: bf16[128,128], index: 6, kind: input, shape index: {}]   ;;  %s5690_s7 = inlined_call_operand.vmem [shape: f32[8,128], index: 7, kind: input, shape index: {}]   ;;  %s5691_s8 = inlined_call_operand.hbm [shape: f32[512,128], index: 8, kind: output, shape index: {}]  }
   0x1   :  { %15 = vsyncpa [#allocation3 + $0x1], 0  ;;  %s4060_s27 = smov 0   ;;  %s4062_s28 = smov 0  }
   0x2   :  { %s4064_s29 = smov 0   ;;  %s4066_s30 = smov 0  }
   0x3 LB: > { %s4081_s9 = sadd.s32 4294967295, %s4006_s30   ;;  %s3265_s10 = sadd.s32 4294967294, %s4006_s30   ;;  %s4006_s30 = sphi %s4066_s30, %s5779_s30   ;;  %s4002_s29 = sphi %s4064_s29, %s5778_s29   ;;  %s3998_s28 = sphi %s4062_s28, %s5777_s28   ;;  %s3994_s27 = sphi %s4060_s27, %s5776_s27  }
   0x4   : > { %s4085_s11 = sadd.s32 1, %s4006_s30   ;;  %s206_s12 = sadd.s32 1, %s4002_s29 }
   0x5   : > { %s203_s13 = ssub.s32 %s4006_s30, %s4085_s11  ;;  %p216_p0 = scmp.ne.s32.totalorder %s4002_s29, %s3998_s28 }
   0x6   : > { %p204_p1 = scmp.eq.s32.totalorder %s203_s13, 0  ;;  %p217_p2 = scmp.eq.s32.totalorder %s4081_s9, 1 }
   0x7   : > { %p222_p3 = scmp.ne.s32.totalorder %s3998_s28, %s3994_s27  ;;  %p223_p4 = scmp.eq.s32.totalorder %s3265_s10, 1 }
   0x8   : > { %s4096_s14 = scalar_select %p204_p1, %s4002_s29, %s206_s12  }
   0x9   : > { %p4098_p5 = por %p217_p2, %p216_p0  ;;  %p4102_p6 = por %p223_p4, %p222_p3 }
   0xa   : > { %p3268_p7 = scmp.ge.s32.totalorder %s4006_s30, 1  ;;  %p277_p8 = scmp.lt.s32.totalorder %s4006_s30, 3 }
   0xc   : > { %p278_p9 = pnand %p3268_p7, %p277_p8 }
   0xe   : > { %281 = sbr.rel (%p278_p9) target bundleno = 1812 (0x714), region = 52 }
  0x15   : > { %s3270_s17 = sshll.u32 %s4081_s9, 5  ;;  %v5692_v0 = vmov 1   ;;  %v5696_v8 = vmov 0   ;;  %v5694_v11 = vmov 2   ;;  %v5698_v13 = vmov 3   ;;  %s313_s25 = sand.u32 1, %s3998_s28  }
  0x16   : > { %3716 = vset.pattern.permute.xlu0 %v5692_v0  ;;  %3714 = vset.pattern.permute.xlu1 %v5692_v0  ;;  %p317_p10 = scmp.lt.s32.totalorder %s3270_s17, 63  ;;  %s3269_s12 = sshll.u32 %s313_s25, 8 }
  0x17   : > { %s5511_s19 = scalar_lea.vmem [#allocation2], %s3269_s12  ;;  %s4012_s26 = smov [#allocation2]  }
  0x18   : > { %s5781_s17 = smov (!%p317_p10, %s3270_s17), 63  ;;  %s3948_s10 = sshll.u32 %s4012_s26, 4  ;;  %s3949_s10 = int_to_ptr.vmem [resolvable:$false] %s3948_s10 }
  0x19   : > { %s3271_s18 = sshll.u32 %s5781_s17, 3  ;;  %s3273_s20 = sshll.u32 %s5781_s17, 2 }
  0x1a   : > { %s4117_s21 = scalar_lea.vmem %s5683_s0, %s3271_s18  ;;  %s5085_s23 = scalar_lea.vmem %s5684_s1, %s3273_s20 }
  0x1b   : > { %v4120_v1 = vld [vmem:[%s4117_s21 + $0x10] sm:$0xff]  ;;  %v4123_v2 = vld [vmem:[%s4117_s21] sm:$0xff]  ;;  %v4131_v4 = vld [vmem:[%s4117_s21 + $0x8] sm:$0xff]  ;;  %s3344_s20 = sshll.u32 %s4081_s9, 12  ;;  %s5642_s9 = scalar_lea.sflag [#allocation3], %s313_s25 }
  0x1c   : > { %600 = vperm.xlu0 %3716, %v4120_v1   ;;  %592 = vperm.xlu1 %3714, %v4123_v2   ;;  %v4128_v3 = vld [vmem:[%s4117_s21 + $0x40] sm:$0xff]  ;;  %v4136_v5 = vld [vmem:[%s4117_s21 + $0x50] sm:$0xff]  ;;  %v333_v6 = vld [vmem:[%s4117_s21 + $0x18] sm:$0xff]  ;;  %s5632_s24 = scalar_lea.hbm %s5691_s8, %s3344_s20  ;;  %s3950_s12 = scalar_lea.vmem %s3949_s10, 8192 }
  0x1d   : > { %v4140_v7 = vld [vmem:[%s4117_s21 + $0x80] sm:$0xff]  ;;  %v4145_v9 = vld [vmem:[%s4117_s21 + $0x90] sm:$0xff]  ;;  %v4170_v15 = vld [vmem:[%s4117_s21 + $0x28] sm:$0xff] }
  0x1e   : > { %v4150_v10 = vld [vmem:[%s4117_s21 + $0xc0] sm:$0xff]  ;;  %v4156_v12 = vld [vmem:[%s4117_s21 + $0xd0] sm:$0xff]  ;;  %v4175_v16 = vld [vmem:[%s4117_s21 + $0x38] sm:$0xff] }
  0x1f   : > { %v334_v14 = vld [vmem:[%s4117_s21 + $0x20] sm:$0xff]  ;;  %v4180_v17 = vld [vmem:[%s4117_s21 + $0x68] sm:$0xff]  ;;  %v4185_v18 = vld [vmem:[%s4117_s21 + $0x78] sm:$0xff] }
  0x20   : > { %624 = vperm.xlu0 %3716, %v4128_v3   ;;  %596 = vperm.xlu1 %3714, %v4131_v4   ;;  %v336_v19 = vld [vmem:[%s4117_s21 + $0x30] sm:$0xff]  ;;  %v4190_v20 = vld [vmem:[%s4117_s21 + $0xa8] sm:$0xff]  ;;  %v4195_v21 = vld [vmem:[%s4117_s21 + $0xb8] sm:$0xff] }
  0x21   : > { %v4200_v22 = vld [vmem:[%s4117_s21 + $0xe8] sm:$0xff]  ;;  %v4205_v23 = vld [vmem:[%s4117_s21 + $0xf8] sm:$0xff]  ;;  %v4218_v25 = vld [vmem:[%s4117_s21 + $0x60] sm:$0xff] }
  0x22   : > { %v339_v24 = vld [vmem:[%s4117_s21 + $0x48] sm:$0xff]  ;;  %v4229_v27 = vld [vmem:[%s4117_s21 + $0xa0] sm:$0xff]  ;;  %v341_v28 = vld [vmem:[%s4117_s21 + $0x58] sm:$0xff] }
  0x23   : > { %v4224_v26 = vld [vmem:[%s4117_s21 + $0x88] sm:$0xff]  ;;  %v4242_v30 = vld [vmem:[%s4117_s21 + $0xe0] sm:$0xff]  ;;  %v344_v44 = vld [vmem:[%s4117_s21 + $0x70] sm:$0xff] }
  0x24   : > { %632 = vperm.xlu0 %3716, %v4136_v5   ;;  %3715 = vset.pattern.permute.xlu1 %v5696_v8  ;;  %v4237_v29 = vld [vmem:[%s4117_s21 + $0xc8] sm:$0xff] }
  0x25   : > { %380 = vperm.xlu1 %3715, %v333_v6  }
  0x28   : > { %656 = vperm.xlu0 %3716, %v4140_v7  }
  0x29   : > { %3717 = vset.pattern.permute.xlu1 %v5692_v0 }
  0x2a   : > { %604 = vperm.xlu1 %3717, %v333_v6  }
  0x2c   : > { %664 = vperm.xlu0 %3716, %v4145_v9  }
  0x2e   : > { %3718 = vset.pattern.permute.xlu1 %v5694_v11 }
  0x2f   : > { %820 = vperm.xlu1 %3718, %v4123_v2  }
  0x30   : > { %688 = vperm.xlu0 %3716, %v4150_v10  }
  0x33   : > { %828 = vperm.xlu1 %3718, %v4120_v1  }
  0x34   : > { %696 = vperm.xlu0 %3716, %v4156_v12  }
  0x37   : > { %832 = vperm.xlu1 %3718, %v333_v6  }
  0x38   : > { %3759 = vset.pattern.permute.xlu0 %v5696_v8 }
  0x39   : > { %365 = vperm.xlu0 %3759, %v4123_v2  }
  0x3b   : > { %3719 = vset.pattern.permute.xlu1 %v5698_v13 }
  0x3c   : > { %1052 = vperm.xlu1 %3719, %v4131_v4  }
  0x3d   : > { %370 = vperm.xlu0 %3759, %v4131_v4  }
  0x40   : > { %3720 = vset.pattern.permute.xlu1 %v5696_v8 }
  0x41   : > { %375 = vperm.xlu0 %3759, %v4120_v1   ;;  %385 = vperm.xlu1 %3720, %v334_v14  }
  0x45   : > { %390 = vperm.xlu0 %3759, %v4170_v15   ;;  %3721 = vset.pattern.permute.xlu1 %v5692_v0 }
  0x46   : > { %608 = vperm.xlu1 %3721, %v334_v14  }
  0x49   : > { %400 = vperm.xlu0 %3759, %v4175_v16  }
  0x4a   : > { %612 = vperm.xlu1 %3721, %v4170_v15  }
  0x4d   : > { %430 = vperm.xlu0 %3759, %v4180_v17  }
  0x4e   : > { %3722 = vset.pattern.permute.xlu1 %v5698_v13 }
  0x4f   : > { %1060 = vperm.xlu1 %3722, %v333_v6  }
  0x51   : > { %440 = vperm.xlu0 %3759, %v4185_v18  }
  0x53   : > { %3723 = vset.pattern.permute.xlu1 %v5696_v8 }
  0x54   : > { %395 = vperm.xlu1 %3723, %v336_v19  }
  0x55   : > { %470 = vperm.xlu0 %3759, %v4190_v20  }
  0x58   : > { %3724 = vset.pattern.permute.xlu1 %v5692_v0 }
  0x59   : > { %480 = vperm.xlu0 %3759, %v4195_v21   ;;  %616 = vperm.xlu1 %3724, %v336_v19  }
  0x5d   : > { %510 = vperm.xlu0 %3759, %v4200_v22   ;;  %620 = vperm.xlu1 %3724, %v4175_v16  }
  0x61   : > { %520 = vperm.xlu0 %3759, %v4205_v23   ;;  %3725 = vset.pattern.permute.xlu1 %v5694_v11 }
  0x62   : > { %840 = vperm.xlu1 %3725, %v4170_v15  }
  0x65   : > { %3767 = vset.pattern.permute.xlu0 %v5694_v11 }
  0x66   : > { %824 = vperm.xlu0 %3767, %v4131_v4   ;;  %844 = vperm.xlu1 %3725, %v336_v19  }
  0x6a   : > { %836 = vperm.xlu0 %3767, %v334_v14   ;;  %3726 = vset.pattern.permute.xlu1 %v5698_v13 }
  0x6b   : > { %1064 = vperm.xlu1 %3726, %v334_v14  }
  0x6e   : > { %848 = vperm.xlu0 %3767, %v4175_v16  }
  0x6f   : > { %3727 = vset.pattern.permute.xlu1 %v5696_v8 }
  0x70   : > { %405 = vperm.xlu1 %3727, %v4128_v3  }
  0x72   : > { %856 = vperm.xlu0 %3767, %v339_v24  }
  0x74   : > { %410 = vperm.xlu1 %3727, %v339_v24  }
  0x76   : > { %868 = vperm.xlu0 %3767, %v4218_v25  }
  0x78   : > { %3728 = vset.pattern.permute.xlu1 %v5692_v0 }
  0x79   : > { %628 = vperm.xlu1 %3728, %v339_v24  }
  0x7a   : > { %880 = vperm.xlu0 %3767, %v4185_v18  }
  0x7d   : > { %3729 = vset.pattern.permute.xlu1 %v5698_v13 }
  0x7e   : > { %888 = vperm.xlu0 %3767, %v4224_v26   ;;  %1072 = vperm.xlu1 %3729, %v336_v19  }
  0x82   : > { %900 = vperm.xlu0 %3767, %v4229_v27   ;;  %3730 = vset.pattern.permute.xlu1 %v5696_v8 }
  0x83   : > { %415 = vperm.xlu1 %3730, %v4136_v5  }
  0x86   : > { %912 = vperm.xlu0 %3767, %v4195_v21  }
  0x87   : > { %420 = vperm.xlu1 %3730, %v341_v28  }
  0x8a   : > { %920 = vperm.xlu0 %3767, %v4237_v29  }
  0x8b   : > { %3731 = vset.pattern.permute.xlu1 %v5692_v0 }
  0x8c   : > { %636 = vperm.xlu1 %3731, %v341_v28  }
  0x8e   : > { %932 = vperm.xlu0 %3767, %v4242_v30  }
  0x90   : > { %3732 = vset.pattern.permute.xlu1 %v5694_v11 }
  0x91   : > { %852 = vperm.xlu1 %3732, %v4128_v3  }
  0x92   : > { %944 = vperm.xlu0 %3767, %v4205_v23  }
  0x95   : > { %860 = vperm.xlu1 %3732, %v4136_v5  }
  0x96   : > { %3770 = vset.pattern.permute.xlu0 %v5698_v13 }
  0x97   : > { %1048 = vperm.xlu0 %3770, %v4123_v2  }
  0x99   : > { %864 = vperm.xlu1 %3732, %v341_v28  }
  0x9b   : > { %1056 = vperm.xlu0 %3770, %v4120_v1   ;;  %v4252_v31 = vpop.permute.xlu1 %592  ;;  %v4254_v32 = vpop.permute.xlu0 %600 }
  0x9d   : > { %3733 = vset.pattern.permute.xlu1 %v5698_v13 }
  0x9e   : > { %1084 = vperm.xlu1 %3733, %v339_v24  }
  0x9f   : > { %1068 = vperm.xlu0 %3770, %v4170_v15   ;;  %v4258_v33 = vpop.permute.xlu1 %596  ;;  %v4260_v34 = vpop.permute.xlu0 %624 }
  0xa0   : > { %5718 = vst [vmem:[#allocation5_spill] sm:$0xff] %v4260_v34 }
  0xa2   : > { %3734 = vset.pattern.permute.xlu1 %v5696_v8 }
  0xa3   : > { %1076 = vperm.xlu0 %3770, %v4175_v16   ;;  %425 = vperm.xlu1 %3734, %v4218_v25   ;;  %v4265_v35 = vpop.permute.xlu0 %632 }
  0xa4   : > { %5719 = vst [vmem:[#allocation6_spill] sm:$0xff] %v4265_v35  ;;  %v4267_v36 = vpop.permute.xlu1 %380 }
  0xa7   : > { %1080 = vperm.xlu0 %3770, %v4128_v3   ;;  %3735 = vset.pattern.permute.xlu1 %v5692_v0  ;;  %v4271_v37 = vpop.permute.xlu0 %656 }
  0xa8   : > { %5720 = vst [vmem:[#allocation7_spill] sm:$0xff] %v4271_v37  ;;  %640 = vperm.xlu1 %3735, %v4218_v25  }
  0xa9   : > { %v4274_v38 = vpop.permute.xlu1 %604 }
  0xab   : > { %1088 = vperm.xlu0 %3770, %v4136_v5   ;;  %v4277_v39 = vpop.permute.xlu0 %664  ;;  %v349_v5 = vld [vmem:[%s4117_s21 + $0x98] sm:$0xff] }
  0xac   : > { %5721 = vst [vmem:[#allocation8_spill] sm:$0xff] %v4277_v39  ;;  %644 = vperm.xlu1 %3735, %v4180_v17   ;;  %v5736_v39 = vmov 1  }
  0xae   : > { %v4280_v40 = vpop.permute.xlu1 %820 }
  0xaf   : > { %v4282_v41 = vpop.permute.xlu0 %688  ;;  %1100 = vperm.xlu0 %3770, %v4180_v17  }
  0xb0   : > { %5722 = vst [vmem:[#allocation9_spill] sm:$0xff] %v4282_v41  ;;  %3736 = vset.pattern.permute.xlu1 %v5698_v13 }
  0xb1   : > { %1092 = vperm.xlu1 %3736, %v341_v28   ;;  %v523_v28 = vlaneseq }
  0xb2   : > { %v4286_v42 = vpop.permute.xlu1 %828 }
  0xb3   : > { %v4288_v43 = vpop.permute.xlu0 %696  ;;  %1108 = vperm.xlu0 %3770, %v4185_v18  }
  0xb4   : > { %5723 = vst [vmem:[#allocation10_spill] sm:$0xff] %v4288_v43  ;;  %v362_v43 = vld [vmem:[%s5685_s2] sm:$0xf] }
  0xb5   : > { %3737 = vset.pattern.permute.xlu1 %v5696_v8 }
  0xb6   : > { %435 = vperm.xlu1 %3737, %v344_v44   ;;  %v4293_v45 = vpop.permute.xlu1 %832 }
  0xb7   : > { %1112 = vperm.xlu0 %3770, %v4140_v7  }
  0xb8   : > { %v4296_v46 = vpop.permute.xlu0 %365 }
  0xba   : > { %3738 = vset.pattern.permute.xlu1 %v5692_v0 }
  0xbb   : > { %648 = vperm.xlu1 %3738, %v344_v44   ;;  %v4299_v47 = vpop.permute.xlu1 %1052  ;;  %1120 = vperm.xlu0 %3770, %v4145_v9  }
  0xbc   : > { %5724 = vst [vmem:[#allocation11_spill] sm:$0xff] %v4299_v47  ;;  %v4302_v48 = vpop.permute.xlu0 %370 }
  0xbf   : > { %652 = vperm.xlu1 %3738, %v4185_v18   ;;  %1132 = vperm.xlu0 %3770, %v4190_v20  }
  0xc0   : > { %v4306_v49 = vpop.permute.xlu0 %375  ;;  %v4308_v50 = vpop.permute.xlu1 %385 }
  0xc3   : > { %3739 = vset.pattern.permute.xlu1 %v5694_v11  ;;  %1140 = vperm.xlu0 %3770, %v4195_v21  }
  0xc4   : > { %872 = vperm.xlu1 %3739, %v4180_v17   ;;  %v4313_v51 = vpop.permute.xlu0 %390 }
  0xc5   : > { %v4315_v52 = vpop.permute.xlu1 %608 }
  0xc7   : > { %1144 = vperm.xlu0 %3770, %v4150_v10  }
  0xc8   : > { %876 = vperm.xlu1 %3739, %v344_v44   ;;  %v4318_v53 = vpop.permute.xlu0 %400 }
  0xc9   : > { %v4320_v54 = vpop.permute.xlu1 %612 }
  0xcb   : > { %1152 = vperm.xlu0 %3770, %v4156_v12  }
  0xcc   : > { %3740 = vset.pattern.permute.xlu1 %v5698_v13  ;;  %v4324_v55 = vpop.permute.xlu0 %430 }
  0xcd   : > { %1096 = vperm.xlu1 %3740, %v4218_v25  }
  0xce   : > { %v4327_v56 = vpop.permute.xlu1 %1060 }
  0xcf   : > { %1164 = vperm.xlu0 %3770, %v4200_v22  }
  0xd0   : > { %v4330_v57 = vpop.permute.xlu0 %440 }
  0xd1   : > { %3741 = vset.pattern.permute.xlu1 %v5696_v8 }
  0xd2   : > { %445 = vperm.xlu1 %3741, %v4140_v7  }
  0xd3   : > { %v4334_v58 = vpop.permute.xlu1 %395 }
  0xd4   : > { %5725 = vst [vmem:[#allocation12_spill] sm:$0xff] %v4334_v58  ;;  %v4336_v59 = vpop.permute.xlu0 %470 }
  0xd6   : > { %450 = vperm.xlu1 %3741, %v4224_v26  }
  0xd8   : > { %v4339_v60 = vpop.permute.xlu1 %616  ;;  %v4341_v61 = vpop.permute.xlu0 %480 }
  0xda   : > { %3742 = vset.pattern.permute.xlu1 %v5692_v0 }
  0xdb   : > { %660 = vperm.xlu1 %3742, %v4224_v26  }
  0xdc   : > { %v4345_v62 = vpop.permute.xlu1 %620  ;;  %v4347_v63 = vpop.permute.xlu0 %510 }
  0xdd   : > { %5726 = vst [vmem:[#allocation13_spill] sm:$0xff] %v4347_v63  ;;  %v5735_v63 = vmov 0  }
  0xdf   : > { %3743 = vset.pattern.permute.xlu1 %v5698_v13 }
  0xe0   : > { %1104 = vperm.xlu1 %3743, %v344_v44   ;;  %v4350_v1 = vpop.permute.xlu0 %520 }
  0xe1   : > { %5727 = vst [vmem:[#allocation14_spill] sm:$0xff] %v4350_v1  ;;  %v4352_v2 = vpop.permute.xlu1 %840 }
  0xe4   : > { %3744 = vset.pattern.permute.xlu1 %v5696_v8 }
  0xe5   : > { %v4355_v3 = vpop.permute.xlu0 %824  ;;  %455 = vperm.xlu1 %3744, %v4145_v9   ;;  %v4358_v4 = vpop.permute.xlu1 %844 }
  0xe6   : > { %5728 = vst [vmem:[#allocation15_spill] sm:$0xff] %v4358_v4 }
  0xe9   : > { %v4361_v6 = vpop.permute.xlu0 %836  ;;  %460 = vperm.xlu1 %3744, %v349_v5  }
  0xea   : > { %v4363_v14 = vpop.permute.xlu1 %1064 }
  0xeb   : > { %5729 = vst [vmem:[#allocation16_spill] sm:$0xff] %v4363_v14 }
  0xed   : > { %v4365_v15 = vpop.permute.xlu0 %848  ;;  %3745 = vset.pattern.permute.xlu1 %v5692_v0 }
  0xee   : > { %668 = vperm.xlu1 %3745, %v349_v5  }
  0xef   : > { %v4368_v16 = vpop.permute.xlu1 %405 }
  0xf0   : > { %5730 = vst [vmem:[#allocation17_spill] sm:$0xff] %v4368_v16 }
  0xf1   : > { %v4370_v17 = vpop.permute.xlu0 %856 }
  0xf2   : > { %3746 = vset.pattern.permute.xlu1 %v5694_v11  ;;  %v524_v11 = vshrl.u32 %v523_v28, 7 }
  0xf3   : > { %884 = vperm.xlu1 %3746, %v4140_v7   ;;  %v4374_v18 = vpop.permute.xlu1 %410 }
  0xf4   : > { %v525_v1 = vsub.s32 0, %v524_v11 }
  0xf5   : > { %v4376_v19 = vpop.permute.xlu0 %868 }
  0xf6   : > { %5731 = vst [vmem:[#allocation18_spill] sm:$0xff] %v4376_v19 }
  0xf7   : > { %892 = vperm.xlu1 %3746, %v4145_v9   ;;  %v721_v9 = vsub.s32 1, %v524_v11 }
  0xf8   : > { %v4379_v24 = vpop.permute.xlu1 %628 }
  0xf9   : > { %v4381_v25 = vpop.permute.xlu0 %880  ;;  %v4402_v28 = vrot.slane %v362_v43, %v721_v9 }
  0xfb   : > { %896 = vperm.xlu1 %3746, %v349_v5  }
  0xfd   : > { %v4383_v44 = vpop.permute.xlu1 %1072  ;;  %v4385_v0 = vpop.permute.xlu0 %888 }
  0xfe   : > { %5732 = vst [vmem:[#allocation19_spill] sm:$0xff] %v4383_v44 }
  0xff   : > { %3747 = vset.pattern.permute.xlu1 %v5698_v13 }
 0x100   : > { %1116 = vperm.xlu1 %3747, %v4224_v26   ;;  %v4404_v26 = vrot.slane %v362_v43, %v525_v1  ;;  %v725_v1 = vsub.f32 %v4254_v32, %v4402_v28  ;;  %v5739_v32 = vmov 3  }
 0x101   : > { %v4389_v7 = vpop.permute.xlu0 %900 }
 0x102   : > { %5733 = vst [vmem:[#allocation20_spill] sm:$0xff] %v4389_v7  ;;  %v4391_v8 = vpop.permute.xlu1 %415  ;;  %v949_v7 = vsub.s32 2, %v524_v11  ;;  %v527_v19 = vsub.f32 %v4296_v46, %v4404_v26 }
 0x103   : > { %5734 = vst [vmem:[#allocation21_spill] sm:$0xff] %v4391_v8  ;;  %v723_v8 = vsub.f32 %v4252_v31, %v4402_v28  ;;  %v1177_v31 = vsub.s32 3, %v524_v11  ;;  %v530_v11 = vsub.f32 %v4267_v36, %v4404_v26  ;;  %v728_v36 = vsub.f32 %v4320_v54, %v4402_v28 }
 0x104   : > { %3748 = vset.pattern.permute.xlu1 %v5735_v63  ;;  %v4416_v14 = vrot.slane %v362_v43, %v949_v7  ;;  %v559_v35 = vmul.f32 %v527_v19, %v527_v19 }
 0x105   : > { %465 = vperm.xlu1 %3748, %v4229_v27   ;;  %v4398_v41 = vpop.permute.xlu0 %912  ;;  %v755_v46 = vmul.f32 %v723_v8, %v723_v8 }
 0x106   : > { %v4400_v13 = vpop.permute.xlu1 %420  ;;  %v951_v16 = vsub.f32 %v4280_v40, %v4416_v14  ;;  %v953_v8 = vsub.f32 %v4286_v42, %v4416_v14  ;;  %v4440_v40 = vrot.slane %v362_v43, %v1177_v31 }
 0x107   : > { %v787_v34 = vadd.f32 %v755_v46, %v559_v35  ;;  %v954_v35 = vsub.f32 %v4293_v45, %v4416_v14 }
 0x108   : > { %v983_v19 = vmul.f32 %v951_v16, %v951_v16  ;;  %v985_v42 = vmul.f32 %v953_v8, %v953_v8  ;;  %v532_v16 = vsub.f32 %v4313_v51, %v4404_v26  ;;  %v534_v51 = vsub.f32 %v4318_v53, %v4404_v26 }
 0x109   : > { %3749 = vset.pattern.permute.xlu1 %v5736_v39  ;;  %v4407_v37 = vpop.permute.xlu0 %920  ;;  %v760_v8 = vmul.f32 %v728_v36, %v728_v36  ;;  %vm1182_vm2 = vcmp.eq.f32.partialorder %v4327_v56, %v4440_v40  ;;  %v536_v56 = vsub.f32 %v4374_v18, %v4404_v26  ;;  %v5740_v18 = vmov 2  }
 0x10a   : > { %5737 = vst [vmem:[#allocation22_spill] sm:$0xff] %v4407_v37  ;;  %672 = vperm.xlu1 %3749, %v4229_v27   ;;  %v529_v37 = vsub.f32 %v4306_v49, %v4404_v26  ;;  %v726_v49 = vsub.f32 %v4274_v38, %v4402_v28  ;;  %v1015_v38 = vadd.f32 %v983_v19, %v787_v34 }
 0x10b   : > { %v4412_v44 = vpop.permute.xlu1 %636  ;;  %v986_v34 = vmul.f32 %v954_v35, %v954_v35  ;;  %v564_v54 = vmul.f32 %v532_v16, %v532_v16 }
 0x10c   : > { %v561_v4 = vmul.f32 %v529_v37, %v529_v37 }
 0x10d   : > { %v4418_v9 = vpop.permute.xlu0 %932 }
 0x10e   : > { %5738 = vst [vmem:[#allocation23_spill] sm:$0xff] %v4418_v9  ;;  %676 = vperm.xlu1 %3749, %v4190_v20   ;;  %v757_v9 = vmul.f32 %v725_v1, %v725_v1  ;;  %v4443_v1 = vld [vmem:[%s4117_s21 + $0xb0] sm:$0xff] }
 0x110   : > { %v4427_v47 = vpop.permute.xlu1 %852  ;;  %v789_v37 = vadd.f32 %v757_v9, %v561_v4  ;;  %v562_v4 = vmul.f32 %v530_v11, %v530_v11  ;;  %v956_v9 = vsub.f32 %v4352_v2, %v4416_v14 }
 0x111   : > { %v4429_v7 = vpop.permute.xlu0 %944 }
 0x112   : > { %3750 = vset.pattern.permute.xlu1 %v5739_v32  ;;  %v988_v35 = vmul.f32 %v956_v9, %v956_v9 }
 0x113   : > { %1124 = vperm.xlu1 %3750, %v349_v5   ;;  %v758_v5 = vmul.f32 %v726_v49, %v726_v49  ;;  %v1017_v49 = vadd.f32 %v985_v42, %v789_v37  ;;  %v958_v37 = vsub.f32 %v4365_v15, %v4416_v14  ;;  %v792_v42 = vadd.f32 %v760_v8, %v564_v54 }
 0x114   : > { %v4436_v58 = vpop.permute.xlu1 %860 }
 0x115   : > { %v790_v19 = vadd.f32 %v758_v5, %v562_v4  ;;  %v566_v5 = vmul.f32 %v534_v51, %v534_v51  ;;  %v1020_v4 = vadd.f32 %v988_v35, %v792_v42  ;;  %v990_v15 = vmul.f32 %v958_v37, %v958_v37 }
 0x116   : > { %v1049_v46 = vpop.permute.xlu0 %1048 }
 0x117   : > { %vm1179_vm0 = vcmp.eq.f32.partialorder %v1049_v46, %v4440_v40  ;;  %3751 = vset.pattern.permute.xlu1 %v5735_v63  ;;  %v730_v46 = vsub.f32 %v4345_v62, %v4402_v28  ;;  %v1018_v53 = vadd.f32 %v986_v34, %v790_v19  ;;  %v732_v62 = vsub.f32 %v4379_v24, %v4402_v28 }
 0x118   : > { %v4453_v43 = vsel %vm1179_vm0, %v1015_v38, 1e+30  ;;  %475 = vperm.xlu1 %3751, %v4443_v1   ;;  %v865_v45 = vpop.permute.xlu1 %864  ;;  %v960_v24 = vsub.f32 %v4370_v17, %v4416_v14  ;;  %v568_v19 = vmul.f32 %v536_v56, %v536_v56  ;;  %v734_v17 = vsub.f32 %v4412_v44, %v4402_v28 }
 0x119   : > { %1243 = vmin.xlane.f32.xlu0 %v4453_v43  ;;  %v4475_v16 = vsel %vm1182_vm2, %v1018_v53, 1e+30  ;;  %v762_v36 = vmul.f32 %v730_v46, %v730_v46  ;;  %v764_v34 = vmul.f32 %v732_v62, %v732_v62  ;;  %v538_v53 = vsub.f32 %v4400_v13, %v4404_v26 }
 0x11a   : > { %v1057_v31 = vpop.permute.xlu0 %1056  ;;  %v992_v54 = vmul.f32 %v960_v24, %v960_v24  ;;  %v962_v35 = vsub.f32 %v865_v45, %v4416_v14  ;;  %v766_v62 = vmul.f32 %v734_v17, %v734_v17  ;;  %v542_v24 = vsub.f32 %v4330_v57, %v4404_v26 }
 0x11b   : > { %vm1181_vm1 = vcmp.eq.f32.partialorder %v1057_v31, %v4440_v40  ;;  %v796_v8 = vadd.f32 %v764_v34, %v568_v19 }
 0x11c   : > { %v4464_v11 = vsel %vm1181_vm1, %v1017_v49, 1e+30  ;;  %3752 = vset.pattern.permute.xlu1 %v5736_v39  ;;  %v794_v49 = vadd.f32 %v762_v36, %v566_v5  ;;  %v570_v5 = vmul.f32 %v538_v53, %v538_v53 }
 0x11d   : > { %1247 = vmin.xlane.f32.xlu0 %v4464_v11  ;;  %680 = vperm.xlu1 %3752, %v4443_v1   ;;  %v1085_v2 = vpop.permute.xlu1 %1084 }
 0x11e   : > { %v1069_v38 = vpop.permute.xlu0 %1068  ;;  %vm1188_vm5 = vcmp.eq.f32.partialorder %v1085_v2, %v4440_v40  ;;  %v798_v13 = vadd.f32 %v766_v62, %v570_v5 }
 0x11f   : > { %vm1184_vm3 = vcmp.eq.f32.partialorder %v1069_v38, %v4440_v40  ;;  %v1024_v38 = vadd.f32 %v992_v54, %v796_v8  ;;  %v574_v54 = vmul.f32 %v542_v24, %v542_v24  ;;  %v966_v8 = vsub.f32 %v4381_v25, %v4416_v14 }
 0x120   : > { %v4486_v51 = vsel %vm1184_vm3, %v1020_v4, 1e+30 }
 0x121   : > { %684 = vperm.xlu1 %3752, %v4195_v21   ;;  %1249 = vmin.xlane.f32.xlu0 %v4475_v16  ;;  %v1022_v21 = vadd.f32 %v990_v15, %v794_v49  ;;  %v4504_v42 = vsel %vm1188_vm5, %v1024_v38, 1e+30  ;;  %v998_v62 = vmul.f32 %v966_v8, %v966_v8 }
 0x122   : > { %v1077_v9 = vpop.permute.xlu0 %1076  ;;  %v4484_v31 = vpop.permute.xlu1 %425 }
 0x123   : > { %vm1186_vm4 = vcmp.eq.f32.partialorder %v1077_v9, %v4440_v40 }
 0x124   : > { %v4499_v37 = vsel %vm1186_vm4, %v1022_v21, 1e+30 }
 0x125   : > { %3753 = vset.pattern.permute.xlu1 %v5740_v18  ;;  %1253 = vmin.xlane.f32.xlu0 %v4486_v51 }
 0x126   : > { %904 = vperm.xlu1 %3753, %v4190_v20   ;;  %v994_v20 = vmul.f32 %v962_v35, %v962_v35  ;;  %v4517_v4 = vpop.permute.xlu0 %1080 }
 0x127   : > { %v4494_v46 = vpop.permute.xlu1 %640  ;;  %vm1187_vm0 = vcmp.eq.f32.partialorder %v4517_v4, %v4440_v40 }
 0x128   : > { %v1026_v45 = vadd.f32 %v994_v20, %v798_v13 }
 0x129   : > { %1257 = vmin.xlane.f32.xlu0 %v4499_v37 }
 0x12a   : > { %908 = vperm.xlu1 %3753, %v4443_v1   ;;  %v4528_v34 = vpop.permute.xlu0 %1088 }
 0x12b   : > { %v645_v44 = vpop.permute.xlu1 %644  ;;  %vm1189_vm1 = vcmp.eq.f32.partialorder %v4528_v34, %v4440_v40 }
 0x12c   : > { %v736_v9 = vsub.f32 %v645_v44, %v4402_v28 }
 0x12d   : > { %1261 = vmin.xlane.f32.xlu0 %v4504_v42 }
 0x12e   : > { %3754 = vset.pattern.permute.xlu1 %v5739_v32  ;;  %v1101_v53 = vpop.permute.xlu0 %1100 }
 0x12f   : > { %1128 = vperm.xlu1 %3754, %v4229_v27   ;;  %v540_v27 = vsub.f32 %v4324_v55, %v4404_v26  ;;  %v768_v55 = vmul.f32 %v736_v9, %v736_v9  ;;  %vm1192_vm7 = vcmp.eq.f32.partialorder %v1101_v53, %v4440_v40  ;;  %v968_v53 = vsub.f32 %v4385_v0, %v4416_v14 }
 0x130   : > { %v1093_v2 = vpop.permute.xlu1 %1092 }
 0x131   : > { %vm1190_vm6 = vcmp.eq.f32.partialorder %v1093_v2, %v4440_v40  ;;  %v572_v21 = vmul.f32 %v540_v27, %v540_v27 }
 0x132   : > { %v4510_v36 = vsel %vm1190_vm6, %v1026_v45, 1e+30  ;;  %v1109_v13 = vpop.permute.xlu0 %1108  ;;  %v357_v45 = vld [vmem:[%s4117_s21 + $0xd8] sm:$0xff] }
 0x133   : > { %3755 = vset.pattern.permute.xlu1 %v5735_v63  ;;  %1265 = vmin.xlane.f32.xlu0 %v4510_v36  ;;  %v800_v38 = vadd.f32 %v768_v55, %v572_v21  ;;  %vm1194_vm8 = vcmp.eq.f32.partialorder %v1109_v13, %v4440_v40 }
 0x134   : > { %485 = vperm.xlu1 %3755, %v4150_v10  }
 0x135   : > { %v4515_v56 = vpop.permute.xlu1 %435 }
 0x138   : > { %490 = vperm.xlu1 %3755, %v4237_v29  }
 0x13a   : > { %v4520_v15 = vpop.permute.xlu1 %648 }
 0x13c   : > { %3756 = vset.pattern.permute.xlu1 %v5736_v39 }
 0x13d   : > { %692 = vperm.xlu1 %3756, %v4237_v29  }
 0x13e   : > { %v653_v49 = vpop.permute.xlu1 %652 }
 0x13f   : > { %v738_v19 = vsub.f32 %v653_v49, %v4402_v28 }
 0x141   : > { %3757 = vset.pattern.permute.xlu1 %v5739_v32  ;;  %v770_v17 = vmul.f32 %v738_v19, %v738_v19 }
 0x142   : > { %1136 = vperm.xlu1 %3757, %v4443_v1  }
 0x143   : > { %v873_v57 = vpop.permute.xlu1 %872  ;;  %v802_v44 = vadd.f32 %v770_v17, %v574_v54 }
 0x144   : > { %v964_v35 = vsub.f32 %v873_v57, %v4416_v14 }
 0x145   : > { %v1030_v2 = vadd.f32 %v998_v62, %v802_v44  ;;  %v1000_v44 = vmul.f32 %v968_v53, %v968_v53 }
 0x146   : > { %v996_v5 = vmul.f32 %v964_v35, %v964_v35  ;;  %3758 = vset.pattern.permute.xlu1 %v5735_v63  ;;  %v360_v35 = vld [vmem:[%s4117_s21 + $0xf0] sm:$0xff]  ;;  %s3191_s21 = sshll.u32 %s5511_s19, 4  ;;  %s5634_s21 = int_to_ptr.vmem [resolvable:$true] %s3191_s21 }
 0x147   : > { %495 = vperm.xlu1 %3758, %v4156_v12   ;;  %v4540_v25 = vpop.permute.xlu1 %876  ;;  %v4549_v24 = vsel %vm1194_vm8, %v1030_v2, 1e+30  ;;  %p3951_p0 = scmp.lt.s32.totalorder %s5634_s21, %s3949_s10 }
 0x148   : > { %v1028_v20 = vadd.f32 %v996_v5, %v800_v38 }
 0x14a   : > { %v4543_v1 = vsel %vm1192_vm7, %v1028_v20, 1e+30 }
 0x14b   : > { %500 = vperm.xlu1 %3758, %v357_v45   ;;  %1269 = vmin.xlane.f32.xlu0 %v4543_v1 }
 0x14c   : > { %v4547_v27 = vpop.permute.xlu1 %1096 }
 0x14d   : > { %vm1191_vm2 = vcmp.eq.f32.partialorder %v4547_v27, %v4440_v40 }
 0x14f   : > { %3760 = vset.pattern.permute.xlu1 %v5736_v39  ;;  %1273 = vmin.xlane.f32.xlu0 %v4549_v24 }
 0x150   : > { %700 = vperm.xlu1 %3760, %v357_v45  }
 0x151   : > { %v4553_v9 = vpop.permute.xlu1 %445 }
 0x154   : > { %3761 = vset.pattern.permute.xlu1 %v5740_v18 }
 0x155   : > { %916 = vperm.xlu1 %3761, %v4150_v10   ;;  %v451_v49 = vpop.permute.xlu1 %450 }
 0x159   : > { %924 = vperm.xlu1 %3761, %v4156_v12  }
 0x15a   : > { %v661_v19 = vpop.permute.xlu1 %660 }
 0x15b   : > { %v740_v55 = vsub.f32 %v661_v19, %v4402_v28 }
 0x15d   : > { %928 = vperm.xlu1 %3761, %v357_v45   ;;  %v772_v57 = vmul.f32 %v740_v55, %v740_v55 }
 0x15f   : > { %v4558_v21 = vpop.permute.xlu1 %1104 }
 0x160   : > { %vm1193_vm3 = vcmp.eq.f32.partialorder %v4558_v21, %v4440_v40 }
 0x161   : > { %3762 = vset.pattern.permute.xlu1 %v5739_v32 }
 0x162   : > { %1148 = vperm.xlu1 %3762, %v4237_v29   ;;  %v544_v29 = vsub.f32 %v451_v49, %v4404_v26 }
 0x164   : > { %v4562_v54 = vpop.permute.xlu1 %455  ;;  %v576_v62 = vmul.f32 %v544_v29, %v544_v29 }
 0x166   : > { %3763 = vset.pattern.permute.xlu1 %v5735_v63  ;;  %v804_v5 = vadd.f32 %v772_v57, %v576_v62  ;;  %v4604_v62 = vpop.permute.xlu0 %1112 }
 0x167   : > { %505 = vperm.xlu1 %3763, %v4242_v30   ;;  %vm1195_vm4 = vcmp.eq.f32.partialorder %v4604_v62, %v4440_v40 }
 0x168   : > { %v461_v8 = vpop.permute.xlu1 %460  ;;  %v1032_v20 = vadd.f32 %v1000_v44, %v804_v5  ;;  %v548_v5 = vsub.f32 %v4336_v59, %v4404_v26 }
 0x169   : > { %v546_v2 = vsub.f32 %v461_v8, %v4404_v26 }
 0x16b   : > { %3764 = vset.pattern.permute.xlu1 %v5736_v39  ;;  %v578_v29 = vmul.f32 %v546_v2, %v546_v2 }
 0x16c   : > { %704 = vperm.xlu1 %3764, %v4242_v30  }
 0x16d   : > { %v669_v10 = vpop.permute.xlu1 %668 }
 0x170   : > { %708 = vperm.xlu1 %3764, %v4200_v22  }
 0x172   : > { %v4569_v12 = vpop.permute.xlu1 %884 }
 0x173   : > { %v967_v34 = vsub.f32 %v4569_v12, %v4416_v14 }
 0x174   : > { %3765 = vset.pattern.permute.xlu1 %v5739_v32 }
 0x175   : > { %1156 = vperm.xlu1 %3765, %v357_v45  }
 0x176   : > { %v4574_v17 = vpop.permute.xlu1 %892 }
 0x177   : > { %v969_v27 = vsub.f32 %v4574_v17, %v4416_v14 }
 0x179   : > { %3766 = vset.pattern.permute.xlu1 %v5735_v63  ;;  %v742_v63 = vsub.f32 %v669_v10, %v4402_v28 }
 0x17a   : > { %515 = vperm.xlu1 %3766, %v360_v35   ;;  %v897_v38 = vpop.permute.xlu1 %896 }
 0x17b   : > { %v970_v49 = vsub.f32 %v897_v38, %v4416_v14  ;;  %v774_v19 = vmul.f32 %v742_v63, %v742_v63 }
 0x17d   : > { %v1002_v53 = vmul.f32 %v970_v49, %v970_v49  ;;  %v806_v57 = vadd.f32 %v774_v19, %v578_v29  ;;  %v580_v49 = vmul.f32 %v548_v5, %v548_v5  ;;  %v724_v5 = vsub.f32 %v4258_v33, %v4402_v28 }
 0x17e   : > { %3768 = vset.pattern.permute.xlu1 %v5736_v39  ;;  %v955_v33 = vsub.f32 %v4361_v6, %v4416_v14 }
 0x17f   : > { %712 = vperm.xlu1 %3768, %v360_v35   ;;  %v1117_v13 = vpop.permute.xlu1 %1116 }
 0x180   : > { %vm1196_vm9 = vcmp.eq.f32.partialorder %v1117_v13, %v4440_v40 }
 0x181   : > { %v4582_v45 = vsel %vm1196_vm9, %v1032_v20, 1e+30  ;;  %v4614_v20 = vpop.permute.xlu0 %1120 }
 0x182   : > { %1277 = vmin.xlane.f32.xlu0 %v4582_v45  ;;  %vm1197_vm5 = vcmp.eq.f32.partialorder %v4614_v20, %v4440_v40 }
 0x183   : > { %716 = vperm.xlu1 %3768, %v4205_v23  }
 0x184   : > { %v4586_v0 = vpop.permute.xlu1 %465 }
 0x187   : > { %3769 = vset.pattern.permute.xlu1 %v5740_v18  ;;  %v1034_v18 = vadd.f32 %v1002_v53, %v806_v57 }
 0x188   : > { %936 = vperm.xlu1 %3769, %v4200_v22  }
 0x189   : > { %v4591_v39 = vpop.permute.xlu1 %672 }
 0x18c   : > { %940 = vperm.xlu1 %3769, %v360_v35  }
 0x18d   : > { %v677_v55 = vpop.permute.xlu1 %676 }
 0x190   : > { %3771 = vset.pattern.permute.xlu1 %v5739_v32  ;;  %v744_v32 = vsub.f32 %v677_v55, %v4402_v28  ;;  %v1133_v55 = vpop.permute.xlu0 %1132 }
 0x191   : > { %1160 = vperm.xlu1 %3771, %v4242_v30   ;;  %vm1200_vm11 = vcmp.eq.f32.partialorder %v1133_v55, %v4440_v40 }
 0x192   : > { %v1125_v10 = vpop.permute.xlu1 %1124  ;;  %v776_v13 = vmul.f32 %v744_v32, %v744_v32  ;;  %v528_v32 = vsub.f32 %v4302_v48, %v4404_v26  ;;  %v531_v48 = vsub.f32 %v4308_v50, %v4404_v26  ;;  %v5743_v50 = vld [vmem:[#allocation15_spill] sm:$0xff] }
 0x193   : > { %vm1198_vm10 = vcmp.eq.f32.partialorder %v1125_v10, %v4440_v40 }
 0x194   : > { %v4598_v22 = vsel %vm1198_vm10, %v1034_v18, 1e+30  ;;  %v808_v57 = vadd.f32 %v776_v13, %v580_v49  ;;  %v560_v13 = vmul.f32 %v528_v32, %v528_v32  ;;  %v756_v49 = vmul.f32 %v724_v5, %v724_v5  ;;  %v5744_v32 = vld [vmem:[#allocation5_spill] sm:$0xff]  ;;  %v5745_v5 = vld [vmem:[#allocation11_spill] sm:$0xff] }
 0x195   : > { %5741 = vst [vmem:[#allocation24_spill] sm:$0xff] %v4598_v22  ;;  %1168 = vperm.xlu1 %3771, %v360_v35   ;;  %1281 = vmin.xlane.f32.xlu0 %v4598_v22  ;;  %v550_v35 = vsub.f32 %v4341_v61, %v4404_v26  ;;  %v731_v6 = vsub.f32 %v5744_v32, %v4402_v28 }
 0x196   : > { %v788_v55 = vadd.f32 %v756_v49, %v560_v13  ;;  %vm1180_vm13 = vcmp.eq.f32.partialorder %v5745_v5, %v4440_v40 }
 0x197   : > { %v4601_v8 = vpop.permute.xlu1 %475  ;;  %v582_v19 = vmul.f32 %v550_v35, %v550_v35  ;;  %v952_v35 = vsub.f32 %v4355_v3, %v4416_v14 }
 0x199   : > { %1172 = vperm.xlu1 %3771, %v4205_v23   ;;  %v974_v23 = vsub.f32 %v4398_v41, %v4416_v14 }
 0x19b   : > { %v1006_v53 = vmul.f32 %v974_v23, %v974_v23 }
 0x19c   : > { %v4606_v38 = vpop.permute.xlu1 %680 }
 0x1a0   : > { %v685_v30 = vpop.permute.xlu1 %684 }
 0x1a1   : > { %v746_v44 = vsub.f32 %v685_v30, %v4402_v28  ;;  %v1141_v30 = vpop.permute.xlu0 %1140 }
 0x1a2   : > { %vm1202_vm12 = vcmp.eq.f32.partialorder %v1141_v30, %v4440_v40  ;;  %v957_v30 = vsub.f32 %v5743_v50, %v4416_v14 }
 0x1a3   : > { %v778_v63 = vmul.f32 %v746_v44, %v746_v44 }
 0x1a5   : > { %v905_v2 = vpop.permute.xlu1 %904  ;;  %v810_v18 = vadd.f32 %v778_v63, %v582_v19  ;;  %v727_v63 = vsub.f32 %v4315_v52, %v4402_v28  ;;  %v984_v19 = vmul.f32 %v952_v35, %v952_v35  ;;  %v987_v52 = vmul.f32 %v955_v33, %v955_v33 }
 0x1a6   : > { %v972_v29 = vsub.f32 %v905_v2, %v4416_v14  ;;  %v989_v33 = vmul.f32 %v957_v30, %v957_v30 }
 0x1a7   : > { %v1038_v22 = vadd.f32 %v1006_v53, %v810_v18  ;;  %v759_v3 = vmul.f32 %v727_v63, %v727_v63  ;;  %v729_v53 = vsub.f32 %v4339_v60, %v4402_v28  ;;  %v5746_v63 = vld [vmem:[#allocation17_spill] sm:$0xff] }
 0x1a8   : > { %v1004_v59 = vmul.f32 %v972_v29, %v972_v29  ;;  %v563_v29 = vmul.f32 %v531_v48, %v531_v48  ;;  %v535_v60 = vsub.f32 %v5746_v63, %v4404_v26 }
 0x1a9   : > { %v4620_v61 = vpop.permute.xlu1 %908  ;;  %v4634_v23 = vsel %vm1202_vm12, %v1038_v22, 1e+30  ;;  %v761_v35 = vmul.f32 %v729_v53, %v729_v53  ;;  %v5748_v53 = vld [vmem:[#allocation16_spill] sm:$0xff] }
 0x1aa   : > { %v1036_v10 = vadd.f32 %v1004_v59, %v808_v57  ;;  %v1016_v57 = vadd.f32 %v984_v19, %v788_v55  ;;  %v791_v18 = vadd.f32 %v759_v3, %v563_v29  ;;  %v5742_v59 = vld [vmem:[#allocation12_spill] sm:$0xff]  ;;  %v959_v55 = vsub.f32 %v4427_v47, %v4416_v14  ;;  %v5747_v29 = vld [vmem:[#allocation6_spill] sm:$0xff] }
 0x1ab   : > { %v763_v3 = vmul.f32 %v731_v6, %v731_v6  ;;  %vm1183_vm14 = vcmp.eq.f32.partialorder %v5748_v53, %v4440_v40  ;;  %v567_v50 = vmul.f32 %v535_v60, %v535_v60  ;;  %v735_v47 = vsub.f32 %v4494_v46, %v4402_v28  ;;  %v5751_v53 = vld [vmem:[#allocation18_spill] sm:$0xff] }
 0x1ac   : > { %v4622_v41 = vsel %vm1200_vm11, %v1036_v10, 1e+30  ;;  %v533_v10 = vsub.f32 %v5742_v59, %v4404_v26  ;;  %v1019_v13 = vadd.f32 %v987_v52, %v791_v18  ;;  %v4661_v48 = vsel %vm1180_vm13, %v1016_v57, 1e+30  ;;  %v5749_v57 = vld [vmem:[#allocation21_spill] sm:$0xff] }
 0x1ad   : > { %1285 = vmin.xlane.f32.xlu0 %v4622_v41  ;;  %v733_v59 = vsub.f32 %v5747_v29, %v4402_v28  ;;  %v537_v32 = vsub.f32 %v5749_v57, %v4404_v26  ;;  %v991_v5 = vmul.f32 %v959_v55, %v959_v55  ;;  %v795_v60 = vadd.f32 %v763_v3, %v567_v50  ;;  %v5752_v50 = vld [vmem:[#allocation7_spill] sm:$0xff] }
 0x1ae   : > { %v4628_v44 = vpop.permute.xlu1 %1128  ;;  %v565_v19 = vmul.f32 %v533_v10, %v533_v10  ;;  %v4670_v18 = vsel %vm1183_vm14, %v1019_v13, 1e+30  ;;  %v5750_v10 = vld [vmem:[#allocation19_spill] sm:$0xff]  ;;  %v539_v13 = vsub.f32 %v4484_v31, %v4404_v26  ;;  %v963_v46 = vsub.f32 %v5751_v53, %v4416_v14 }
 0x1af   : > { %vm1185_vm15 = vcmp.eq.f32.partialorder %v5750_v10, %v4440_v40  ;;  %v765_v63 = vmul.f32 %v733_v59, %v733_v59  ;;  %v569_v29 = vmul.f32 %v537_v32, %v537_v32  ;;  %v767_v57 = vmul.f32 %v735_v47, %v735_v47 }
 0x1b0   : > { %v793_v52 = vadd.f32 %v761_v35, %v565_v19  ;;  %v961_v35 = vsub.f32 %v4436_v58, %v4416_v14  ;;  %v737_v3 = vsub.f32 %v4520_v15, %v4402_v28  ;;  %v739_v32 = vsub.f32 %v5752_v50, %v4402_v28 }
 0x1b1   : > { %1289 = vmin.xlane.f32.xlu0 %v4634_v23  ;;  %v797_v31 = vadd.f32 %v765_v63, %v569_v29  ;;  %v995_v10 = vmul.f32 %v963_v46, %v963_v46  ;;  %v541_v47 = vsub.f32 %v4515_v56, %v4404_v26  ;;  %v543_v15 = vsub.f32 %v4553_v9, %v4404_v26  ;;  %v5753_v46 = vld [vmem:[#allocation8_spill] sm:$0xff] }
 0x1b2   : > { %v1021_v6 = vadd.f32 %v989_v33, %v793_v52  ;;  %v1023_v33 = vadd.f32 %v991_v5, %v795_v60  ;;  %v993_v55 = vmul.f32 %v961_v35, %v961_v35  ;;  %v571_v52 = vmul.f32 %v539_v13, %v539_v13 }
 0x1b3   : > { %v4639_v2 = vpop.permute.xlu1 %485  ;;  %v965_v5 = vsub.f32 %v4540_v25, %v4416_v14  ;;  %v769_v63 = vmul.f32 %v737_v3, %v737_v3  ;;  %v771_v60 = vmul.f32 %v739_v32, %v739_v32  ;;  %v573_v56 = vmul.f32 %v541_v47, %v541_v47 }
 0x1b4   : > { %v4685_v19 = vsel %vm1185_vm15, %v1021_v6, 1e+30  ;;  %v4694_v59 = vsel %vm1187_vm0, %v1023_v33, 1e+30  ;;  %v799_v6 = vadd.f32 %v767_v57, %v571_v52  ;;  %v1025_v4 = vadd.f32 %v993_v55, %v797_v31 }
 0x1b5   : > { %v997_v25 = vmul.f32 %v965_v5, %v965_v5  ;;  %v575_v53 = vmul.f32 %v543_v15, %v543_v15  ;;  %v545_v9 = vsub.f32 %v4562_v54, %v4404_v26  ;;  %v741_v57 = vsub.f32 %v5753_v46, %v4402_v28  ;;  %v5754_v5 = vld [vmem:[#allocation20_spill] sm:$0xff] }
 0x1b6   : > { %v4711_v13 = vsel %vm1189_vm1, %v1025_v4, 1e+30  ;;  %v1027_v29 = vadd.f32 %v995_v10, %v799_v6  ;;  %v801_v55 = vadd.f32 %v769_v63, %v573_v56  ;;  %v999_v52 = vmul.f32 %v967_v34, %v967_v34 }
 0x1b7   : > { %v4645_v22 = vpop.permute.xlu1 %490  ;;  %v743_v31 = vsub.f32 %v4591_v39, %v4402_v28  ;;  %v803_v3 = vadd.f32 %v771_v60, %v575_v53  ;;  %v577_v50 = vmul.f32 %v545_v9, %v545_v9  ;;  %v547_v32 = vsub.f32 %v4586_v0, %v4404_v26 }
 0x1b8   : > { %v4724_v12 = vsel %vm1191_vm2, %v1027_v29, 1e+30  ;;  %v1029_v54 = vadd.f32 %v997_v25, %v801_v55  ;;  %v773_v10 = vmul.f32 %v741_v57, %v741_v57  ;;  %v1001_v47 = vmul.f32 %v969_v27, %v969_v27  ;;  %v5756_v55 = vld [vmem:[#allocation22_spill] sm:$0xff] }
 0x1b9   : > { %v1031_v4 = vadd.f32 %v999_v52, %v803_v3  ;;  %v971_v21 = vsub.f32 %v5754_v5, %v4416_v14  ;;  %v775_v39 = vmul.f32 %v743_v31, %v743_v31  ;;  %v579_v0 = vmul.f32 %v547_v32, %v547_v32 }
 0x1ba   : > { %v4735_v6 = vsel %vm1193_vm3, %v1029_v54, 1e+30  ;;  %v805_v63 = vadd.f32 %v773_v10, %v577_v50  ;;  %v552_v34 = vsub.f32 %v4645_v22, %v4404_v26  ;;  %v745_v56 = vsub.f32 %v4606_v38, %v4402_v28  ;;  %v5755_v38 = vld [vmem:[#allocation9_spill] sm:$0xff] }
 0x1bb   : > { %v4746_v29 = vsel %vm1195_vm4, %v1031_v4, 1e+30  ;;  %v1003_v53 = vmul.f32 %v971_v21, %v971_v21  ;;  %v807_v62 = vadd.f32 %v775_v39, %v579_v0  ;;  %v549_v9 = vsub.f32 %v4601_v8, %v4404_v26 }
 0x1bc   : > { %v4659_v49 = vpop.permute.xlu1 %692  ;;  %v1033_v60 = vadd.f32 %v1001_v47, %v805_v63  ;;  %v973_v22 = vsub.f32 %v4620_v61, %v4416_v14  ;;  %v551_v46 = vsub.f32 %v4639_v2, %v4404_v26  ;;  %v747_v57 = vsub.f32 %v5755_v38, %v4402_v28  ;;  %v5757_v47 = vld [vmem:[#allocation10_spill] sm:$0xff] }
 0x1bd   : > { %1245 = vmin.xlane.f32.xlu1 %v4661_v48  ;;  %v748_v15 = vsub.f32 %v4659_v49, %v4402_v28  ;;  %v976_v52 = vsub.f32 %v5756_v55, %v4416_v14  ;;  %v584_v20 = vmul.f32 %v552_v34, %v552_v34  ;;  %v777_v31 = vmul.f32 %v745_v56, %v745_v56 }
 0x1be   : > { %v4763_v27 = vsel %vm1197_vm5, %v1033_v60, 1e+30  ;;  %v1035_v8 = vadd.f32 %v1003_v53, %v807_v62  ;;  %vm1199_vm6 = vcmp.eq.f32.partialorder %v4628_v44, %v4440_v40  ;;  %v581_v2 = vmul.f32 %v549_v9, %v549_v9  ;;  %v1145_v62 = vpop.permute.xlu0 %1144 }
 0x1bf   : > { %v780_v49 = vmul.f32 %v748_v15, %v748_v15  ;;  %v1005_v50 = vmul.f32 %v973_v22, %v973_v22  ;;  %v583_v32 = vmul.f32 %v551_v46, %v551_v46  ;;  %v779_v4 = vmul.f32 %v747_v57, %v747_v57 }
 0x1c0   : > { %v749_v5 = vsub.f32 %v5757_v47, %v4402_v28  ;;  %v1008_v21 = vmul.f32 %v976_v52, %v976_v52  ;;  %v4773_v39 = vsel %vm1199_vm6, %v1035_v8, 1e+30  ;;  %vm1203_vm9 = vcmp.eq.f32.partialorder %v1145_v62, %v4440_v40  ;;  %v5762_v62 = vld [vmem:[#allocation23_spill] sm:$0xff] }
 0x1c1   : > { %1251 = vmin.xlane.f32.xlu1 %v4670_v18  ;;  %v4679_v30 = vpop.permute.xlu1 %1136  ;;  %v812_v61 = vadd.f32 %v780_v49, %v584_v20 }
 0x1c2   : > { %vm1201_vm7 = vcmp.eq.f32.partialorder %v4679_v30, %v4440_v40  ;;  %v781_v53 = vmul.f32 %v749_v5, %v749_v5  ;;  %v1153_v57 = vpop.permute.xlu0 %1152 }
 0x1c3   : > { %v1040_v63 = vadd.f32 %v1008_v21, %v812_v61  ;;  %vm1205_vm10 = vcmp.eq.f32.partialorder %v1153_v57, %v4440_v40 }
 0x1c5   : > { %1255 = vmin.xlane.f32.xlu1 %v4685_v19 }
 0x1c6   : > { %v4692_v58 = vpop.permute.xlu1 %495 }
 0x1c7   : > { %v553_v10 = vsub.f32 %v4692_v58, %v4404_v26  ;;  %v811_v58 = vadd.f32 %v779_v4, %v583_v32 }
 0x1c9   : > { %1259 = vmin.xlane.f32.xlu1 %v4694_v59  ;;  %v585_v60 = vmul.f32 %v553_v10, %v553_v10 }
 0x1ca   : > { %v4709_v35 = vpop.permute.xlu1 %500 }
 0x1cb   : > { %v813_v30 = vadd.f32 %v781_v53, %v585_v60  ;;  %v554_v20 = vsub.f32 %v4709_v35, %v4404_v26 }
 0x1cd   : > { %1263 = vmin.xlane.f32.xlu1 %v4711_v13 }
 0x1cf   : > { %v4722_v33 = vpop.permute.xlu1 %700 }
 0x1d0   : > { %v750_v55 = vsub.f32 %v4722_v33, %v4402_v28 }
 0x1d1   : > { %1267 = vmin.xlane.f32.xlu1 %v4724_v12 }
 0x1d2   : > { %v782_v8 = vmul.f32 %v750_v55, %v750_v55 }
 0x1d4   : > { %v917_v17 = vpop.permute.xlu1 %916 }
 0x1d5   : > { %1271 = vmin.xlane.f32.xlu1 %v4735_v6  ;;  %v975_v54 = vsub.f32 %v917_v17, %v4416_v14  ;;  %v809_v17 = vadd.f32 %v777_v31, %v581_v2  ;;  %v586_v2 = vmul.f32 %v554_v20, %v554_v20 }
 0x1d7   : > { %v1007_v15 = vmul.f32 %v975_v54, %v975_v54  ;;  %v1037_v34 = vadd.f32 %v1005_v50, %v809_v17  ;;  %v814_v32 = vadd.f32 %v782_v8, %v586_v2  ;;  %v5761_v17 = vld [vmem:[#allocation13_spill] sm:$0xff] }
 0x1d8   : > { %v925_v25 = vpop.permute.xlu1 %924 }
 0x1d9   : > { %1275 = vmin.xlane.f32.xlu1 %v4746_v29  ;;  %v977_v44 = vsub.f32 %v925_v25, %v4416_v14  ;;  %v4782_v49 = vsel %vm1201_vm7, %v1037_v34, 1e+30  ;;  %v1039_v9 = vadd.f32 %v1007_v15, %v811_v58  ;;  %v556_v15 = vsub.f32 %v5761_v17, %v4404_v26 }
 0x1db   : > { %v1009_v25 = vmul.f32 %v977_v44, %v977_v44  ;;  %v4787_v38 = vsel %vm1203_vm9, %v1039_v9, 1e+30  ;;  %v588_v58 = vmul.f32 %v556_v15, %v556_v15  ;;  %v979_v9 = vsub.f32 %v5762_v62, %v4416_v14 }
 0x1dc   : > { %v929_v3 = vpop.permute.xlu1 %928 }
 0x1dd   : > { %1279 = vmin.xlane.f32.xlu1 %v4763_v27  ;;  %v1041_v46 = vadd.f32 %v1009_v25, %v813_v30  ;;  %v978_v31 = vsub.f32 %v929_v3, %v4416_v14 }
 0x1df   : > { %v4796_v54 = vsel %vm1205_vm10, %v1041_v46, 1e+30  ;;  %v1010_v50 = vmul.f32 %v978_v31, %v978_v31 }
 0x1e0   : > { %5759 = vst [vmem:[#allocation15_spill] sm:$0xff] %v4796_v54 }
 0x1e1   : > { %1283 = vmin.xlane.f32.xlu1 %v4773_v39  ;;  %v1149_v0 = vpop.permute.xlu1 %1148  ;;  %v1042_v10 = vadd.f32 %v1010_v50, %v814_v32  ;;  %v1011_v50 = vmul.f32 %v979_v9, %v979_v9 }
 0x1e2   : > { %vm1204_vm8 = vcmp.eq.f32.partialorder %v1149_v0, %v4440_v40 }
 0x1e3   : > { %v4780_v56 = vsel %vm1204_vm8, %v1040_v63, 1e+30 }
 0x1e4   : > { %5758 = vst [vmem:[#allocation12_spill] sm:$0xff] %v4780_v56  ;;  %1293 = vmin.xlane.f32.xlu0 %v4780_v56 }
 0x1e5   : > { %1287 = vmin.xlane.f32.xlu1 %v4782_v49 }
 0x1e6   : > { %v506_v22 = vpop.permute.xlu1 %505 }
 0x1e7   : > { %v555_v44 = vsub.f32 %v506_v22, %v4404_v26 }
 0x1e9   : > { %1291 = vmin.xlane.f32.xlu1 %v4787_v38  ;;  %v587_v53 = vmul.f32 %v555_v44, %v555_v44 }
 0x1eb   : > { %v705_v52 = vpop.permute.xlu1 %704 }
 0x1ec   : > { %v751_v21 = vsub.f32 %v705_v52, %v4402_v28  ;;  %v1165_v52 = vpop.permute.xlu0 %1164 }
 0x1ed   : > { %1295 = vmin.xlane.f32.xlu1 %v4796_v54  ;;  %vm1208_vm12 = vcmp.eq.f32.partialorder %v1165_v52, %v4440_v40 }
 0x1ee   : > { %v783_v0 = vmul.f32 %v751_v21, %v751_v21 }
 0x1ef   : > { %v709_v61 = vpop.permute.xlu1 %708 }
 0x1f0   : > { %v752_v3 = vsub.f32 %v709_v61, %v4402_v28  ;;  %v815_v57 = vadd.f32 %v783_v0, %v587_v53  ;;  %v5763_v61 = vld [vmem:[#allocation14_spill] sm:$0xff]  ;;  %v1244_v17 = vpop.xlane.xlu0 %1243 }
 0x1f1   : > { %v558_v2 = vsub.f32 %v5763_v61, %v4404_v26  ;;  %vm1307_vm15 = vcmp.le.f32.partialorder %v4453_v43, %v1244_v17 }
 0x1f2   : > { %v784_v63 = vmul.f32 %v752_v3, %v752_v3  ;;  %v4836_v62 = vsel %vm1307_vm15, 1e+30, %v4453_v43 }
 0x1f4   : > { %v1157_v4 = vpop.permute.xlu1 %1156  ;;  %v816_v25 = vadd.f32 %v784_v63, %v588_v58 }
 0x1f5   : > { %vm1206_vm11 = vcmp.eq.f32.partialorder %v1157_v4, %v4440_v40 }
 0x1f6   : > { %v4800_v33 = vsel %vm1206_vm11, %v1042_v10, 1e+30 }
 0x1f7   : > { %5760 = vst [vmem:[#allocation5_spill] sm:$0xff] %v4800_v33  ;;  %1297 = vmin.xlane.f32.xlu0 %v4800_v33 }
 0x1f9   : > { %v516_v35 = vpop.permute.xlu1 %515 }
 0x1fa   : > { %v557_v20 = vsub.f32 %v516_v35, %v4404_v26  ;;  %v1043_v35 = vadd.f32 %v1011_v50, %v815_v57 }
 0x1fc   : > { %v589_v4 = vmul.f32 %v557_v20, %v557_v20 }
 0x1fe   : > { %v713_v47 = vpop.permute.xlu1 %712 }
 0x1ff   : > { %v753_v30 = vsub.f32 %v713_v47, %v4402_v28 }
 0x201   : > { %v785_v32 = vmul.f32 %v753_v30, %v753_v30 }
 0x202   : > { %v717_v5 = vpop.permute.xlu1 %716 }
 0x203   : > { %v754_v22 = vsub.f32 %v717_v5, %v4402_v28  ;;  %v590_v28 = vmul.f32 %v558_v2, %v558_v2  ;;  %v982_v5 = vsub.f32 %v4429_v7, %v4416_v14  ;;  %v817_v15 = vadd.f32 %v785_v32, %v589_v4 }
 0x205   : > { %v786_v47 = vmul.f32 %v754_v22, %v754_v22 }
 0x207   : > { %v937_v34 = vpop.permute.xlu1 %936  ;;  %v818_v44 = vadd.f32 %v786_v47, %v590_v28 }
 0x208   : > { %v980_v60 = vsub.f32 %v937_v34, %v4416_v14  ;;  %v1014_v34 = vmul.f32 %v982_v5, %v982_v5 }
 0x20a   : > { %v1012_v46 = vmul.f32 %v980_v60, %v980_v60  ;;  %v1248_v60 = vpop.xlane.xlu0 %1247 }
 0x20b   : > { %v941_v55 = vpop.permute.xlu1 %940  ;;  %vm1309_vm1 = vcmp.le.f32.partialorder %v4464_v11, %v1248_v60 }
 0x20c   : > { %v1044_v31 = vadd.f32 %v1012_v46, %v816_v25  ;;  %v981_v8 = vsub.f32 %v941_v55, %v4416_v14  ;;  %v1046_v14 = vadd.f32 %v1014_v34, %v818_v44  ;;  %v4842_v9 = vsel %vm1309_vm1, 1e+30, %v4464_v11 }
 0x20e   : > { %v4818_v10 = vsel %vm1208_vm12, %v1044_v31, 1e+30  ;;  %v1013_v3 = vmul.f32 %v981_v8, %v981_v8  ;;  %v1250_v25 = vpop.xlane.xlu0 %1249 }
 0x20f   : > { %5764 = vst [vmem:[#allocation11_spill] sm:$0xff] %v4818_v10  ;;  %1301 = vmin.xlane.f32.xlu0 %v4818_v10  ;;  %vm1310_vm3 = vcmp.le.f32.partialorder %v4475_v16, %v1250_v25 }
 0x210   : > { %v1161_v21 = vpop.permute.xlu1 %1160  ;;  %v1045_v63 = vadd.f32 %v1013_v3, %v817_v15  ;;  %v4853_v52 = vsel %vm1310_vm3, 1e+30, %v4475_v16 }
 0x211   : > { %vm1207_vm13 = vcmp.eq.f32.partialorder %v1161_v21, %v4440_v40 }
 0x212   : > { %v4824_v26 = vsel %vm1207_vm13, %v1043_v35, 1e+30  ;;  %v1254_v30 = vpop.xlane.xlu0 %1253 }
 0x213   : > { %5765 = vst [vmem:[#allocation17_spill] sm:$0xff] %v4824_v26  ;;  %1299 = vmin.xlane.f32.xlu1 %v4824_v26  ;;  %vm1312_vm5 = vcmp.le.f32.partialorder %v4486_v51, %v1254_v30 }
 0x214   : > { %v1169_v0 = vpop.permute.xlu1 %1168  ;;  %v4863_v8 = vsel %vm1312_vm5, 1e+30, %v4486_v51 }
 0x215   : > { %vm1209_vm14 = vcmp.eq.f32.partialorder %v1169_v0, %v4440_v40 }
 0x216   : > { %v4828_v58 = vsel %vm1209_vm14, %v1045_v63, 1e+30 }
 0x217   : > { %5766 = vst [vmem:[#allocation6_spill] sm:$0xff] %v4828_v58  ;;  %1303 = vmin.xlane.f32.xlu1 %v4828_v58 }
 0x218   : > { %v1173_v7 = vpop.permute.xlu1 %1172 }
 0x219   : > { %vm1210_vm0 = vcmp.eq.f32.partialorder %v1173_v7, %v4440_v40  ;;  %v1258_v40 = vpop.xlane.xlu0 %1257 }
 0x21a   : > { %v4833_v53 = vsel %vm1210_vm0, %v1046_v14, 1e+30  ;;  %vm1314_vm7 = vcmp.le.f32.partialorder %v4499_v37, %v1258_v40 }
 0x21b   : > { %5767 = vst [vmem:[#allocation16_spill] sm:$0xff] %v4833_v53  ;;  %1371 = vmin.xlane.f32.xlu1 %v4836_v62  ;;  %1305 = vmin.xlane.f32.xlu0 %v4833_v53  ;;  %v4873_v32 = vsel %vm1314_vm7, 1e+30, %v4499_v37 }
 0x21d   : > { %v1262_v22 = vpop.xlane.xlu0 %1261 }
 0x21e   : > { %vm1316_vm9 = vcmp.le.f32.partialorder %v4504_v42, %v1262_v22  ;;  %v5768_v22 = vld [vmem:[#allocation24_spill] sm:$0xff] }
 0x21f   : > { %1375 = vmin.xlane.f32.xlu1 %v4842_v9  ;;  %v4883_v35 = vsel %vm1316_vm9, 1e+30, %v4504_v42 }
 0x221   : > { %v1266_v2 = vpop.xlane.xlu0 %1265 }
 0x222   : > { %vm1318_vm11 = vcmp.le.f32.partialorder %v4510_v36, %v1266_v2 }
 0x223   : > { %v4893_v17 = vsel %vm1318_vm11, 1e+30, %v4510_v36 }
 0x225   : > { %v1270_v47 = vpop.xlane.xlu0 %1269 }
 0x226   : > { %vm1320_vm13 = vcmp.le.f32.partialorder %v4543_v1, %v1270_v47 }
 0x227   : > { %v4903_v0 = vsel %vm1320_vm13, 1e+30, %v4543_v1 }
 0x229   : > { %v1274_v5 = vpop.xlane.xlu0 %1273 }
 0x22a   : > { %vm1322_vm15 = vcmp.le.f32.partialorder %v4549_v24, %v1274_v5 }
 0x22b   : > { %v4913_v7 = vsel %vm1322_vm15, 1e+30, %v4549_v24 }
 0x22d   : > { %v1278_v63 = vpop.xlane.xlu0 %1277 }
 0x22e   : > { %vm1324_vm1 = vcmp.le.f32.partialorder %v4582_v45, %v1278_v63 }
 0x22f   : > { %v4923_v40 = vsel %vm1324_vm1, 1e+30, %v4582_v45 }
 0x231   : > { %v1282_v14 = vpop.xlane.xlu0 %1281 }
 0x232   : > { %vm1326_vm3 = vcmp.le.f32.partialorder %v5768_v22, %v1282_v14 }
 0x233   : > { %v4933_v2 = vsel %vm1326_vm3, 1e+30, %v5768_v22 }
 0x24a   : > { %v1246_v46 = vpop.xlane.xlu1 %1245 }
 0x24b   : > { %vm1308_vm2 = vcmp.le.f32.partialorder %v4661_v48, %v1246_v46  ;;  %v1286_v46 = vpop.xlane.xlu0 %1285 }
 0x24c   : > { %v4847_v57 = vsel %vm1308_vm2, 1e+30, %v4661_v48  ;;  %vm1328_vm5 = vcmp.le.f32.partialorder %v4622_v41, %v1286_v46 }
 0x24d   : > { %1373 = vmin.xlane.f32.xlu0 %v4847_v57 }
 0x24e   : > { %v1252_v55 = vpop.xlane.xlu1 %1251 }
 0x24f   : > { %vm1311_vm4 = vcmp.le.f32.partialorder %v4670_v18, %v1252_v55  ;;  %v1290_v47 = vpop.xlane.xlu0 %1289 }
 0x250   : > { %v4856_v20 = vsel %vm1311_vm4, 1e+30, %v4670_v18  ;;  %vm1330_vm7 = vcmp.le.f32.partialorder %v4634_v23, %v1290_v47 }
 0x251   : > { %1377 = vmin.xlane.f32.xlu0 %v4853_v52  ;;  %1379 = vmin.xlane.f32.xlu1 %v4856_v20 }
 0x252   : > { %v1256_v31 = vpop.xlane.xlu1 %1255 }
 0x253   : > { %vm1313_vm6 = vcmp.le.f32.partialorder %v4685_v19, %v1256_v31 }
 0x254   : > { %v4866_v61 = vsel %vm1313_vm6, 1e+30, %v4685_v19 }
 0x255   : > { %1381 = vmin.xlane.f32.xlu0 %v4863_v8  ;;  %1383 = vmin.xlane.f32.xlu1 %v4866_v61 }
 0x256   : > { %v1260_v50 = vpop.xlane.xlu1 %1259 }
 0x257   : > { %vm1315_vm8 = vcmp.le.f32.partialorder %v4694_v59, %v1260_v50 }
 0x258   : > { %v4876_v4 = vsel %vm1315_vm8, 1e+30, %v4694_v59 }
 0x259   : > { %1385 = vmin.xlane.f32.xlu0 %v4873_v32  ;;  %1387 = vmin.xlane.f32.xlu1 %v4876_v4 }
 0x25a   : > { %v1264_v3 = vpop.xlane.xlu1 %1263 }
 0x25b   : > { %vm1317_vm10 = vcmp.le.f32.partialorder %v4711_v13, %v1264_v3 }
 0x25c   : > { %v4886_v21 = vsel %vm1317_vm10, 1e+30, %v4711_v13 }
 0x25d   : > { %1389 = vmin.xlane.f32.xlu0 %v4883_v35  ;;  %1391 = vmin.xlane.f32.xlu1 %v4886_v21 }
 0x25e   : > { %v1268_v28 = vpop.xlane.xlu1 %1267 }
 0x25f   : > { %vm1319_vm12 = vcmp.le.f32.partialorder %v4724_v12, %v1268_v28  ;;  %v4943_v28 = vsel %vm1328_vm5, 1e+30, %v4622_v41 }
 0x260   : > { %v4896_v15 = vsel %vm1319_vm12, 1e+30, %v4724_v12 }
 0x261   : > { %1393 = vmin.xlane.f32.xlu0 %v4893_v17  ;;  %1395 = vmin.xlane.f32.xlu1 %v4896_v15 }
 0x262   : > { %v1272_v44 = vpop.xlane.xlu1 %1271 }
 0x263   : > { %vm1321_vm14 = vcmp.le.f32.partialorder %v4735_v6, %v1272_v44 }
 0x264   : > { %v4906_v34 = vsel %vm1321_vm14, 1e+30, %v4735_v6 }
 0x265   : > { %1397 = vmin.xlane.f32.xlu0 %v4903_v0  ;;  %1399 = vmin.xlane.f32.xlu1 %v4906_v34 }
 0x266   : > { %v1276_v60 = vpop.xlane.xlu1 %1275 }
 0x267   : > { %vm1323_vm0 = vcmp.le.f32.partialorder %v4746_v29, %v1276_v60  ;;  %v4953_v60 = vsel %vm1330_vm7, 1e+30, %v4634_v23 }
 0x268   : > { %v4916_v25 = vsel %vm1323_vm0, 1e+30, %v4746_v29 }
 0x269   : > { %1401 = vmin.xlane.f32.xlu0 %v4913_v7  ;;  %1403 = vmin.xlane.f32.xlu1 %v4916_v25 }
 0x26a   : > { %v1280_v30 = vpop.xlane.xlu1 %1279 }
 0x26b   : > { %vm1325_vm2 = vcmp.le.f32.partialorder %v4763_v27, %v1280_v30 }
 0x26c   : > { %v4926_v55 = vsel %vm1325_vm2, 1e+30, %v4763_v27 }
 0x26d   : > { %1405 = vmin.xlane.f32.xlu0 %v4923_v40  ;;  %1407 = vmin.xlane.f32.xlu1 %v4926_v55 }
 0x26e   : > { %v1284_v31 = vpop.xlane.xlu1 %1283 }
 0x26f   : > { %vm1327_vm4 = vcmp.le.f32.partialorder %v4773_v39, %v1284_v31 }
 0x270   : > { %v4936_v50 = vsel %vm1327_vm4, 1e+30, %v4773_v39 }
 0x271   : > { %1409 = vmin.xlane.f32.xlu0 %v4933_v2  ;;  %1411 = vmin.xlane.f32.xlu1 %v4936_v50  ;;  %v1294_v44 = vpop.xlane.xlu0 %1293 }
 0x272   : > { %v1288_v3 = vpop.xlane.xlu1 %1287  ;;  %vm1332_vm9 = vcmp.le.f32.partialorder %v4780_v56, %v1294_v44 }
 0x273   : > { %vm1329_vm6 = vcmp.le.f32.partialorder %v4782_v49, %v1288_v3  ;;  %v4963_v46 = vsel %vm1332_vm9, 1e+30, %v4780_v56 }
 0x274   : > { %v4946_v5 = vsel %vm1329_vm6, 1e+30, %v4782_v49 }
 0x275   : > { %1413 = vmin.xlane.f32.xlu0 %v4943_v28  ;;  %1415 = vmin.xlane.f32.xlu1 %v4946_v5 }
 0x276   : > { %v1292_v63 = vpop.xlane.xlu1 %1291 }
 0x277   : > { %vm1331_vm8 = vcmp.le.f32.partialorder %v4787_v38, %v1292_v63 }
 0x278   : > { %v4956_v14 = vsel %vm1331_vm8, 1e+30, %v4787_v38 }
 0x279   : > { %1417 = vmin.xlane.f32.xlu0 %v4953_v60  ;;  %1419 = vmin.xlane.f32.xlu1 %v4956_v14 }
 0x27a   : > { %v1296_v30 = vpop.xlane.xlu1 %1295 }
 0x27b   : > { %vm1333_vm10 = vcmp.le.f32.partialorder %v4796_v54, %v1296_v30 }
 0x27c   : > { %v4966_v31 = vsel %vm1333_vm10, 1e+30, %v4796_v54 }
 0x27d   : > { %1421 = vmin.xlane.f32.xlu0 %v4963_v46  ;;  %1423 = vmin.xlane.f32.xlu1 %v4966_v31 }
 0x284   : > { %v1298_v47 = vpop.xlane.xlu0 %1297 }
 0x285   : > { %vm1334_vm11 = vcmp.le.f32.partialorder %v4800_v33, %v1298_v47 }
 0x286   : > { %v4972_v3 = vsel %vm1334_vm11, 1e+30, %v4800_v33 }
 0x287   : > { %1425 = vmin.xlane.f32.xlu0 %v4972_v3 }
 0x29c   : > { %v1302_v44 = vpop.xlane.xlu0 %1301 }
 0x29d   : > { %vm1336_vm12 = vcmp.le.f32.partialorder %v4818_v10, %v1302_v44 }
 0x29e   : > { %v4977_v63 = vsel %vm1336_vm12, 1e+30, %v4818_v10 }
 0x29f   : > { %1429 = vmin.xlane.f32.xlu0 %v4977_v63 }
 0x2a0   : > { %v1300_v30 = vpop.xlane.xlu1 %1299 }
 0x2a1   : > { %vm1335_vm13 = vcmp.le.f32.partialorder %v4824_v26, %v1300_v30 }
 0x2a2   : > { %v4982_v56 = vsel %vm1335_vm13, 1e+30, %v4824_v26 }
 0x2a3   : > { %1427 = vmin.xlane.f32.xlu1 %v4982_v56 }
 0x2a4   : > { %v1304_v47 = vpop.xlane.xlu1 %1303 }
 0x2a5   : > { %vm1337_vm14 = vcmp.le.f32.partialorder %v4828_v58, %v1304_v47 }
 0x2a6   : > { %v4987_v33 = vsel %vm1337_vm14, 1e+30, %v4828_v58 }
 0x2a7   : > { %1431 = vmin.xlane.f32.xlu1 %v4987_v33 }
 0x2a8   : > { %v1306_v44 = vpop.xlane.xlu0 %1305  ;;  %v1372_v10 = vpop.xlane.xlu1 %1371 }
 0x2a9   : > { %vm1338_vm15 = vcmp.le.f32.partialorder %v4833_v53, %v1306_v44  ;;  %vm1435_vm0 = vcmp.le.f32.partialorder %v4836_v62, %v1372_v10 }
 0x2aa   : > { %v4993_v30 = vsel %vm1338_vm15, 1e+30, %v4833_v53  ;;  %v1467_v26 = vsel %vm1435_vm0, 1e+30, %v4836_v62 }
 0x2ab   : > { %1433 = vmin.xlane.f32.xlu0 %v4993_v30  ;;  %1499 = vmin.xlane.f32.xlu1 %v1467_v26 }
 0x2ac   : > { %v1376_v47 = vpop.xlane.xlu1 %1375 }
 0x2ad   : > { %vm1437_vm1 = vcmp.le.f32.partialorder %v4842_v9, %v1376_v47 }
 0x2ae   : > { %v1469_v58 = vsel %vm1437_vm1, 1e+30, %v4842_v9 }
 0x2af   : > { %1503 = vmin.xlane.f32.xlu1 %v1469_v58 }
 0x2da   : > { %v1374_v54 = vpop.xlane.xlu0 %1373 }
 0x2db   : > { %vm1436_vm2 = vcmp.le.f32.partialorder %v4847_v57, %v1374_v54 }
 0x2dc   : > { %v1468_v44 = vsel %vm1436_vm2, 1e+30, %v4847_v57 }
 0x2dd   : > { %1501 = vmin.xlane.f32.xlu0 %v1468_v44 }
 0x2de   : > { %v1378_v10 = vpop.xlane.xlu0 %1377  ;;  %v1380_v53 = vpop.xlane.xlu1 %1379 }
 0x2df   : > { %vm1438_vm3 = vcmp.le.f32.partialorder %v4853_v52, %v1378_v10  ;;  %vm1439_vm4 = vcmp.le.f32.partialorder %v4856_v20, %v1380_v53 }
 0x2e0   : > { %v1470_v26 = vsel %vm1438_vm3, 1e+30, %v4853_v52  ;;  %v1471_v62 = vsel %vm1439_vm4, 1e+30, %v4856_v20 }
 0x2e1   : > { %1505 = vmin.xlane.f32.xlu0 %v1470_v26  ;;  %1507 = vmin.xlane.f32.xlu1 %v1471_v62 }
 0x2e2   : > { %v1382_v9 = vpop.xlane.xlu0 %1381  ;;  %v1384_v58 = vpop.xlane.xlu1 %1383 }
 0x2e3   : > { %vm1440_vm5 = vcmp.le.f32.partialorder %v4863_v8, %v1382_v9  ;;  %vm1441_vm6 = vcmp.le.f32.partialorder %v4866_v61, %v1384_v58 }
 0x2e4   : > { %v1472_v54 = vsel %vm1440_vm5, 1e+30, %v4863_v8  ;;  %v1473_v57 = vsel %vm1441_vm6, 1e+30, %v4866_v61 }
 0x2e5   : > { %1509 = vmin.xlane.f32.xlu0 %v1472_v54  ;;  %1511 = vmin.xlane.f32.xlu1 %v1473_v57 }
 0x2e6   : > { %v1386_v47 = vpop.xlane.xlu0 %1385  ;;  %v1388_v53 = vpop.xlane.xlu1 %1387 }
 0x2e7   : > { %vm1442_vm7 = vcmp.le.f32.partialorder %v4873_v32, %v1386_v47  ;;  %vm1443_vm8 = vcmp.le.f32.partialorder %v4876_v4, %v1388_v53 }
 0x2e8   : > { %v1474_v52 = vsel %vm1442_vm7, 1e+30, %v4873_v32  ;;  %v1475_v20 = vsel %vm1443_vm8, 1e+30, %v4876_v4 }
 0x2e9   : > { %1513 = vmin.xlane.f32.xlu0 %v1474_v52  ;;  %1515 = vmin.xlane.f32.xlu1 %v1475_v20 }
 0x2ea   : > { %v1390_v44 = vpop.xlane.xlu0 %1389  ;;  %v1392_v10 = vpop.xlane.xlu1 %1391 }
 0x2eb   : > { %vm1444_vm9 = vcmp.le.f32.partialorder %v4883_v35, %v1390_v44  ;;  %vm1445_vm10 = vcmp.le.f32.partialorder %v4886_v21, %v1392_v10 }
 0x2ec   : > { %v1476_v8 = vsel %vm1444_vm9, 1e+30, %v4883_v35  ;;  %v1477_v61 = vsel %vm1445_vm10, 1e+30, %v4886_v21 }
 0x2ed   : > { %1517 = vmin.xlane.f32.xlu0 %v1476_v8  ;;  %1519 = vmin.xlane.f32.xlu1 %v1477_v61 }
 0x2ee   : > { %v1394_v26 = vpop.xlane.xlu0 %1393  ;;  %v1396_v62 = vpop.xlane.xlu1 %1395 }
 0x2ef   : > { %vm1446_vm11 = vcmp.le.f32.partialorder %v4893_v17, %v1394_v26  ;;  %vm1447_vm12 = vcmp.le.f32.partialorder %v4896_v15, %v1396_v62 }
 0x2f0   : > { %v1478_v32 = vsel %vm1446_vm11, 1e+30, %v4893_v17  ;;  %v1479_v4 = vsel %vm1447_vm12, 1e+30, %v4896_v15 }
 0x2f1   : > { %1521 = vmin.xlane.f32.xlu0 %v1478_v32  ;;  %1523 = vmin.xlane.f32.xlu1 %v1479_v4 }
 0x2f2   : > { %v1398_v9 = vpop.xlane.xlu0 %1397  ;;  %v1400_v58 = vpop.xlane.xlu1 %1399 }
 0x2f3   : > { %vm1448_vm13 = vcmp.le.f32.partialorder %v4903_v0, %v1398_v9  ;;  %vm1449_vm14 = vcmp.le.f32.partialorder %v4906_v34, %v1400_v58 }
 0x2f4   : > { %v1480_v35 = vsel %vm1448_vm13, 1e+30, %v4903_v0  ;;  %v1481_v21 = vsel %vm1449_vm14, 1e+30, %v4906_v34 }
 0x2f5   : > { %1525 = vmin.xlane.f32.xlu0 %v1480_v35  ;;  %1527 = vmin.xlane.f32.xlu1 %v1481_v21 }
 0x2f6   : > { %v1402_v54 = vpop.xlane.xlu0 %1401  ;;  %v1404_v57 = vpop.xlane.xlu1 %1403 }
 0x2f7   : > { %vm1450_vm15 = vcmp.le.f32.partialorder %v4913_v7, %v1402_v54  ;;  %vm1451_vm0 = vcmp.le.f32.partialorder %v4916_v25, %v1404_v57 }
 0x2f8   : > { %v1482_v17 = vsel %vm1450_vm15, 1e+30, %v4913_v7  ;;  %v1483_v15 = vsel %vm1451_vm0, 1e+30, %v4916_v25 }
 0x2f9   : > { %1529 = vmin.xlane.f32.xlu0 %v1482_v17  ;;  %1531 = vmin.xlane.f32.xlu1 %v1483_v15 }
 0x2fa   : > { %v1406_v47 = vpop.xlane.xlu0 %1405  ;;  %v1408_v53 = vpop.xlane.xlu1 %1407 }
 0x2fb   : > { %vm1452_vm1 = vcmp.le.f32.partialorder %v4923_v40, %v1406_v47  ;;  %vm1453_vm2 = vcmp.le.f32.partialorder %v4926_v55, %v1408_v53  ;;  %v3772_v47 = vld [vmem:[%s5687_s4] sm:$0xff]  }
 0x2fc   : > { %v1484_v0 = vsel %vm1452_vm1, 1e+30, %v4923_v40  ;;  %v1485_v34 = vsel %vm1453_vm2, 1e+30, %v4926_v55  ;;  %3437 = vmatprep.subr.bf16.mxu0 %v3772_v47  ;;  %v3776_v53 = vld [vmem:[%s5085_s23] sm:$0xff]   ;;  %vm2027_vm2 = vcmask 523264  }
 0x2fd   : > { %1533 = vmin.xlane.f32.xlu0 %v1484_v0  ;;  %1535 = vmin.xlane.f32.xlu1 %v1485_v34  ;;  %v3777_v0 = vld [vmem:[%s5085_s23 + $0x8] sm:$0xff]   ;;  %v3778_v34 = vld [vmem:[%s5085_s23 + $0x10] sm:$0xff]  }
 0x2fe   : > { %v1410_v52 = vpop.xlane.xlu0 %1409  ;;  %v1412_v20 = vpop.xlane.xlu1 %1411  ;;  %3438 = vmatpush3.bf16.msra.mxu0 %v3772_v47  ;;  %3445 = vmatprep.mubr.msk.bf16.mxu0 %vm2027_vm2, %v3776_v53  ;;  %v1608_v47 = vmax.f32 %v4543_v1, 1e-16  ;;  %v1609_v53 = vmax.f32 %v4735_v6, 1e-16 }
 0x2ff   : > { %vm1454_vm3 = vcmp.le.f32.partialorder %v4933_v2, %v1410_v52  ;;  %vm1455_vm4 = vcmp.le.f32.partialorder %v4936_v50, %v1412_v20  ;;  %v3779_v52 = vld [vmem:[%s5085_s23 + $0x18] sm:$0xff]   ;;  %v3780_v20 = vld [vmem:[%s5085_s23 + $0x20] sm:$0xff]  }
 0x300   : > { %v1486_v7 = vsel %vm1454_vm3, 1e+30, %v4933_v2  ;;  %v1487_v25 = vsel %vm1455_vm4, 1e+30, %v4936_v50 }
 0x301   : > { %1537 = vmin.xlane.f32.xlu0 %v1486_v7  ;;  %1539 = vmin.xlane.f32.xlu1 %v1487_v25  ;;  %v3781_v7 = vld [vmem:[%s5085_s23 + $0x28] sm:$0xff]   ;;  %v3786_v25 = vld [vmem:[%s5686_s3] sm:$0xff]  }
 0x302   : > { %v1414_v44 = vpop.xlane.xlu0 %1413  ;;  %v1416_v10 = vpop.xlane.xlu1 %1415 }
 0x303   : > { %vm1456_vm5 = vcmp.le.f32.partialorder %v4943_v28, %v1414_v44  ;;  %vm1457_vm6 = vcmp.le.f32.partialorder %v4946_v5, %v1416_v10  ;;  %v3787_v44 = vld [vmem:[%s5686_s3 + $0x8] sm:$0xff]   ;;  %v1596_v10 = vmax.f32 %v4661_v48, 1e-16 }
 0x304   : > { %v1488_v40 = vsel %vm1456_vm5, 1e+30, %v4943_v28  ;;  %v1489_v55 = vsel %vm1457_vm6, 1e+30, %v4946_v5 }
 0x305   : > { %1541 = vmin.xlane.f32.xlu0 %v1488_v40  ;;  %1543 = vmin.xlane.f32.xlu1 %v1489_v55  ;;  %v3782_v40 = vld [vmem:[%s5085_s23 + $0x30] sm:$0xff]   ;;  %v1598_v55 = vmax.f32 %v4475_v16, 1e-16 }
 0x306   : > { %v1418_v8 = vpop.xlane.xlu0 %1417  ;;  %v1420_v61 = vpop.xlane.xlu1 %1419 }
 0x307   : > { %vm1458_vm7 = vcmp.le.f32.partialorder %v4953_v60, %v1418_v8  ;;  %vm1459_vm8 = vcmp.le.f32.partialorder %v4956_v14, %v1420_v61  ;;  %v3790_v8 = vld [vmem:[%s5686_s3 + $0x10] sm:$0xff]   ;;  %v1599_v61 = vmax.f32 %v4670_v18, 1e-16 }
 0x308   : > { %v1490_v2 = vsel %vm1458_vm7, 1e+30, %v4953_v60  ;;  %v1491_v50 = vsel %vm1459_vm8, 1e+30, %v4956_v14  ;;  %v1595_v14 = vmax.f32 %v4453_v43, 1e-16 }
 0x309   : > { %1545 = vmin.xlane.f32.xlu0 %v1490_v2  ;;  %1547 = vmin.xlane.f32.xlu1 %v1491_v50  ;;  %v1601_v2 = vmax.f32 %v4685_v19, 1e-16  ;;  %v3783_v50 = vld [vmem:[%s5085_s23 + $0x38] sm:$0xff]  }
 0x30a   : > { %v1422_v26 = vpop.xlane.xlu0 %1421  ;;  %v1424_v62 = vpop.xlane.xlu1 %1423  ;;  %3816 = vrcp.f32 %v1595_v14  ;;  %v1604_v14 = vmax.f32 %v4504_v42, 1e-16 }
 0x30b   : > { %vm1460_vm9 = vcmp.le.f32.partialorder %v4963_v46, %v1422_v26  ;;  %vm1461_vm10 = vcmp.le.f32.partialorder %v4966_v31, %v1424_v62  ;;  %v1600_v26 = vmax.f32 %v4486_v51, 1e-16  ;;  %v3784_v62 = vld [vmem:[%s5085_s23 + $0x40] sm:$0xff]  }
 0x30c   : > { %v1492_v28 = vsel %vm1460_vm9, 1e+30, %v4963_v46  ;;  %v1493_v5 = vsel %vm1461_vm10, 1e+30, %v4966_v31  ;;  %v1597_v46 = vmax.f32 %v4464_v11, 1e-16 }
 0x30d   : > { %1549 = vmin.xlane.f32.xlu0 %v1492_v28  ;;  %1551 = vmin.xlane.f32.xlu1 %v1493_v5  ;;  %v1602_v28 = vmax.f32 %v4499_v37, 1e-16  ;;  %v1603_v5 = vmax.f32 %v4694_v59, 1e-16 }
 0x30e   : > { %3818 = vrcp.f32 %v1597_v46  ;;  %v1605_v46 = vmax.f32 %v4711_v13, 1e-16 }
 0x30f   : > { %3820 = vrcp.f32 %v1596_v10 }
 0x310   : > { %3822 = vrcp.f32 %v1598_v55  ;;  %v1613_v55 = vmax.f32 %v4763_v27, 1e-16 }
 0x311   : > { %3824 = vrcp.f32 %v1599_v61 }
 0x312   : > { %3826 = vrcp.f32 %v1601_v2  ;;  %v1612_v2 = vmax.f32 %v4582_v45, 1e-16 }
 0x313   : > { %3828 = vrcp.f32 %v1600_v26 }
 0x314   : > { %v1426_v32 = vpop.xlane.xlu0 %1425  ;;  %3830 = vrcp.f32 %v1602_v28  ;;  %v3793_v28 = vld [vmem:[%s5085_s23 + $0x68] sm:$0xff]  }
 0x315   : > { %vm1462_vm11 = vcmp.le.f32.partialorder %v4972_v3, %v1426_v32  ;;  %3832 = vrcp.f32 %v1603_v5  ;;  %v3794_v5 = vld [vmem:[%s5686_s3 + $0x20] sm:$0xff]  }
 0x316   : > { %v1494_v60 = vsel %vm1462_vm11, 1e+30, %v4972_v3  ;;  %3834 = vrcp.f32 %v1604_v14 }
 0x317   : > { %1553 = vmin.xlane.f32.xlu0 %v1494_v60  ;;  %3836 = vrcp.f32 %v1605_v46 }
 0x32c   : > { %v1430_v4 = vpop.xlane.xlu0 %1429 }
 0x32d   : > { %vm1464_vm12 = vcmp.le.f32.partialorder %v4977_v63, %v1430_v4 }
 0x32e   : > { %v1496_v9 = vsel %vm1464_vm12, 1e+30, %v4977_v63  ;;  %v3817_v63 = vpop.eup %3816 }
 0x32f   : > { %1557 = vmin.xlane.f32.xlu0 %v1496_v9  ;;  %v3819_v15 = vpop.eup %3818  ;;  %v3785_v9 = vld [vmem:[%s5085_s23 + $0x48] sm:$0xff]  }
 0x330   : > { %v1428_v31 = vpop.xlane.xlu1 %1427  ;;  %v3821_v60 = vpop.eup %3820 }
 0x331   : > { %vm1463_vm13 = vcmp.le.f32.partialorder %v4982_v56, %v1428_v31  ;;  %v3823_v31 = vpop.eup %3822 }
 0x332   : > { %v1495_v58 = vsel %vm1463_vm13, 1e+30, %v4982_v56 }
 0x333   : > { %1555 = vmin.xlane.f32.xlu1 %v1495_v58 }
 0x334   : > { %v1432_v3 = vpop.xlane.xlu1 %1431 }
 0x335   : > { %vm1465_vm14 = vcmp.le.f32.partialorder %v4987_v33, %v1432_v3 }
 0x336   : > { %v1497_v35 = vsel %vm1465_vm14, 1e+30, %v4987_v33 }
 0x337   : > { %1559 = vmin.xlane.f32.xlu1 %v1497_v35  ;;  %v3788_v35 = vld [vmem:[%s5085_s23 + $0x50] sm:$0xff]  }
 0x338   : > { %v1434_v21 = vpop.xlane.xlu0 %1433  ;;  %v1500_v54 = vpop.xlane.xlu1 %1499 }
 0x339   : > { %vm1466_vm15 = vcmp.le.f32.partialorder %v4993_v30, %v1434_v21  ;;  %vm1563_vm0 = vcmp.le.f32.partialorder %v4453_v43, %v1500_v54  ;;  %v3773_v43 = vld [vmem:[%s5687_s4 + $0x8] sm:$0xff]   ;;  %v3825_v21 = vpop.eup %3824 }
 0x33a   : > { %v1498_v57 = vsel %vm1466_vm15, 1e+30, %v4993_v30  ;;  %v5062_v17 = vsel %vm1563_vm0, %v3817_v63, 0.0  ;;  %3439 = vmatprep.subr.bf16.mxu0 %v3773_v43  ;;  %v3775_v30 = vld [vmem:[%s5687_s4 + $0x18] sm:$0xff]  }
 0x33b   : > { %1561 = vmin.xlane.f32.xlu0 %v1498_v57  ;;  %1691 = vadd.xlane.f32.xlu1 %v5062_v17  ;;  %v1607_v57 = vmax.f32 %v4724_v12, 1e-16 }
 0x33c   : > { %v1504_v56 = vpop.xlane.xlu1 %1503  ;;  %3440 = vmatpush3.bf16.msra.mxu0 %v3773_v43 }
 0x33d   : > { %vm1565_vm1 = vcmp.le.f32.partialorder %v4464_v11, %v1504_v56  ;;  %v3774_v11 = vld [vmem:[%s5687_s4 + $0x10] sm:$0xff]  }
 0x33e   : > { %v5066_v33 = vsel %vm1565_vm1, %v3819_v15, 0.0  ;;  %3441 = vmatprep.subr.bf16.mxu0 %v3774_v11 }
 0x33f   : > { %1695 = vadd.xlane.f32.xlu1 %v5066_v33 }
 0x340   : > { %3442 = vmatpush3.bf16.msra.mxu0 %v3774_v11 }
 0x341   : > { %3443 = vmatprep.subr.bf16.mxu0 %v3775_v30 }
 0x344   : > { %3444 = vmatpush3.bf16.msra.mxu0 %v3775_v30  ;;  %v3789_v30 = vld [vmem:[%s5085_s23 + $0x58] sm:$0xff]  }
 0x345   : > { %3477 = vmatprep.subr.bf16.mxu0 %v3786_v25 }
 0x347   : > { %3446 = vmatmul.mubr.msk.bf16.vlgmr.msra.gmra.mrb[0].mxu0 %vm2027_vm2, %v3777_v0 }
 0x348   : > { %3449 = vmatprep.mubr.msk.bf16.mxu0 %vm2027_vm2, %v3778_v34  ;;  %3478 = vmatpush3.bf16.msra.mxu0 %v3786_v25  ;;  %v1611_v25 = vmax.f32 %v4746_v29, 1e-16 }
 0x349   : > { %3479 = vmatprep.subr.bf16.mxu0 %v3787_v44 }
 0x34c   : > { %3480 = vmatpush3.bf16.msra.mxu0 %v3787_v44 }
 0x34d   : > { %3481 = vmatprep.subr.bf16.mxu0 %v3790_v8 }
 0x34f   : > { %3450 = vmatmul.mubr.msk.bf16.gmra.mrb[4].mxu0 %vm2027_vm2, %v3779_v52 }
 0x350   : > { %3453 = vmatprep.mubr.msk.bf16.mxu0 %vm2027_vm2, %v3780_v20  ;;  %3482 = vmatpush3.bf16.msra.mxu0 %v3790_v8 }
 0x357   : > { %3454 = vmatmul.mubr.msk.bf16.gmra.mrb[8].mxu0 %vm2027_vm2, %v3781_v7 }
 0x358   : > { %3457 = vmatprep.mubr.msk.bf16.mxu0 %vm2027_vm2, %v3782_v40 }
 0x35f   : > { %3458 = vmatmul.mubr.msk.bf16.gmra.mrb[12].mxu0 %vm2027_vm2, %v3783_v50 }
 0x360   : > { %3461 = vmatprep.mubr.msk.bf16.mxu0 %vm2027_vm2, %v3784_v62 }
 0x367   : > { %3462 = vmatmul.mubr.msk.bf16.gmra.mrb[16].mxu0 %vm2027_vm2, %v3785_v9  ;;  %v1615_v9 = vmax.f32 %v4773_v39, 1e-16 }
 0x368   : > { %3465 = vmatprep.mubr.msk.bf16.mxu0 %vm2027_vm2, %v3788_v35 }
 0x36a   : > { %v1502_v32 = vpop.xlane.xlu0 %1501 }
 0x36b   : > { %vm1564_vm3 = vcmp.le.f32.partialorder %v4661_v48, %v1502_v32  ;;  %v1606_v48 = vmax.f32 %v4510_v36, 1e-16  ;;  %v1614_v32 = vmax.f32 %v5768_v22, 1e-16 }
 0x36c   : > { %v5123_v4 = vsel %vm1564_vm3, %v3821_v60, 0.0 }
 0x36d   : > { %1693 = vadd.xlane.f32.xlu0 %v5123_v4  ;;  %3838 = vrcp.f32 %v1606_v48  ;;  %v1617_v48 = vmax.f32 %v4782_v49, 1e-16 }
 0x36e   : > { %v1506_v58 = vpop.xlane.xlu0 %1505  ;;  %v1508_v3 = vpop.xlane.xlu1 %1507  ;;  %3840 = vrcp.f32 %v1607_v57 }
 0x36f   : > { %vm1566_vm4 = vcmp.le.f32.partialorder %v4475_v16, %v1506_v58  ;;  %vm1567_vm5 = vcmp.le.f32.partialorder %v4670_v18, %v1508_v3  ;;  %v3827_v16 = vpop.eup %3826  ;;  %3842 = vrcp.f32 %v1608_v47  ;;  %3466 = vmatmul.mubr.msk.bf16.gmra.mrb[20].mxu0 %vm2027_vm2, %v3789_v30  ;;  %v3795_v58 = vld [vmem:[%s5686_s3 + $0x28] sm:$0xff]   ;;  %v1616_v3 = vmax.f32 %v4622_v41, 1e-16 }
 0x370   : > { %v5132_v54 = vsel %vm1566_vm4, %v3823_v31, 0.0  ;;  %v5134_v63 = vsel %vm1567_vm5, %v3825_v21, 0.0  ;;  %v3829_v15 = vpop.eup %3828  ;;  %3844 = vrcp.f32 %v1609_v53  ;;  %v1618_v47 = vmax.f32 %v4634_v23, 1e-16 }
 0x371   : > { %1697 = vadd.xlane.f32.xlu0 %v5132_v54  ;;  %1699 = vadd.xlane.f32.xlu1 %v5134_v63  ;;  %v3831_v0 = vpop.eup %3830 }
 0x372   : > { %v1510_v56 = vpop.xlane.xlu0 %1509  ;;  %v1512_v18 = vpop.xlane.xlu1 %1511 }
 0x373   : > { %vm1568_vm6 = vcmp.le.f32.partialorder %v4486_v51, %v1510_v56  ;;  %vm1569_vm7 = vcmp.le.f32.partialorder %v4685_v19, %v1512_v18  ;;  %v3833_v52 = vpop.eup %3832  ;;  %v1610_v19 = vmax.f32 %v4549_v24, 1e-16  ;;  %v3797_v18 = vld [vmem:[%s5085_s23 + $0x78] sm:$0xff]  }
 0x374   : > { %v5144_v43 = vsel %vm1568_vm6, %v3829_v15, 0.0  ;;  %v5146_v11 = vsel %vm1569_vm7, %v3827_v16, 0.0  ;;  %v3835_v44 = vpop.eup %3834  ;;  %v3796_v16 = vld [vmem:[%s5085_s23 + $0x70] sm:$0xff]  }
 0x375   : > { %1701 = vadd.xlane.f32.xlu0 %v5144_v43  ;;  %1703 = vadd.xlane.f32.xlu1 %v5146_v11  ;;  %v3837_v40 = vpop.eup %3836  ;;  %3846 = vrcp.f32 %v1610_v19  ;;  %v3798_v15 = vld [vmem:[%s5686_s3 + $0x30] sm:$0xff]  }
 0x376   : > { %v1514_v34 = vpop.xlane.xlu0 %1513  ;;  %v1516_v51 = vpop.xlane.xlu1 %1515  ;;  %3848 = vrcp.f32 %v1611_v25  ;;  %v5769_v19 = vld [vmem:[#allocation15_spill] sm:$0xff] }
 0x377   : > { %vm1570_vm8 = vcmp.le.f32.partialorder %v4499_v37, %v1514_v34  ;;  %vm1571_vm9 = vcmp.le.f32.partialorder %v4694_v59, %v1516_v51  ;;  %v3791_v59 = vld [vmem:[%s5686_s3 + $0x18] sm:$0xff]   ;;  %v3839_v50 = vpop.eup %3838  ;;  %3850 = vrcp.f32 %v1613_v55  ;;  %v1621_v25 = vmax.f32 %v5769_v19, 1e-16 }
 0x378   : > { %v5155_v20 = vsel %vm1570_vm8, %v3831_v0, 0.0  ;;  %v5157_v7 = vsel %vm1571_vm9, %v3833_v52, 0.0  ;;  %3483 = vmatprep.subr.bf16.mxu0 %v3791_v59  ;;  %v3841_v62 = vpop.eup %3840  ;;  %3852 = vrcp.f32 %v1612_v2  ;;  %v3799_v52 = vld [vmem:[%s5686_s3 + $0x38] sm:$0xff]  }
 0x379   : > { %1705 = vadd.xlane.f32.xlu0 %v5155_v20  ;;  %1707 = vadd.xlane.f32.xlu1 %v5157_v7  ;;  %3854 = vrcp.f32 %v1614_v32 }
 0x37a   : > { %v1518_v37 = vpop.xlane.xlu0 %1517  ;;  %v1520_v10 = vpop.xlane.xlu1 %1519  ;;  %3484 = vmatpush3.bf16.msra.mxu0 %v3791_v59  ;;  %3856 = vrcp.f32 %v1615_v9 }
 0x37b   : > { %vm1572_vm10 = vcmp.le.f32.partialorder %v4504_v42, %v1518_v37  ;;  %vm1573_vm11 = vcmp.le.f32.partialorder %v4711_v13, %v1520_v10  ;;  %v3792_v13 = vld [vmem:[%s5085_s23 + $0x60] sm:$0xff]   ;;  %3485 = vmatprep.subr.bf16.mxu0 %v3794_v5  ;;  %3858 = vrcp.f32 %v1616_v3  ;;  %v5770_v10 = vld [vmem:[#allocation12_spill] sm:$0xff]  ;;  %s3944_s23 = scalar_lea.vmem %s5634_s21, 4096 }
 0x37c   : > { %v5169_v8 = vsel %vm1572_vm10, %v3835_v44, 0.0  ;;  %v5171_v61 = vsel %vm1573_vm11, %v3837_v40, 0.0  ;;  %3469 = vmatprep.mubr.msk.bf16.mxu0 %vm2027_vm2, %v3792_v13  ;;  %3860 = vrcp.f32 %v1617_v48  ;;  %v1620_v59 = vmax.f32 %v5770_v10, 1e-16  ;;  %p3945_p11 = scmp.ne.s32.totalorder %s5634_s21, %s3944_s23  ;;  %p3952_p1 = scmp.lt.s32.totalorder %s3950_s12, %s3944_s23 }
 0x37d   : > { %1709 = vadd.xlane.f32.xlu0 %v5169_v8  ;;  %1711 = vadd.xlane.f32.xlu1 %v5171_v61  ;;  %3862 = vrcp.f32 %v1618_v47 }
 0x37e   : > { %v1522_v42 = vpop.xlane.xlu0 %1521  ;;  %v1524_v26 = vpop.xlane.xlu1 %1523  ;;  %3470 = vmatmul.mubr.msk.bf16.gmra.mrb[24].mxu0 %vm2027_vm2, %v3793_v28  ;;  %p3946_p12 = pnand %p3945_p11, %p4098_p5  ;;  %p3953_p2 = por %p3952_p1, %p3951_p0 }
 0x37f   : > { %vm1574_vm12 = vcmp.le.f32.partialorder %v4510_v36, %v1522_v42  ;;  %vm1575_vm13 = vcmp.le.f32.partialorder %v4724_v12, %v1524_v26  ;;  %v3843_v36 = vpop.eup %3842  ;;  %3486 = vmatpush3.bf16.msra.mxu0 %v3794_v5  ;;  %3473 = vmatprep.mubr.msk.bf16.mxu0 %vm2027_vm2, %v3796_v16 }
 0x380   : > { %v5184_v60 = vsel %vm1574_vm12, %v3839_v50, 0.0  ;;  %v5186_v14 = vsel %vm1575_vm13, %v3841_v62, 0.0  ;;  %v3845_v31 = vpop.eup %3844  ;;  %3487 = vmatprep.subr.bf16.mxu0 %v3795_v58  ;;  %p3947_p13 = pneg %p3946_p12 }
 0x381   : > { %1713 = vadd.xlane.f32.xlu0 %v5184_v60  ;;  %1715 = vadd.xlane.f32.xlu1 %v5186_v14 }
 0x382   : > { %v1526_v12 = vpop.xlane.xlu0 %1525  ;;  %v1528_v46 = vpop.xlane.xlu1 %1527  ;;  %p3954_p3 = pnand %p3953_p2, %p3947_p13 }
 0x383   : > { %vm1576_vm14 = vcmp.le.f32.partialorder %v4543_v1, %v1526_v12  ;;  %vm1577_vm15 = vcmp.le.f32.partialorder %v4735_v6, %v1528_v46  ;;  %v3847_v1 = vpop.eup %3846  ;;  %3488 = vmatpush3.bf16.msra.mxu0 %v3795_v58 }
 0x384   : > { %v5199_v35 = vsel %vm1576_vm14, %v3843_v36, 0.0  ;;  %v5201_v21 = vsel %vm1577_vm15, %v3845_v31, 0.0  ;;  %v3849_v56 = vpop.eup %3848  ;;  %3489 = vmatprep.subr.bf16.mxu0 %v3798_v15  ;;  %v5771_v36 = vld [vmem:[#allocation5_spill] sm:$0xff] }
 0x385   : > { %1717 = vadd.xlane.f32.xlu0 %v5199_v35  ;;  %1719 = vadd.xlane.f32.xlu1 %v5201_v21  ;;  %v1622_v12 = vmax.f32 %v5771_v36, 1e-16 }
 0x386   : > { %v1530_v6 = vpop.xlane.xlu0 %1529  ;;  %v1532_v57 = vpop.xlane.xlu1 %1531  ;;  %3474 = vmatmul.mubr.msk.bf16.gmra.mrb[28].mxu0 %vm2027_vm2, %v3797_v18 }
 0x387   : > { %vm1578_vm0 = vcmp.le.f32.partialorder %v4549_v24, %v1530_v6  ;;  %vm1579_vm1 = vcmp.le.f32.partialorder %v4746_v29, %v1532_v57  ;;  %v1619_v24 = vmax.f32 %v4787_v38, 1e-16  ;;  %v3851_v29 = vpop.eup %3850  ;;  %3490 = vmatpush3.bf16.msra.mxu0 %v3798_v15  ;;  %v5772_v57 = vld [vmem:[#allocation11_spill] sm:$0xff]  ;;  %v5774_v15 = vld [vmem:[#allocation6_spill] sm:$0xff] }
 0x388   : > { %v5214_v30 = vsel %vm1578_vm0, %v3847_v1, 0.0  ;;  %v5216_v53 = vsel %vm1579_vm1, %v3849_v56, 0.0  ;;  %v3853_v51 = vpop.eup %3852  ;;  %3491 = vmatprep.subr.bf16.mxu0 %v3799_v52  ;;  %v1624_v16 = vmax.f32 %v5772_v57, 1e-16  ;;  %v5773_v56 = vld [vmem:[#allocation17_spill] sm:$0xff] }
 0x389   : > { %1721 = vadd.xlane.f32.xlu0 %v5214_v30  ;;  %1723 = vadd.xlane.f32.xlu1 %v5216_v53  ;;  %3864 = vrcp.f32 %v1619_v24  ;;  %v1623_v18 = vmax.f32 %v5773_v56, 1e-16  ;;  %v1625_v47 = vmax.f32 %v5774_v15, 1e-16  ;;  %v5775_v24 = vld [vmem:[#allocation16_spill] sm:$0xff] }
 0x38a   : > { %v1534_v0 = vpop.xlane.xlu0 %1533  ;;  %v1536_v34 = vpop.xlane.xlu1 %1535  ;;  %3866 = vrcp.f32 %v1621_v25 }
 0x38b   : > { %vm1580_vm3 = vcmp.le.f32.partialorder %v4582_v45, %v1534_v0  ;;  %vm1581_vm4 = vcmp.le.f32.partialorder %v4763_v27, %v1536_v34  ;;  %v3855_v45 = vpop.eup %3854  ;;  %3492 = vmatpush3.bf16.msra.mxu0 %v3799_v52  ;;  %3868 = vrcp.f32 %v1620_v59 }
 0x38c   : > { %v5229_v44 = vsel %vm1580_vm3, %v3853_v51, 0.0  ;;  %v5231_v37 = vsel %vm1581_vm4, %v3851_v29, 0.0  ;;  %v3857_v55 = vpop.eup %3856  ;;  %3870 = vrcp.f32 %v1622_v12  ;;  %v1626_v29 = vmax.f32 %v5775_v24, 1e-16 }
 0x38d   : > { %1725 = vadd.xlane.f32.xlu0 %v5229_v44  ;;  %1727 = vadd.xlane.f32.xlu1 %v5231_v37  ;;  %v3859_v42 = vpop.eup %3858  ;;  %3872 = vrcp.f32 %v1624_v16 }
 0x38e   : > { %v1538_v27 = vpop.xlane.xlu0 %1537  ;;  %v1540_v40 = vpop.xlane.xlu1 %1539  ;;  %3874 = vrcp.f32 %v1623_v18 }
 0x38f   : > { %vm1582_vm2 = vcmp.le.f32.partialorder %v5768_v22, %v1538_v27  ;;  %vm1583_vm5 = vcmp.le.f32.partialorder %v4773_v39, %v1540_v40  ;;  %v3861_v62 = vpop.eup %3860  ;;  %3876 = vrcp.f32 %v1625_v47 }
 0x390   : > { %v5238_v2 = vsel %vm1582_vm2, %v3855_v45, 0.0  ;;  %v5240_v50 = vsel %vm1583_vm5, %v3857_v55, 0.0  ;;  %v3863_v28 = vpop.eup %3862  ;;  %3878 = vrcp.f32 %v1626_v29 }
 0x391   : > { %1729 = vadd.xlane.f32.xlu0 %v5238_v2  ;;  %1731 = vadd.xlane.f32.xlu1 %v5240_v50 }
 0x392   : > { %v1542_v26 = vpop.xlane.xlu0 %1541  ;;  %v1544_v13 = vpop.xlane.xlu1 %1543 }
 0x393   : > { %vm1584_vm6 = vcmp.le.f32.partialorder %v4622_v41, %v1542_v26  ;;  %vm1585_vm7 = vcmp.le.f32.partialorder %v4782_v49, %v1544_v13  ;;  %v3865_v9 = vpop.eup %3864  ;;  %v5302_v26 = vld [vmem:[%s5688_s5 + $0x8] sm:$0xff]   ;;  %v5310_v13 = vld [vmem:[%s5688_s5 + $0x10] sm:$0xff]  }
 0x394   : > { %v5246_v39 = vsel %vm1584_vm6, %v3859_v42, 0.0  ;;  %v5248_v22 = vsel %vm1585_vm7, %v3861_v62, 0.0  ;;  %v3867_v46 = vpop.eup %3866  ;;  %v5296_v42 = vld [vmem:[%s5688_s5] sm:$0xff]  }
 0x395   : > { %1733 = vadd.xlane.f32.xlu0 %v5246_v39  ;;  %1735 = vadd.xlane.f32.xlu1 %v5248_v22  ;;  %v3869_v3 = vpop.eup %3868 }
 0x396   : > { %v1546_v5 = vpop.xlane.xlu0 %1545  ;;  %v1548_v32 = vpop.xlane.xlu1 %1547  ;;  %3525 = vmatprep.subr.bf16.mxu0 %v5296_v42  ;;  %3621 = vmatprep.subr.bf16.mxu1 %v5296_v42 }
 0x397   : > { %vm1586_vm8 = vcmp.le.f32.partialorder %v4634_v23, %v1546_v5  ;;  %vm1587_vm9 = vcmp.le.f32.partialorder %v4787_v38, %v1548_v32  ;;  %v3871_v1 = vpop.eup %3870  ;;  %3629 = vmatpush3.bf16.msra.mxu1 %v5296_v42 }
 0x398   : > { %v5255_v41 = vsel %vm1586_vm8, %v3863_v28, 0.0  ;;  %v5257_v49 = vsel %vm1587_vm9, %v3865_v9, 0.0  ;;  %v3873_v34 = vpop.eup %3872  ;;  %3622 = vmatprep.subr.bf16.mxu1 %v5302_v26  ;;  %v5317_v28 = vld [vmem:[%s5688_s5 + $0x18] sm:$0xff]   ;;  %v5324_v9 = vld [vmem:[%s5688_s5 + $0x20] sm:$0xff]  }
 0x399   : > { %1737 = vadd.xlane.f32.xlu0 %v5255_v41  ;;  %1739 = vadd.xlane.f32.xlu1 %v5257_v49 }
 0x39a   : > { %v1550_v31 = vpop.xlane.xlu0 %1549  ;;  %v1552_v58 = vpop.xlane.xlu1 %1551 }
 0x39b   : > { %vm1588_vm10 = vcmp.le.f32.partialorder %v5770_v10, %v1550_v31  ;;  %vm1589_vm11 = vcmp.le.f32.partialorder %v5769_v19, %v1552_v58  ;;  %v3875_v19 = vpop.eup %3874  ;;  %3630 = vmatpush3.bf16.msra.mxu1 %v5302_v26  ;;  %v5331_v31 = vld [vmem:[%s5688_s5 + $0x28] sm:$0xff]  }
 0x39c   : > { %v5263_v23 = vsel %vm1588_vm10, %v3869_v3, 0.0  ;;  %v5265_v38 = vsel %vm1589_vm11, %v3867_v46, 0.0  ;;  %v3877_v59 = vpop.eup %3876  ;;  %3623 = vmatprep.subr.bf16.mxu1 %v5310_v13 }
 0x39d   : > { %1741 = vadd.xlane.f32.xlu0 %v5263_v23  ;;  %1743 = vadd.xlane.f32.xlu1 %v5265_v38  ;;  %v3879_v40 = vpop.eup %3878 }
 0x39f   : > { %3631 = vmatpush3.bf16.msra.mxu1 %v5310_v13 }
 0x3a0   : > { %3624 = vmatprep.subr.bf16.mxu1 %v5317_v28 }
 0x3a3   : > { %3632 = vmatpush3.bf16.msra.mxu1 %v5317_v28 }
 0x3a4   : > { %v1554_v48 = vpop.xlane.xlu0 %1553  ;;  %3625 = vmatprep.subr.bf16.mxu1 %v5324_v9 }
 0x3a5   : > { %vm1590_vm12 = vcmp.le.f32.partialorder %v5771_v36, %v1554_v48 }
 0x3a6   : > { %v5270_v6 = vsel %vm1590_vm12, %v3871_v1, 0.0 }
 0x3a7   : > { %1745 = vadd.xlane.f32.xlu0 %v5270_v6  ;;  %3633 = vmatpush3.bf16.msra.mxu1 %v5324_v9 }
 0x3a8   : > { %3626 = vmatprep.subr.bf16.mxu1 %v5331_v31 }
 0x3ab   : > { %3634 = vmatpush3.bf16.msra.mxu1 %v5331_v31 }
 0x3bc   : > { %v1558_v0 = vpop.xlane.xlu0 %1557 }
 0x3bd   : > { %vm1592_vm13 = vcmp.le.f32.partialorder %v5772_v57, %v1558_v0 }
 0x3be   : > { %v5278_v51 = vsel %vm1592_vm13, %v3873_v34, 0.0 }
 0x3bf   : > { %1749 = vadd.xlane.f32.xlu0 %v5278_v51 }
 0x3c0   : > { %v1556_v52 = vpop.xlane.xlu1 %1555 }
 0x3c1   : > { %vm1591_vm14 = vcmp.le.f32.partialorder %v5773_v56, %v1556_v52 }
 0x3c2   : > { %v5282_v25 = vsel %vm1591_vm14, %v3875_v19, 0.0 }
 0x3c3   : > { %1747 = vadd.xlane.f32.xlu1 %v5282_v25 }
 0x3c4   : > { %v1560_v10 = vpop.xlane.xlu1 %1559 }
 0x3c5   : > { %vm1593_vm15 = vcmp.le.f32.partialorder %v5774_v15, %v1560_v10 }
 0x3c6   : > { %v5286_v45 = vsel %vm1593_vm15, %v3877_v59, 0.0 }
 0x3c7   : > { %1751 = vadd.xlane.f32.xlu1 %v5286_v45 }
 0x3c8   : > { %v1562_v27 = vpop.xlane.xlu0 %1561  ;;  %v1692_v62 = vpop.xlane.xlu1 %1691 }
 0x3c9   : > { %vm1594_vm0 = vcmp.le.f32.partialorder %v5775_v24, %v1562_v27  ;;  %v1755_v5 = vmax.f32 %v1692_v62, 1e-16 }
 0x3ca   : > { %v5290_v55 = vsel %vm1594_vm0, %v3879_v40, 0.0 }
 0x3cb   : > { %1753 = vadd.xlane.f32.xlu0 %v5290_v55  ;;  %3880 = vrcp.f32 %v1755_v5 }
 0x3cc   : > { %v1696_v32 = vpop.xlane.xlu1 %1695 }
 0x3cd   : > { %v1757_v12 = vmax.f32 %v1696_v32, 1e-16 }
 0x3d5   : > { %v3881_v15 = vpop.eup %3880 }
 0x3d6   : > { %v1819_v52 = vmul.f32 %v3881_v15, %v5062_v17 }
 0x3fa   : > { %v1694_v36 = vpop.xlane.xlu0 %1693 }
 0x3fb   : > { %v1756_v46 = vmax.f32 %v1694_v36, 1e-16 }
 0x3fd   : > { %3882 = vrcp.f32 %v1756_v46 }
 0x3fe   : > { %v1698_v58 = vpop.xlane.xlu0 %1697  ;;  %v1700_v3 = vpop.xlane.xlu1 %1699  ;;  %3884 = vrcp.f32 %v1757_v12 }
 0x3ff   : > { %v1758_v48 = vmax.f32 %v1698_v58, 1e-16  ;;  %v1759_v1 = vmax.f32 %v1700_v3, 1e-16 }
 0x401   : > { %3886 = vrcp.f32 %v1758_v48 }
 0x402   : > { %v1702_v57 = vpop.xlane.xlu0 %1701  ;;  %v1704_v16 = vpop.xlane.xlu1 %1703  ;;  %3888 = vrcp.f32 %v1759_v1 }
 0x403   : > { %v1760_v56 = vmax.f32 %v1702_v57, 1e-16  ;;  %v1761_v18 = vmax.f32 %v1704_v16, 1e-16 }
 0x405   : > { %3890 = vrcp.f32 %v1760_v56 }
 0x406   : > { %v1706_v47 = vpop.xlane.xlu0 %1705  ;;  %v1708_v24 = vpop.xlane.xlu1 %1707  ;;  %3892 = vrcp.f32 %v1761_v18 }
 0x407   : > { %v3883_v29 = vpop.eup %3882  ;;  %v1762_v0 = vmax.f32 %v1706_v47, 1e-16  ;;  %v1763_v34 = vmax.f32 %v1708_v24, 1e-16 }
 0x408   : > { %v1820_v19 = vmul.f32 %v3883_v29, %v5123_v4  ;;  %v3885_v10 = vpop.eup %3884 }
 0x409   : > { %3894 = vrcp.f32 %v1762_v0  ;;  %v1821_v36 = vmul.f32 %v3885_v10, %v5066_v33 }
 0x40a   : > { %v1710_v59 = vpop.xlane.xlu0 %1709  ;;  %v1712_v27 = vpop.xlane.xlu1 %1711  ;;  %v1851_v40 = vpack.c.bf16 %v1820_v19, %v1819_v52  ;;  %3896 = vrcp.f32 %v1763_v34 }
 0x40b   : > { %v3887_v62 = vpop.eup %3886  ;;  %v1764_v5 = vmax.f32 %v1710_v59, 1e-16  ;;  %v1765_v32 = vmax.f32 %v1712_v27, 1e-16 }
 0x40c   : > { %v1822_v12 = vmul.f32 %v3887_v62, %v5132_v54  ;;  %3493 = vmatprep.mubr.bf16.mxu0 %v1851_v40  ;;  %v3889_v46 = vpop.eup %3888 }
 0x40d   : > { %3898 = vrcp.f32 %v1764_v5  ;;  %v1823_v57 = vmul.f32 %v3889_v46, %v5134_v63 }
 0x40e   : > { %v1714_v58 = vpop.xlane.xlu0 %1713  ;;  %v1716_v17 = vpop.xlane.xlu1 %1715  ;;  %v1852_v3 = vpack.c.bf16 %v1822_v12, %v1821_v36  ;;  %3900 = vrcp.f32 %v1765_v32 }
 0x40f   : > { %v3891_v4 = vpop.eup %3890  ;;  %v1766_v48 = vmax.f32 %v1714_v58, 1e-16  ;;  %v1767_v1 = vmax.f32 %v1716_v17, 1e-16 }
 0x410   : > { %3494 = vmatmul.mubr.bf16.vlgmr.msra.gmra.mrb[0].mxu0 %v1852_v3  ;;  %v1824_v16 = vmul.f32 %v3891_v4, %v5144_v43  ;;  %v3893_v56 = vpop.eup %3892 }
 0x411   : > { %3902 = vrcp.f32 %v1766_v48  ;;  %3526 = vmatpush3.bf16.msra.mxu0 %v5296_v42  ;;  %v1825_v29 = vmul.f32 %v3893_v56, %v5146_v11 }
 0x412   : > { %v1718_v33 = vpop.xlane.xlu0 %1717  ;;  %v1720_v54 = vpop.xlane.xlu1 %1719  ;;  %v1853_v18 = vpack.c.bf16 %v1824_v16, %v1823_v57  ;;  %3527 = vmatprep.subr.bf16.mxu0 %v5302_v26  ;;  %3904 = vrcp.f32 %v1767_v1 }
 0x413   : > { %v3895_v15 = vpop.eup %3894  ;;  %v1768_v47 = vmax.f32 %v1718_v33, 1e-16  ;;  %v1769_v24 = vmax.f32 %v1720_v54, 1e-16 }
 0x414   : > { %3497 = vmatprep.mubr.bf16.mxu0 %v1853_v18  ;;  %v1826_v63 = vmul.f32 %v3895_v15, %v5155_v20  ;;  %v3897_v0 = vpop.eup %3896 }
 0x415   : > { %3906 = vrcp.f32 %v1768_v47  ;;  %3528 = vmatpush3.bf16.msra.mxu0 %v5302_v26  ;;  %v1827_v59 = vmul.f32 %v3897_v0, %v5157_v7 }
 0x416   : > { %v1722_v43 = vpop.xlane.xlu0 %1721  ;;  %v1724_v42 = vpop.xlane.xlu1 %1723  ;;  %v1854_v34 = vpack.c.bf16 %v1826_v63, %v1825_v29  ;;  %3529 = vmatprep.subr.bf16.mxu0 %v5310_v13  ;;  %3908 = vrcp.f32 %v1769_v24 }
 0x417   : > { %v3899_v52 = vpop.eup %3898  ;;  %v1770_v19 = vmax.f32 %v1722_v43, 1e-16  ;;  %v1771_v10 = vmax.f32 %v1724_v42, 1e-16 }
 0x418   : > { %3498 = vmatmul.mubr.bf16.gmra.mrb[4].mxu0 %v1854_v34  ;;  %v1828_v11 = vmul.f32 %v3899_v52, %v5169_v8  ;;  %v3901_v27 = vpop.eup %3900 }
 0x419   : > { %3910 = vrcp.f32 %v1770_v19  ;;  %3530 = vmatpush3.bf16.msra.mxu0 %v5310_v13  ;;  %v1829_v36 = vmul.f32 %v3901_v27, %v5171_v61 }
 0x41a   : > { %v1726_v20 = vpop.xlane.xlu0 %1725  ;;  %v1728_v26 = vpop.xlane.xlu1 %1727  ;;  %v1855_v40 = vpack.c.bf16 %v1828_v11, %v1827_v59  ;;  %3531 = vmatprep.subr.bf16.mxu0 %v5317_v28  ;;  %3912 = vrcp.f32 %v1771_v10 }
 0x41b   : > { %v3903_v62 = vpop.eup %3902  ;;  %v1772_v5 = vmax.f32 %v1726_v20, 1e-16  ;;  %v1773_v32 = vmax.f32 %v1728_v26, 1e-16 }
 0x41c   : > { %3501 = vmatprep.mubr.bf16.mxu0 %v1855_v40  ;;  %v1830_v7 = vmul.f32 %v3903_v62, %v5184_v60  ;;  %v3905_v12 = vpop.eup %3904 }
 0x41d   : > { %3914 = vrcp.f32 %v1772_v5  ;;  %3532 = vmatpush3.bf16.msra.mxu0 %v5317_v28  ;;  %v1831_v4 = vmul.f32 %v3905_v12, %v5186_v14 }
 0x41e   : > { %v1730_v8 = vpop.xlane.xlu0 %1729  ;;  %v1732_v13 = vpop.xlane.xlu1 %1731  ;;  %v1856_v46 = vpack.c.bf16 %v1830_v7, %v1829_v36  ;;  %3533 = vmatprep.subr.bf16.mxu0 %v5324_v9  ;;  %3916 = vrcp.f32 %v1773_v32 }
 0x41f   : > { %v3907_v58 = vpop.eup %3906  ;;  %v1774_v17 = vmax.f32 %v1730_v8, 1e-16  ;;  %v1775_v3 = vmax.f32 %v1732_v13, 1e-16 }
 0x420   : > { %3502 = vmatmul.mubr.bf16.gmra.mrb[8].mxu0 %v1856_v46  ;;  %v1832_v61 = vmul.f32 %v3907_v58, %v5199_v35  ;;  %v3909_v48 = vpop.eup %3908 }
 0x421   : > { %3918 = vrcp.f32 %v1774_v17  ;;  %3534 = vmatpush3.bf16.msra.mxu0 %v5324_v9  ;;  %v1833_v33 = vmul.f32 %v3909_v48, %v5201_v21 }
 0x422   : > { %v1734_v60 = vpop.xlane.xlu0 %1733  ;;  %v1736_v28 = vpop.xlane.xlu1 %1735  ;;  %v1857_v1 = vpack.c.bf16 %v1832_v61, %v1831_v4  ;;  %3535 = vmatprep.subr.bf16.mxu0 %v5331_v31  ;;  %3920 = vrcp.f32 %v1775_v3 }
 0x423   : > { %v3911_v57 = vpop.eup %3910  ;;  %v1776_v16 = vmax.f32 %v1734_v60, 1e-16  ;;  %v1777_v56 = vmax.f32 %v1736_v28, 1e-16 }
 0x424   : > { %3505 = vmatprep.mubr.bf16.mxu0 %v1857_v1  ;;  %v1834_v14 = vmul.f32 %v3911_v57, %v5214_v30  ;;  %v3913_v54 = vpop.eup %3912 }
 0x425   : > { %3922 = vrcp.f32 %v1776_v16  ;;  %3536 = vmatpush3.bf16.msra.mxu0 %v5331_v31  ;;  %v1835_v29 = vmul.f32 %v3913_v54, %v5216_v53  ;;  %v3806_v16 = vld [vmem:[%s5688_s5 + $0x30] sm:$0xff]  }
 0x426   : > { %v1738_v35 = vpop.xlane.xlu0 %1737  ;;  %v1740_v9 = vpop.xlane.xlu1 %1739  ;;  %v1858_v18 = vpack.c.bf16 %v1834_v14, %v1833_v33  ;;  %3924 = vrcp.f32 %v1777_v56  ;;  %3537 = vmatprep.subr.bf16.mxu0 %v3806_v16  ;;  %3627 = vmatprep.subr.bf16.mxu1 %v3806_v16 }
 0x427   : > { %v3915_v15 = vpop.eup %3914  ;;  %v1778_v47 = vmax.f32 %v1738_v35, 1e-16  ;;  %v1779_v24 = vmax.f32 %v1740_v9, 1e-16  ;;  %3635 = vmatpush3.bf16.msra.mxu1 %v3806_v16 }
 0x428   : > { %3506 = vmatmul.mubr.bf16.gmra.mrb[12].mxu0 %v1858_v18  ;;  %v1836_v63 = vmul.f32 %v3915_v15, %v5229_v44  ;;  %v3917_v0 = vpop.eup %3916 }
 0x429   : > { %3926 = vrcp.f32 %v1778_v47  ;;  %v1837_v31 = vmul.f32 %v3917_v0, %v5231_v37  ;;  %3538 = vmatpush3.bf16.msra.mxu0 %v3806_v16 }
 0x42a   : > { %v1742_v21 = vpop.xlane.xlu0 %1741  ;;  %v1859_v30 = vpack.c.bf16 %v1836_v63, %v1835_v29  ;;  %3928 = vrcp.f32 %v1779_v24  ;;  %v1744_v19 = vpop.xlane.xlu1 %1743 }
 0x42b   : > { %v3919_v43 = vpop.eup %3918  ;;  %v1780_v42 = vmax.f32 %v1742_v21, 1e-16  ;;  %v1781_v27 = vmax.f32 %v1744_v19, 1e-16 }
 0x42c   : > { %3509 = vmatprep.mubr.bf16.mxu0 %v1859_v30  ;;  %v1838_v34 = vmul.f32 %v3919_v43, %v5238_v2  ;;  %v3921_v52 = vpop.eup %3920 }
 0x42d   : > { %3930 = vrcp.f32 %v1780_v42  ;;  %v1839_v53 = vmul.f32 %v3921_v52, %v5240_v50 }
 0x42e   : > { %v1860_v10 = vpack.c.bf16 %v1838_v34, %v1837_v31  ;;  %3932 = vrcp.f32 %v1781_v27 }
 0x42f   : > { %v3923_v59 = vpop.eup %3922 }
 0x430   : > { %3510 = vmatmul.mubr.bf16.gmra.mrb[16].mxu0 %v1860_v10  ;;  %v1840_v44 = vmul.f32 %v3923_v59, %v5246_v39  ;;  %v3925_v11 = vpop.eup %3924 }
 0x431   : > { %v1841_v37 = vmul.f32 %v3925_v11, %v5248_v22 }
 0x432   : > { %v1861_v20 = vpack.c.bf16 %v1840_v44, %v1839_v53 }
 0x433   : > { %v3927_v26 = vpop.eup %3926 }
 0x434   : > { %v1746_v40 = vpop.xlane.xlu0 %1745  ;;  %3513 = vmatprep.mubr.bf16.mxu0 %v1861_v20  ;;  %v1842_v2 = vmul.f32 %v3927_v26, %v5255_v41  ;;  %v3929_v62 = vpop.eup %3928 }
 0x435   : > { %v1782_v5 = vmax.f32 %v1746_v40, 1e-16  ;;  %v1843_v50 = vmul.f32 %v3929_v62, %v5257_v49 }
 0x436   : > { %v1862_v32 = vpack.c.bf16 %v1842_v2, %v1841_v37 }
 0x437   : > { %v3931_v36 = vpop.eup %3930  ;;  %3934 = vrcp.f32 %v1782_v5  ;;  %v3809_v5 = vld [vmem:[%s5689_s6 + $0x8] sm:$0xff]  }
 0x438   : > { %3514 = vmatmul.mubr.bf16.gmra.mrb[20].mxu0 %v1862_v32  ;;  %v1844_v39 = vmul.f32 %v3931_v36, %v5263_v23  ;;  %v3933_v12 = vpop.eup %3932 }
 0x439   : > { %v1845_v13 = vmul.f32 %v3933_v12, %v5265_v38 }
 0x43a   : > { %v1863_v7 = vpack.c.bf16 %v1844_v39, %v1843_v50 }
 0x43c   : > { %3517 = vmatprep.mubr.bf16.mxu0 %v1863_v7 }
 0x441   : > { %v3935_v8 = vpop.eup %3934 }
 0x442   : > { %v1846_v22 = vmul.f32 %v3935_v8, %v5270_v6 }
 0x444   : > { %v1864_v41 = vpack.c.bf16 %v1846_v22, %v1845_v13  ;;  %v3810_v13 = vld [vmem:[%s5689_s6 + $0x10] sm:$0xff]  }
 0x446   : > { %3518 = vmatmul.mubr.bf16.gmra.mrb[24].mxu0 %v1864_v41 }
 0x44c   : > { %v1750_v46 = vpop.xlane.xlu0 %1749 }
 0x44d   : > { %v1784_v58 = vmax.f32 %v1750_v46, 1e-16 }
 0x44f   : > { %3936 = vrcp.f32 %v1784_v58 }
 0x450   : > { %v1748_v17 = vpop.xlane.xlu1 %1747 }
 0x451   : > { %v1783_v3 = vmax.f32 %v1748_v17, 1e-16 }
 0x453   : > { %3938 = vrcp.f32 %v1783_v3 }
 0x454   : > { %v1752_v4 = vpop.xlane.xlu1 %1751 }
 0x455   : > { %v1785_v49 = vmax.f32 %v1752_v4, 1e-16 }
 0x457   : > { %3940 = vrcp.f32 %v1785_v49  ;;  %v3811_v49 = vld [vmem:[%s5689_s6 + $0x18] sm:$0xff]  }
 0x458   : > { %v1754_v61 = vpop.xlane.xlu0 %1753 }
 0x459   : > { %v1786_v23 = vmax.f32 %v1754_v61, 1e-16  ;;  %v3937_v48 = vpop.eup %3936 }
 0x45a   : > { %v1848_v6 = vmul.f32 %v3937_v48, %v5278_v51  ;;  %v3807_v51 = vld [vmem:[%s5688_s5 + $0x38] sm:$0xff]  }
 0x45b   : > { %3942 = vrcp.f32 %v1786_v23  ;;  %3539 = vmatprep.subr.bf16.mxu0 %v3807_v51  ;;  %3628 = vmatprep.subr.bf16.mxu1 %v3807_v51 }
 0x45c   : > { %3540 = vmatpush3.bf16.msra.mxu0 %v3807_v51  ;;  %3636 = vmatpush3.bf16.msra.mxu1 %v3807_v51 }
 0x45d   : > { %v3939_v60 = vpop.eup %3938 }
 0x45e   : > { %v1847_v38 = vmul.f32 %v3939_v60, %v5282_v25  ;;  %v3808_v25 = vld [vmem:[%s5689_s6] sm:$0xff]  }
 0x45f   : > { %3573 = vmatprep.subr.bf16.mxu1 %v3808_v25 }
 0x460   : > { %v1865_v28 = vpack.c.bf16 %v1848_v6, %v1847_v38 }
 0x461   : > { %v3941_v1 = vpop.eup %3940 }
 0x462   : > { %3521 = vmatprep.mubr.bf16.mxu0 %v1865_v28  ;;  %v1849_v56 = vmul.f32 %v3941_v1, %v5286_v45  ;;  %v5391_v45 = vld [vmem:[%s5690_s7] ss:$0 sm:$0xff] }
 0x463   : > { %v3812_v1 = vld [vmem:[%s5689_s6 + $0x20] sm:$0xff]  }
 0x465   : > { %v3943_v57 = vpop.eup %3942 }
 0x466   : > { %v1850_v33 = vmul.f32 %v3943_v57, %v5290_v55 }
 0x468   : > { %v1866_v14 = vpack.c.bf16 %v1850_v33, %v1849_v56 }
 0x46a   : > { %3522 = vmatmul.mubr.bf16.gmra.mrb[28].mxu0 %v1866_v14 }
 0x4e3   : > { %v3495_v55 = vpop.f32.mrb[0].mxu0 }
 0x4e4   : > { %v2453_v54 = vadd.f32 %v3495_v55, %v5391_v45  ;;  %v2319_v35 = vpop.f32.mrb[1].mxu0  ;;  %v3813_v55 = vld [vmem:[%s5689_s6 + $0x28] sm:$0xff]  }
 0x4e5   : > { %v2451_v9 = vadd.f32 %v5391_v45, %v2319_v35  ;;  %v3496_v18 = vpop.f32.mrb[2].mxu0 }
 0x4e6   : > { %v2454_v15 = vadd.f32 %v3496_v18, %v5391_v45  ;;  %v2322_v47 = vpop.f32.mrb[3].mxu0  ;;  %v2485_v29 = vmax.f32 %v2453_v54, 0.0 }
 0x4e7   : > { %v2452_v24 = vadd.f32 %v5391_v45, %v2322_v47  ;;  %v2483_v0 = vmax.f32 %v2451_v9, 0.0 }
 0x4e8   : > { %v2486_v63 = vmax.f32 %v2454_v15, 0.0 }
 0x4e9   : > { %v2484_v21 = vmax.f32 %v2452_v24, 0.0 }
 0x4ea   : > { %v2516_v30 = vpack.c.bf16 %v2486_v63, %v2485_v29 }
 0x4eb   : > { %v2515_v43 = vpack.c.bf16 %v2484_v21, %v2483_v0  ;;  %v3499_v42 = vpop.f32.mrb[4].mxu0 }
 0x4ec   : > { %v2457_v31 = vadd.f32 %v3499_v42, %v5391_v45  ;;  %v2335_v34 = vpop.f32.mrb[5].mxu0 }
 0x4ed   : > { %v2455_v52 = vadd.f32 %v5391_v45, %v2335_v34  ;;  %v3500_v19 = vpop.f32.mrb[6].mxu0  ;;  %3541 = vmatprep.mubr.bf16.mxu0 %v2515_v43 }
 0x4ee   : > { %v2458_v10 = vadd.f32 %v3500_v19, %v5391_v45  ;;  %v2338_v59 = vpop.f32.mrb[7].mxu0  ;;  %3542 = vmatmul.mubr.bf16.vlgmr.msra.gmra.mrb[32].mxu0 %v2516_v30  ;;  %v2489_v44 = vmax.f32 %v2457_v31, 0.0 }
 0x4ef   : > { %v2456_v53 = vadd.f32 %v5391_v45, %v2338_v59  ;;  %v2487_v27 = vmax.f32 %v2455_v52, 0.0 }
 0x4f0   : > { %v2490_v11 = vmax.f32 %v2458_v10, 0.0 }
 0x4f1   : > { %v2488_v20 = vmax.f32 %v2456_v53, 0.0 }
 0x4f2   : > { %v2518_v26 = vpack.c.bf16 %v2490_v11, %v2489_v44 }
 0x4f3   : > { %v3503_v40 = vpop.f32.mrb[8].mxu0  ;;  %v2517_v37 = vpack.c.bf16 %v2488_v20, %v2487_v27 }
 0x4f4   : > { %v2461_v2 = vadd.f32 %v3503_v40, %v5391_v45  ;;  %v2351_v62 = vpop.f32.mrb[9].mxu0 }
 0x4f5   : > { %v2459_v32 = vadd.f32 %v5391_v45, %v2351_v62  ;;  %v3504_v36 = vpop.f32.mrb[10].mxu0  ;;  %3545 = vmatprep.mubr.bf16.mxu1 %v2517_v37 }
 0x4f6   : > { %v2462_v50 = vadd.f32 %v3504_v36, %v5391_v45  ;;  %v2354_v39 = vpop.f32.mrb[11].mxu0  ;;  %3546 = vmatmul.mubr.bf16.vlgmr.msra.gmra.mrb[0].mxu1 %v2518_v26  ;;  %v2493_v12 = vmax.f32 %v2461_v2, 0.0 }
 0x4f7   : > { %v2460_v7 = vadd.f32 %v5391_v45, %v2354_v39  ;;  %3574 = vmatpush3.bf16.msra.mxu1 %v3808_v25  ;;  %v2491_v22 = vmax.f32 %v2459_v32, 0.0 }
 0x4f8   : > { %v2494_v8 = vmax.f32 %v2462_v50, 0.0  ;;  %3575 = vmatprep.subr.bf16.mxu1 %v3809_v5 }
 0x4f9   : > { %v2492_v41 = vmax.f32 %v2460_v7, 0.0 }
 0x4fa   : > { %v2520_v46 = vpack.c.bf16 %v2494_v8, %v2493_v12 }
 0x4fb   : > { %v2519_v58 = vpack.c.bf16 %v2492_v41, %v2491_v22  ;;  %v3507_v17 = vpop.f32.mrb[12].mxu0  ;;  %3576 = vmatpush3.bf16.msra.mxu1 %v3809_v5 }
 0x4fc   : > { %v2465_v3 = vadd.f32 %v3507_v17, %v5391_v45  ;;  %v2367_v4 = vpop.f32.mrb[13].mxu0  ;;  %3577 = vmatprep.subr.bf16.mxu1 %v3810_v13 }
 0x4fd   : > { %v2463_v61 = vadd.f32 %v5391_v45, %v2367_v4  ;;  %v3508_v23 = vpop.f32.mrb[14].mxu0  ;;  %3549 = vmatprep.mubr.bf16.mxu1 %v2519_v58 }
 0x4fe   : > { %v2466_v48 = vadd.f32 %v3508_v23, %v5391_v45  ;;  %v2370_v60 = vpop.f32.mrb[15].mxu0  ;;  %3550 = vmatmul.mubr.bf16.gmra.mrb[4].mxu1 %v2520_v46  ;;  %v2497_v6 = vmax.f32 %v2465_v3, 0.0 }
 0x4ff   : > { %v2464_v38 = vadd.f32 %v5391_v45, %v2370_v60  ;;  %3578 = vmatpush3.bf16.msra.mxu1 %v3810_v13  ;;  %v2495_v57 = vmax.f32 %v2463_v61, 0.0 }
 0x500   : > { %v2498_v28 = vmax.f32 %v2466_v48, 0.0  ;;  %3579 = vmatprep.subr.bf16.mxu1 %v3811_v49 }
 0x501   : > { %v2496_v16 = vmax.f32 %v2464_v38, 0.0  ;;  %v3814_v38 = vld [vmem:[%s5689_s6 + $0x30] sm:$0xff]  }
 0x502   : > { %v2522_v56 = vpack.c.bf16 %v2498_v28, %v2497_v6 }
 0x503   : > { %v2521_v33 = vpack.c.bf16 %v2496_v16, %v2495_v57  ;;  %v3511_v14 = vpop.f32.mrb[16].mxu0  ;;  %3580 = vmatpush3.bf16.msra.mxu1 %v3811_v49 }
 0x504   : > { %v2469_v51 = vadd.f32 %v3511_v14, %v5391_v45  ;;  %v2383_v25 = vpop.f32.mrb[17].mxu0  ;;  %3581 = vmatprep.subr.bf16.mxu1 %v3812_v1 }
 0x505   : > { %v2467_v54 = vadd.f32 %v5391_v45, %v2383_v25  ;;  %v3512_v35 = vpop.f32.mrb[18].mxu0  ;;  %3553 = vmatprep.mubr.bf16.mxu1 %v2521_v33 }
 0x506   : > { %v2470_v9 = vadd.f32 %v3512_v35, %v5391_v45  ;;  %v2386_v18 = vpop.f32.mrb[19].mxu0  ;;  %3554 = vmatmul.mubr.bf16.gmra.mrb[8].mxu1 %v2522_v56  ;;  %v2501_v47 = vmax.f32 %v2469_v51, 0.0 }
 0x507   : > { %v2468_v15 = vadd.f32 %v5391_v45, %v2386_v18  ;;  %3582 = vmatpush3.bf16.msra.mxu1 %v3812_v1  ;;  %v2499_v29 = vmax.f32 %v2467_v54, 0.0  ;;  %v3815_v1 = vld [vmem:[%s5689_s6 + $0x38] sm:$0xff]  }
 0x508   : > { %v2502_v24 = vmax.f32 %v2470_v9, 0.0  ;;  %3583 = vmatprep.subr.bf16.mxu1 %v3813_v55 }
 0x509   : > { %v2500_v63 = vmax.f32 %v2468_v15, 0.0 }
 0x50a   : > { %v2524_v0 = vpack.c.bf16 %v2502_v24, %v2501_v47 }
 0x50b   : > { %v2523_v21 = vpack.c.bf16 %v2500_v63, %v2499_v29  ;;  %v3515_v30 = vpop.f32.mrb[20].mxu0  ;;  %3584 = vmatpush3.bf16.msra.mxu1 %v3813_v55 }
 0x50c   : > { %v2473_v43 = vadd.f32 %v3515_v30, %v5391_v45  ;;  %v2399_v42 = vpop.f32.mrb[21].mxu0  ;;  %3585 = vmatprep.subr.bf16.mxu1 %v3814_v38 }
 0x50d   : > { %v2471_v31 = vadd.f32 %v5391_v45, %v2399_v42  ;;  %v3516_v34 = vpop.f32.mrb[22].mxu0  ;;  %3557 = vmatprep.mubr.bf16.mxu1 %v2523_v21 }
 0x50e   : > { %v2474_v52 = vadd.f32 %v3516_v34, %v5391_v45  ;;  %v2402_v19 = vpop.f32.mrb[23].mxu0  ;;  %3558 = vmatmul.mubr.bf16.gmra.mrb[12].mxu1 %v2524_v0  ;;  %v2505_v59 = vmax.f32 %v2473_v43, 0.0 }
 0x50f   : > { %v2472_v10 = vadd.f32 %v5391_v45, %v2402_v19  ;;  %v2503_v44 = vmax.f32 %v2471_v31, 0.0  ;;  %3586 = vmatpush3.bf16.msra.mxu1 %v3814_v38 }
 0x510   : > { %v2506_v53 = vmax.f32 %v2474_v52, 0.0  ;;  %3587 = vmatprep.subr.bf16.mxu1 %v3815_v1 }
 0x511   : > { %v2504_v11 = vmax.f32 %v2472_v10, 0.0 }
 0x512   : > { %v2526_v27 = vpack.c.bf16 %v2506_v53, %v2505_v59 }
 0x513   : > { %v2525_v20 = vpack.c.bf16 %v2504_v11, %v2503_v44  ;;  %3588 = vmatpush3.bf16.msra.mxu1 %v3815_v1 }
 0x515   : > { %3561 = vmatprep.mubr.bf16.mxu1 %v2525_v20 }
 0x516   : > { %3562 = vmatmul.mubr.bf16.gmra.mrb[16].mxu1 %v2526_v27 }
 0x519   : > { %v3519_v26 = vpop.f32.mrb[24].mxu0 }
 0x51a   : > { %v2477_v40 = vadd.f32 %v3519_v26, %v5391_v45  ;;  %v2415_v37 = vpop.f32.mrb[25].mxu0 }
 0x51b   : > { %v2475_v2 = vadd.f32 %v5391_v45, %v2415_v37  ;;  %v3520_v62 = vpop.f32.mrb[26].mxu0 }
 0x51c   : > { %v2478_v5 = vadd.f32 %v3520_v62, %v5391_v45  ;;  %v2418_v32 = vpop.f32.mrb[27].mxu0  ;;  %v2509_v50 = vmax.f32 %v2477_v40, 0.0 }
 0x51d   : > { %v2476_v36 = vadd.f32 %v5391_v45, %v2418_v32  ;;  %v2507_v7 = vmax.f32 %v2475_v2, 0.0 }
 0x51e   : > { %v2510_v39 = vmax.f32 %v2478_v5, 0.0 }
 0x51f   : > { %v2508_v12 = vmax.f32 %v2476_v36, 0.0 }
 0x520   : > { %v2528_v8 = vpack.c.bf16 %v2510_v39, %v2509_v50 }
 0x521   : > { %v2527_v13 = vpack.c.bf16 %v2508_v12, %v2507_v7 }
 0x523   : > { %3565 = vmatprep.mubr.bf16.mxu1 %v2527_v13 }
 0x524   : > { %3566 = vmatmul.mubr.bf16.gmra.mrb[20].mxu1 %v2528_v8 }
 0x53d   : > { %v3523_v22 = vpop.f32.mrb[28].mxu0 }
 0x53e   : > { %v2481_v41 = vadd.f32 %v3523_v22, %v5391_v45  ;;  %v2431_v46 = vpop.f32.mrb[29].mxu0 }
 0x53f   : > { %v2479_v58 = vadd.f32 %v5391_v45, %v2431_v46  ;;  %v3524_v17 = vpop.f32.mrb[30].mxu0 }
 0x540   : > { %v2482_v3 = vadd.f32 %v3524_v17, %v5391_v45  ;;  %v2434_v4 = vpop.f32.mrb[31].mxu0  ;;  %v2513_v61 = vmax.f32 %v2481_v41, 0.0 }
 0x541   : > { %v2480_v49 = vadd.f32 %v5391_v45, %v2434_v4  ;;  %v2511_v48 = vmax.f32 %v2479_v58, 0.0  ;;  %v5449_v45 = vld [vmem:[%s5690_s7 + $0x1] ss:$0 sm:$0xff] }
 0x542   : > { %v2514_v23 = vmax.f32 %v2482_v3, 0.0 }
 0x543   : > { %v2512_v60 = vmax.f32 %v2480_v49, 0.0 }
 0x544   : > { %v2530_v6 = vpack.c.bf16 %v2514_v23, %v2513_v61 }
 0x545   : > { %v2529_v28 = vpack.c.bf16 %v2512_v60, %v2511_v48 }
 0x547   : > { %3569 = vmatprep.mubr.bf16.mxu1 %v2529_v28 }
 0x548   : > { %3570 = vmatmul.mubr.bf16.gmra.mrb[24].mxu1 %v2530_v6 }
 0x5c1   : > { %v3543_v57 = vpop.f32.mrb[32].mxu0 }
 0x5c2   : > { %v2643_v16 = vadd.f32 %v3543_v57, %v5449_v45  ;;  %v2634_v56 = vpop.f32.mrb[33].mxu0 }
 0x5c3   : > { %v2635_v33 = vadd.f32 %v5449_v45, %v2634_v56  ;;  %v3544_v14 = vpop.f32.mrb[34].mxu0 }
 0x5c4   : > { %v2646_v51 = vadd.f32 %v3544_v14, %v5449_v45  ;;  %v2637_v25 = vpop.f32.mrb[35].mxu0  ;;  %v2763_v54 = vmax.f32 %v2643_v16, 0.0 }
 0x5c5   : > { %v2638_v55 = vadd.f32 %v5449_v45, %v2637_v25  ;;  %v2761_v9 = vmax.f32 %v2635_v33, 0.0 }
 0x5c6   : > { %v2764_v35 = vmax.f32 %v2646_v51, 0.0 }
 0x5c7   : > { %v2762_v18 = vmax.f32 %v2638_v55, 0.0 }
 0x5c8   : > { %v2794_v15 = vpack.c.bf16 %v2764_v35, %v2763_v54 }
 0x5c9   : > { %v2793_v47 = vpack.c.bf16 %v2762_v18, %v2761_v9  ;;  %v3547_v24 = vpop.f32.mrb[0].mxu1 }
 0x5ca   : > { %v2659_v29 = vadd.f32 %v3547_v24, %v5449_v45  ;;  %v2650_v63 = vpop.f32.mrb[1].mxu1 }
 0x5cb   : > { %v2651_v0 = vadd.f32 %v5449_v45, %v2650_v63  ;;  %v3548_v21 = vpop.f32.mrb[2].mxu1  ;;  %3589 = vmatprep.mubr.bf16.mxu1 %v2793_v47 }
 0x5cc   : > { %v2662_v30 = vadd.f32 %v3548_v21, %v5449_v45  ;;  %v2653_v43 = vpop.f32.mrb[3].mxu1  ;;  %3590 = vmatmul.mubr.bf16.vlgmr.msra.gmra.mrb[28].mxu1 %v2794_v15  ;;  %v2767_v31 = vmax.f32 %v2659_v29, 0.0 }
 0x5cd   : > { %v2654_v42 = vadd.f32 %v5449_v45, %v2653_v43  ;;  %v2765_v52 = vmax.f32 %v2651_v0, 0.0 }
 0x5ce   : > { %v2768_v34 = vmax.f32 %v2662_v30, 0.0 }
 0x5cf   : > { %v2766_v19 = vmax.f32 %v2654_v42, 0.0 }
 0x5d0   : > { %v2796_v10 = vpack.c.bf16 %v2768_v34, %v2767_v31 }
 0x5d1   : > { %v2795_v59 = vpack.c.bf16 %v2766_v19, %v2765_v52  ;;  %v3551_v53 = vpop.f32.mrb[4].mxu1 }
 0x5d2   : > { %v2675_v44 = vadd.f32 %v3551_v53, %v5449_v45  ;;  %v2666_v11 = vpop.f32.mrb[5].mxu1 }
 0x5d3   : > { %v2667_v27 = vadd.f32 %v5449_v45, %v2666_v11  ;;  %v3552_v20 = vpop.f32.mrb[6].mxu1  ;;  %3593 = vmatprep.mubr.bf16.mxu1 %v2795_v59 }
 0x5d4   : > { %v2678_v26 = vadd.f32 %v3552_v20, %v5449_v45  ;;  %v2669_v40 = vpop.f32.mrb[7].mxu1  ;;  %3594 = vmatmul.mubr.bf16.gmra.mrb[32].mxu1 %v2796_v10  ;;  %v2771_v2 = vmax.f32 %v2675_v44, 0.0 }
 0x5d5   : > { %v2670_v37 = vadd.f32 %v5449_v45, %v2669_v40  ;;  %v2769_v5 = vmax.f32 %v2667_v27, 0.0 }
 0x5d6   : > { %v2772_v62 = vmax.f32 %v2678_v26, 0.0 }
 0x5d7   : > { %v2770_v32 = vmax.f32 %v2670_v37, 0.0 }
 0x5d8   : > { %v2798_v36 = vpack.c.bf16 %v2772_v62, %v2771_v2 }
 0x5d9   : > { %v2797_v50 = vpack.c.bf16 %v2770_v32, %v2769_v5  ;;  %v3555_v39 = vpop.f32.mrb[8].mxu1 }
 0x5da   : > { %v2691_v7 = vadd.f32 %v3555_v39, %v5449_v45  ;;  %v2682_v12 = vpop.f32.mrb[9].mxu1 }
 0x5db   : > { %v2683_v8 = vadd.f32 %v5449_v45, %v2682_v12  ;;  %v3556_v13 = vpop.f32.mrb[10].mxu1  ;;  %3597 = vmatprep.mubr.bf16.mxu1 %v2797_v50 }
 0x5dc   : > { %v2694_v22 = vadd.f32 %v3556_v13, %v5449_v45  ;;  %v2685_v41 = vpop.f32.mrb[11].mxu1  ;;  %3598 = vmatmul.mubr.bf16.gmra.mrb[36].mxu1 %v2798_v36  ;;  %v2775_v58 = vmax.f32 %v2691_v7, 0.0 }
 0x5dd   : > { %v2686_v46 = vadd.f32 %v5449_v45, %v2685_v41  ;;  %v2773_v3 = vmax.f32 %v2683_v8, 0.0 }
 0x5de   : > { %v2776_v17 = vmax.f32 %v2694_v22, 0.0 }
 0x5df   : > { %v2774_v4 = vmax.f32 %v2686_v46, 0.0  ;;  %v5486_v46 = vld [vmem:[%s5690_s7 + $0x2] ss:$0 sm:$0xff] }
 0x5e0   : > { %v2800_v49 = vpack.c.bf16 %v2776_v17, %v2775_v58 }
 0x5e1   : > { %v2799_v61 = vpack.c.bf16 %v2774_v4, %v2773_v3  ;;  %v3559_v23 = vpop.f32.mrb[12].mxu1 }
 0x5e2   : > { %v2707_v48 = vadd.f32 %v3559_v23, %v5449_v45  ;;  %v2698_v60 = vpop.f32.mrb[13].mxu1 }
 0x5e3   : > { %v2699_v38 = vadd.f32 %v5449_v45, %v2698_v60  ;;  %v3560_v6 = vpop.f32.mrb[14].mxu1  ;;  %3601 = vmatprep.mubr.bf16.mxu1 %v2799_v61  ;;  %v5502_v60 = vld [vmem:[%s5690_s7 + $0x4] ss:$0 sm:$0xff] }
 0x5e4   : > { %v2710_v28 = vadd.f32 %v3560_v6, %v5449_v45  ;;  %v2701_v1 = vpop.f32.mrb[15].mxu1  ;;  %3602 = vmatmul.mubr.bf16.gmra.mrb[40].mxu1 %v2800_v49  ;;  %v2779_v16 = vmax.f32 %v2707_v48, 0.0 }
 0x5e5   : > { %v2702_v57 = vadd.f32 %v5449_v45, %v2701_v1  ;;  %v2777_v33 = vmax.f32 %v2699_v38, 0.0 }
 0x5e6   : > { %v2780_v56 = vmax.f32 %v2710_v28, 0.0 }
 0x5e7   : > { %v2778_v14 = vmax.f32 %v2702_v57, 0.0 }
 0x5e8   : > { %v2802_v51 = vpack.c.bf16 %v2780_v56, %v2779_v16 }
 0x5e9   : > { %v2801_v25 = vpack.c.bf16 %v2778_v14, %v2777_v33  ;;  %v3563_v55 = vpop.f32.mrb[16].mxu1 }
 0x5ea   : > { %v2723_v54 = vadd.f32 %v3563_v55, %v5449_v45  ;;  %v2714_v35 = vpop.f32.mrb[17].mxu1 }
 0x5eb   : > { %v2715_v9 = vadd.f32 %v5449_v45, %v2714_v35  ;;  %v3564_v18 = vpop.f32.mrb[18].mxu1  ;;  %3605 = vmatprep.mubr.bf16.mxu1 %v2801_v25 }
 0x5ec   : > { %v2726_v15 = vadd.f32 %v3564_v18, %v5449_v45  ;;  %v2717_v47 = vpop.f32.mrb[19].mxu1  ;;  %3606 = vmatmul.mubr.bf16.gmra.mrb[44].mxu1 %v2802_v51  ;;  %v2783_v29 = vmax.f32 %v2723_v54, 0.0 }
 0x5ed   : > { %v2718_v24 = vadd.f32 %v5449_v45, %v2717_v47  ;;  %v2781_v0 = vmax.f32 %v2715_v9, 0.0 }
 0x5ee   : > { %v2784_v63 = vmax.f32 %v2726_v15, 0.0 }
 0x5ef   : > { %v2782_v21 = vmax.f32 %v2718_v24, 0.0 }
 0x5f0   : > { %v2804_v30 = vpack.c.bf16 %v2784_v63, %v2783_v29 }
 0x5f1   : > { %v2803_v43 = vpack.c.bf16 %v2782_v21, %v2781_v0 }
 0x5f3   : > { %3609 = vmatprep.mubr.bf16.mxu1 %v2803_v43 }
 0x5f4   : > { %3610 = vmatmul.mubr.bf16.gmra.mrb[48].mxu1 %v2804_v30 }
 0x5f7   : > { %v3567_v42 = vpop.f32.mrb[20].mxu1 }
 0x5f8   : > { %v2739_v31 = vadd.f32 %v3567_v42, %v5449_v45  ;;  %v2730_v34 = vpop.f32.mrb[21].mxu1 }
 0x5f9   : > { %v2731_v52 = vadd.f32 %v5449_v45, %v2730_v34  ;;  %v3568_v19 = vpop.f32.mrb[22].mxu1 }
 0x5fa   : > { %v2742_v10 = vadd.f32 %v3568_v19, %v5449_v45  ;;  %v2733_v59 = vpop.f32.mrb[23].mxu1  ;;  %v2787_v44 = vmax.f32 %v2739_v31, 0.0 }
 0x5fb   : > { %v2734_v53 = vadd.f32 %v5449_v45, %v2733_v59  ;;  %v2785_v27 = vmax.f32 %v2731_v52, 0.0 }
 0x5fc   : > { %v2788_v11 = vmax.f32 %v2742_v10, 0.0 }
 0x5fd   : > { %v2786_v20 = vmax.f32 %v2734_v53, 0.0 }
 0x5fe   : > { %v2806_v26 = vpack.c.bf16 %v2788_v11, %v2787_v44 }
 0x5ff   : > { %v2805_v40 = vpack.c.bf16 %v2786_v20, %v2785_v27 }
 0x601   : > { %3613 = vmatprep.mubr.bf16.mxu1 %v2805_v40 }
 0x602   : > { %3614 = vmatmul.mubr.bf16.gmra.mrb[52].mxu1 %v2806_v26 }
 0x61b   : > { %v3571_v37 = vpop.f32.mrb[24].mxu1 }
 0x61c   : > { %v2755_v2 = vadd.f32 %v3571_v37, %v5449_v45  ;;  %v2746_v62 = vpop.f32.mrb[25].mxu1 }
 0x61d   : > { %v2747_v5 = vadd.f32 %v5449_v45, %v2746_v62  ;;  %v3572_v32 = vpop.f32.mrb[26].mxu1 }
 0x61e   : > { %v2758_v36 = vadd.f32 %v3572_v32, %v5449_v45  ;;  %v2749_v50 = vpop.f32.mrb[27].mxu1  ;;  %v2791_v7 = vmax.f32 %v2755_v2, 0.0 }
 0x61f   : > { %v2750_v39 = vadd.f32 %v5449_v45, %v2749_v50  ;;  %v2789_v8 = vmax.f32 %v2747_v5, 0.0  ;;  %v5493_v45 = vld [vmem:[%s5690_s7 + $0x3] ss:$0 sm:$0xff] }
 0x620   : > { %v2792_v12 = vmax.f32 %v2758_v36, 0.0 }
 0x621   : > { %v2790_v13 = vmax.f32 %v2750_v39, 0.0 }
 0x622   : > { %v2808_v22 = vpack.c.bf16 %v2792_v12, %v2791_v7 }
 0x623   : > { %v2807_v41 = vpack.c.bf16 %v2790_v13, %v2789_v8 }
 0x625   : > { %3617 = vmatprep.mubr.bf16.mxu1 %v2807_v41 }
 0x626   : > { %3618 = vmatmul.mubr.bf16.gmra.mrb[56].mxu1 %v2808_v22 }
 0x69f   : > { %v3591_v58 = vpop.f32.mrb[28].mxu1 }
 0x6a0   : > { %v2921_v17 = vadd.f32 %v3591_v58, %v5486_v46  ;;  %v2912_v3 = vpop.f32.mrb[29].mxu1 }
 0x6a1   : > { %v2913_v4 = vadd.f32 %v5486_v46, %v2912_v3  ;;  %v3592_v49 = vpop.f32.mrb[30].mxu1 }
 0x6a2   : > { %v3041_v61 = vmax.f32 %v2921_v17, 0.0  ;;  %v2924_v23 = vadd.f32 %v3592_v49, %v5486_v46  ;;  %v2915_v48 = vpop.f32.mrb[31].mxu1 }
 0x6a3   : > { %v3039_v38 = vmax.f32 %v2913_v4, 0.0  ;;  %v2916_v6 = vadd.f32 %v5486_v46, %v2915_v48 }
 0x6a4   : > { %v3078_v28 = vmul.f32 %v5493_v45, %v3041_v61  ;;  %v3042_v1 = vmax.f32 %v2924_v23, 0.0 }
 0x6a5   : > { %v3076_v57 = vmul.f32 %v5493_v45, %v3039_v38  ;;  %v3040_v16 = vmax.f32 %v2916_v6, 0.0 }
 0x6a6   : > { %v3115_v56 = vadd.f32 %v5502_v60, %v3078_v28  ;;  %v3079_v33 = vmul.f32 %v5493_v45, %v3042_v1 }
 0x6a7   : > { %v3113_v14 = vadd.f32 %v5502_v60, %v3076_v57  ;;  %v3077_v51 = vmul.f32 %v5493_v45, %v3040_v16  ;;  %v3595_v25 = vpop.f32.mrb[32].mxu1 }
 0x6a8   : > { %3147 = vst [vmem:[%s5511_s19 + $0x10] sm:$0xff] %v3115_v56  ;;  %v3116_v55 = vadd.f32 %v5502_v60, %v3079_v33  ;;  %v2937_v54 = vadd.f32 %v3595_v25, %v5486_v46  ;;  %v2928_v35 = vpop.f32.mrb[33].mxu1 }
 0x6a9   : > { %3145 = vst [vmem:[%s5511_s19] sm:$0xff] %v3113_v14  ;;  %v3114_v9 = vadd.f32 %v5502_v60, %v3077_v51  ;;  %v2929_v18 = vadd.f32 %v5486_v46, %v2928_v35  ;;  %v3596_v15 = vpop.f32.mrb[34].mxu1 }
 0x6aa   : > { %3148 = vst [vmem:[%s5511_s19 + $0x18] sm:$0xff] %v3116_v55  ;;  %v3045_v47 = vmax.f32 %v2937_v54, 0.0  ;;  %v2940_v24 = vadd.f32 %v3596_v15, %v5486_v46  ;;  %v2931_v29 = vpop.f32.mrb[35].mxu1 }
 0x6ab   : > { %3146 = vst [vmem:[%s5511_s19 + $0x8] sm:$0xff] %v3114_v9  ;;  %v3043_v63 = vmax.f32 %v2929_v18, 0.0  ;;  %v2932_v0 = vadd.f32 %v5486_v46, %v2931_v29 }
 0x6ac   : > { %v3082_v21 = vmul.f32 %v5493_v45, %v3045_v47  ;;  %v3046_v30 = vmax.f32 %v2940_v24, 0.0 }
 0x6ad   : > { %v3080_v43 = vmul.f32 %v5493_v45, %v3043_v63  ;;  %v3044_v42 = vmax.f32 %v2932_v0, 0.0 }
 0x6ae   : > { %v3119_v31 = vadd.f32 %v5502_v60, %v3082_v21  ;;  %v3083_v34 = vmul.f32 %v5493_v45, %v3046_v30 }
 0x6af   : > { %v3117_v52 = vadd.f32 %v5502_v60, %v3080_v43  ;;  %v3081_v19 = vmul.f32 %v5493_v45, %v3044_v42  ;;  %v3599_v10 = vpop.f32.mrb[36].mxu1 }
 0x6b0   : > { %3151 = vst [vmem:[%s5511_s19 + $0x30] sm:$0xff] %v3119_v31  ;;  %v3120_v59 = vadd.f32 %v5502_v60, %v3083_v34  ;;  %v2953_v53 = vadd.f32 %v3599_v10, %v5486_v46  ;;  %v2944_v44 = vpop.f32.mrb[37].mxu1 }
 0x6b1   : > { %3149 = vst [vmem:[%s5511_s19 + $0x20] sm:$0xff] %v3117_v52  ;;  %v3118_v11 = vadd.f32 %v5502_v60, %v3081_v19  ;;  %v2945_v27 = vadd.f32 %v5486_v46, %v2944_v44  ;;  %v3600_v20 = vpop.f32.mrb[38].mxu1 }
 0x6b2   : > { %3152 = vst [vmem:[%s5511_s19 + $0x38] sm:$0xff] %v3120_v59  ;;  %v3049_v26 = vmax.f32 %v2953_v53, 0.0  ;;  %v2956_v40 = vadd.f32 %v3600_v20, %v5486_v46  ;;  %v2947_v37 = vpop.f32.mrb[39].mxu1 }
 0x6b3   : > { %3150 = vst [vmem:[%s5511_s19 + $0x28] sm:$0xff] %v3118_v11  ;;  %v3047_v2 = vmax.f32 %v2945_v27, 0.0  ;;  %v2948_v62 = vadd.f32 %v5486_v46, %v2947_v37 }
 0x6b4   : > { %v3086_v5 = vmul.f32 %v5493_v45, %v3049_v26  ;;  %v3050_v32 = vmax.f32 %v2956_v40, 0.0 }
 0x6b5   : > { %v3084_v36 = vmul.f32 %v5493_v45, %v3047_v2  ;;  %v3048_v50 = vmax.f32 %v2948_v62, 0.0 }
 0x6b6   : > { %v3123_v39 = vadd.f32 %v5502_v60, %v3086_v5  ;;  %v3087_v7 = vmul.f32 %v5493_v45, %v3050_v32 }
 0x6b7   : > { %v3121_v12 = vadd.f32 %v5502_v60, %v3084_v36  ;;  %v3085_v8 = vmul.f32 %v5493_v45, %v3048_v50  ;;  %v3603_v13 = vpop.f32.mrb[40].mxu1 }
 0x6b8   : > { %3155 = vst [vmem:[%s5511_s19 + $0x50] sm:$0xff] %v3123_v39  ;;  %v3124_v22 = vadd.f32 %v5502_v60, %v3087_v7  ;;  %v2969_v41 = vadd.f32 %v3603_v13, %v5486_v46  ;;  %v2960_v58 = vpop.f32.mrb[41].mxu1 }
 0x6b9   : > { %3153 = vst [vmem:[%s5511_s19 + $0x40] sm:$0xff] %v3121_v12  ;;  %v3122_v17 = vadd.f32 %v5502_v60, %v3085_v8  ;;  %v2961_v3 = vadd.f32 %v5486_v46, %v2960_v58  ;;  %v3604_v4 = vpop.f32.mrb[42].mxu1 }
 0x6ba   : > { %3156 = vst [vmem:[%s5511_s19 + $0x58] sm:$0xff] %v3124_v22  ;;  %v3053_v49 = vmax.f32 %v2969_v41, 0.0  ;;  %v2972_v61 = vadd.f32 %v3604_v4, %v5486_v46  ;;  %v2963_v23 = vpop.f32.mrb[43].mxu1 }
 0x6bb   : > { %3154 = vst [vmem:[%s5511_s19 + $0x48] sm:$0xff] %v3122_v17  ;;  %v3051_v48 = vmax.f32 %v2961_v3, 0.0  ;;  %v2964_v38 = vadd.f32 %v5486_v46, %v2963_v23 }
 0x6bc   : > { %v3090_v6 = vmul.f32 %v5493_v45, %v3053_v49  ;;  %v3054_v28 = vmax.f32 %v2972_v61, 0.0 }
 0x6bd   : > { %v3088_v1 = vmul.f32 %v5493_v45, %v3051_v48  ;;  %v3052_v57 = vmax.f32 %v2964_v38, 0.0 }
 0x6be   : > { %v3127_v16 = vadd.f32 %v5502_v60, %v3090_v6  ;;  %v3091_v56 = vmul.f32 %v5493_v45, %v3054_v28 }
 0x6bf   : > { %v3125_v33 = vadd.f32 %v5502_v60, %v3088_v1  ;;  %v3089_v14 = vmul.f32 %v5493_v45, %v3052_v57  ;;  %v3607_v51 = vpop.f32.mrb[44].mxu1 }
 0x6c0   : > { %3159 = vst [vmem:[%s5511_s19 + $0x70] sm:$0xff] %v3127_v16  ;;  %v3128_v25 = vadd.f32 %v5502_v60, %v3091_v56  ;;  %v2985_v55 = vadd.f32 %v3607_v51, %v5486_v46  ;;  %v2976_v54 = vpop.f32.mrb[45].mxu1 }
 0x6c1   : > { %3157 = vst [vmem:[%s5511_s19 + $0x60] sm:$0xff] %v3125_v33  ;;  %v3126_v35 = vadd.f32 %v5502_v60, %v3089_v14  ;;  %v2977_v9 = vadd.f32 %v5486_v46, %v2976_v54  ;;  %v3608_v18 = vpop.f32.mrb[46].mxu1 }
 0x6c2   : > { %3160 = vst [vmem:[%s5511_s19 + $0x78] sm:$0xff] %v3128_v25  ;;  %v3057_v15 = vmax.f32 %v2985_v55, 0.0  ;;  %v2988_v47 = vadd.f32 %v3608_v18, %v5486_v46  ;;  %v2979_v24 = vpop.f32.mrb[47].mxu1 }
 0x6c3   : > { %3158 = vst [vmem:[%s5511_s19 + $0x68] sm:$0xff] %v3126_v35  ;;  %v3055_v29 = vmax.f32 %v2977_v9, 0.0  ;;  %v2980_v63 = vadd.f32 %v5486_v46, %v2979_v24 }
 0x6c4   : > { %v3094_v0 = vmul.f32 %v5493_v45, %v3057_v15  ;;  %v3058_v21 = vmax.f32 %v2988_v47, 0.0 }
 0x6c5   : > { %v3092_v30 = vmul.f32 %v5493_v45, %v3055_v29  ;;  %v3056_v43 = vmax.f32 %v2980_v63, 0.0 }
 0x6c6   : > { %v3131_v42 = vadd.f32 %v5502_v60, %v3094_v0  ;;  %v3095_v31 = vmul.f32 %v5493_v45, %v3058_v21 }
 0x6c7   : > { %v3129_v34 = vadd.f32 %v5502_v60, %v3092_v30  ;;  %v3093_v52 = vmul.f32 %v5493_v45, %v3056_v43  ;;  %v3611_v19 = vpop.f32.mrb[48].mxu1 }
 0x6c8   : > { %3163 = vst [vmem:[%s5511_s19 + $0x90] sm:$0xff] %v3131_v42  ;;  %v3132_v10 = vadd.f32 %v5502_v60, %v3095_v31  ;;  %v3001_v59 = vadd.f32 %v3611_v19, %v5486_v46  ;;  %v2992_v53 = vpop.f32.mrb[49].mxu1 }
 0x6c9   : > { %3161 = vst [vmem:[%s5511_s19 + $0x80] sm:$0xff] %v3129_v34  ;;  %v3130_v44 = vadd.f32 %v5502_v60, %v3093_v52  ;;  %v2993_v11 = vadd.f32 %v5486_v46, %v2992_v53  ;;  %v3612_v27 = vpop.f32.mrb[50].mxu1 }
 0x6ca   : > { %3164 = vst [vmem:[%s5511_s19 + $0x98] sm:$0xff] %v3132_v10  ;;  %v3061_v20 = vmax.f32 %v3001_v59, 0.0  ;;  %v3004_v26 = vadd.f32 %v3612_v27, %v5486_v46  ;;  %v2995_v40 = vpop.f32.mrb[51].mxu1 }
 0x6cb   : > { %3162 = vst [vmem:[%s5511_s19 + $0x88] sm:$0xff] %v3130_v44  ;;  %v3059_v37 = vmax.f32 %v2993_v11, 0.0  ;;  %v2996_v2 = vadd.f32 %v5486_v46, %v2995_v40 }
 0x6cc   : > { %v3098_v62 = vmul.f32 %v5493_v45, %v3061_v20  ;;  %v3062_v5 = vmax.f32 %v3004_v26, 0.0 }
 0x6cd   : > { %v3096_v32 = vmul.f32 %v5493_v45, %v3059_v37  ;;  %v3060_v36 = vmax.f32 %v2996_v2, 0.0 }
 0x6ce   : > { %v3135_v50 = vadd.f32 %v5502_v60, %v3098_v62  ;;  %v3099_v39 = vmul.f32 %v5493_v45, %v3062_v5 }
 0x6cf   : > { %v3133_v7 = vadd.f32 %v5502_v60, %v3096_v32  ;;  %v3097_v12 = vmul.f32 %v5493_v45, %v3060_v36 }
 0x6d0   : > { %3167 = vst [vmem:[%s5511_s19 + $0xb0] sm:$0xff] %v3135_v50  ;;  %v3136_v8 = vadd.f32 %v5502_v60, %v3099_v39 }
 0x6d1   : > { %3165 = vst [vmem:[%s5511_s19 + $0xa0] sm:$0xff] %v3133_v7  ;;  %v3134_v13 = vadd.f32 %v5502_v60, %v3097_v12 }
 0x6d2   : > { %3168 = vst [vmem:[%s5511_s19 + $0xb8] sm:$0xff] %v3136_v8 }
 0x6d3   : > { %3166 = vst [vmem:[%s5511_s19 + $0xa8] sm:$0xff] %v3134_v13 }
 0x6d5   : > { %v3615_v22 = vpop.f32.mrb[52].mxu1 }
 0x6d6   : > { %v3017_v41 = vadd.f32 %v3615_v22, %v5486_v46  ;;  %v3008_v58 = vpop.f32.mrb[53].mxu1 }
 0x6d7   : > { %v3009_v17 = vadd.f32 %v5486_v46, %v3008_v58  ;;  %v3616_v3 = vpop.f32.mrb[54].mxu1 }
 0x6d8   : > { %v3065_v4 = vmax.f32 %v3017_v41, 0.0  ;;  %v3020_v49 = vadd.f32 %v3616_v3, %v5486_v46  ;;  %v3011_v61 = vpop.f32.mrb[55].mxu1 }
 0x6d9   : > { %v3063_v23 = vmax.f32 %v3009_v17, 0.0  ;;  %v3012_v48 = vadd.f32 %v5486_v46, %v3011_v61 }
 0x6da   : > { %v3102_v38 = vmul.f32 %v5493_v45, %v3065_v4  ;;  %v3066_v6 = vmax.f32 %v3020_v49, 0.0 }
 0x6db   : > { %v3100_v28 = vmul.f32 %v5493_v45, %v3063_v23  ;;  %v3064_v1 = vmax.f32 %v3012_v48, 0.0 }
 0x6dc   : > { %v3139_v57 = vadd.f32 %v5502_v60, %v3102_v38  ;;  %v3103_v16 = vmul.f32 %v5493_v45, %v3066_v6 }
 0x6dd   : > { %v3137_v56 = vadd.f32 %v5502_v60, %v3100_v28  ;;  %v3101_v33 = vmul.f32 %v5493_v45, %v3064_v1 }
 0x6de   : > { %3171 = vst [vmem:[%s5511_s19 + $0xd0] sm:$0xff] %v3139_v57  ;;  %v3140_v14 = vadd.f32 %v5502_v60, %v3103_v16 }
 0x6df   : > { %3169 = vst [vmem:[%s5511_s19 + $0xc0] sm:$0xff] %v3137_v56  ;;  %v3138_v51 = vadd.f32 %v5502_v60, %v3101_v33 }
 0x6e0   : > { %3172 = vst [vmem:[%s5511_s19 + $0xd8] sm:$0xff] %v3140_v14 }
 0x6e1   : > { %3170 = vst [vmem:[%s5511_s19 + $0xc8] sm:$0xff] %v3138_v51 }
 0x6f9   : > { %v3619_v25 = vpop.f32.mrb[56].mxu1 }
 0x6fa   : > { %v3033_v55 = vadd.f32 %v3619_v25, %v5486_v46  ;;  %v3024_v54 = vpop.f32.mrb[57].mxu1 }
 0x6fb   : > { %v3025_v35 = vadd.f32 %v5486_v46, %v3024_v54  ;;  %v3620_v9 = vpop.f32.mrb[58].mxu1 }
 0x6fc   : > { %v3069_v18 = vmax.f32 %v3033_v55, 0.0  ;;  %v3036_v15 = vadd.f32 %v3620_v9, %v5486_v46  ;;  %v3027_v47 = vpop.f32.mrb[59].mxu1 }
 0x6fd   : > { %v3067_v24 = vmax.f32 %v3025_v35, 0.0  ;;  %v3028_v29 = vadd.f32 %v5486_v46, %v3027_v47 }
 0x6fe   : > { %v3106_v63 = vmul.f32 %v5493_v45, %v3069_v18  ;;  %v3070_v0 = vmax.f32 %v3036_v15, 0.0 }
 0x6ff   : > { %v3104_v21 = vmul.f32 %v5493_v45, %v3067_v24  ;;  %v3068_v30 = vmax.f32 %v3028_v29, 0.0 }
 0x700   : > { %v3143_v43 = vadd.f32 %v5502_v60, %v3106_v63  ;;  %v3107_v42 = vmul.f32 %v5493_v45, %v3070_v0 }
 0x701   : > { %v3141_v31 = vadd.f32 %v5502_v60, %v3104_v21  ;;  %v3105_v46 = vmul.f32 %v5493_v45, %v3068_v30 }
 0x702   : > { %3175 = vst [vmem:[%s5511_s19 + $0xf0] sm:$0xff] %v3143_v43  ;;  %v3144_v34 = vadd.f32 %v5502_v60, %v3107_v42 }
 0x703   : > { %3173 = vst [vmem:[%s5511_s19 + $0xe0] sm:$0xff] %v3141_v31  ;;  %v3142_v52 = vadd.f32 %v5502_v60, %v3105_v46 }
 0x704   : > { %3176 = vst [vmem:[%s5511_s19 + $0xf8] sm:$0xff] %v3144_v34 }
 0x705   : > { %3174 = vst [vmem:[%s5511_s19 + $0xe8] sm:$0xff] %v3142_v52 }
 0x706   : > { %3957 = shalt.err (!%p3954_p3)
}
 0x707   : > { %s3958_s25 = scalar_lea.hbm %s5632_s24, 4096  ;;  %s3962_s19 = scalar_lea.hbm %s5691_s8, 8192 }
 0x708   : > { %p3959_p4 = scmp.ne.s32.totalorder %s5632_s24, %s3958_s25  ;;  %p3963_p9 = scmp.lt.u32.totalorder %s5632_s24, %s5691_s8 }
 0x709   : > { %p3964_p10 = scmp.lt.u32.totalorder %s3962_s19, %s3958_s25  ;;  %p3966_p12 = scmp.lt.u32.totalorder %s3958_s25, %s5632_s24 }
 0x70a   : > { %p3960_p7 = pnand %p3959_p4, %p4098_p5 }
 0x70b   : > { %p3965_p11 = por %p3964_p10, %p3963_p9 }
 0x70c   : > { %p3961_p8 = pneg %p3960_p7 }
 0x70d   : > { %p3967_p13 = por %p3966_p12, %p3965_p11 }
 0x70f   : > { %p3968_p0 = pnand %p3967_p13, %p3961_p8 }
 0x711   : > { %3971 = shalt.err (!%p3968_p0)
}
 0x712   : > { %s4013_s17 = smov 128   ;;  %s4014_s23 = smov 8  }
 0x713   : > { %3669 = dma.vmem_to_hbm [thread:$0]  (%p4098_p5), %s5634_s21, 4096, %s5632_s24, %s5642_s9, %s4013_s17, %s4013_s17, %s4014_s23  }
 0x714 PF: > { %p3675_p1 = scmp.ge.s32.totalorder %s4006_s30, 2  ;;  %s3206_s26 = sand.u32 1, %s3994_s27  }
 0x715   : > { %s3207_s10 = scalar_lea.sflag [#allocation3], %s3206_s26 }
 0x716   : > { %p3672_p2 = pnand %p3675_p1, %p4102_p6 }
 0x718   : > { %3989 = dma.done.wait (!%p3672_p2), %s3207_s10, 4096  }
 0x719   : > { %3991 = vsyncadd (!%p3672_p2), %s3207_s10, 4294963200  ;;  %p18_p3 = scmp.ge.s32.totalorder %s4085_s11, 4   ;;  %s5776_s27 = smov %s3998_s28 }
 0x71a   : > { %s5777_s28 = smov %s4002_s29  ;;  %s5778_s29 = smov %s4096_s14 }
 0x71b   : > { %s5779_s30 = smov %s4085_s11  ;;  %20 = sbr.rel (!%p18_p3) target bundleno = 3 (0x3), region = 90 }
 0x722   :  { %3212 = vsyncpa [#allocation3], 1 }
 0x723   :  { %3214 = vsyncpa [#allocation3 + $0x1], 1 }

</bundles_post_ra>
